<compile_context>
chip_gen: v6e
topology: v6e:2x2x1
jax: 0.10.0
libtpu: 0.0.40
codegen_flags: <defaults>
</compile_context>

<pallas_src>
import math

import numpy as np
import jax
import jax.numpy as jnp
from jax import lax
from jax.experimental import pallas as pl
from jax.experimental.pallas import tpu as pltpu

BN_EPS = 1e-5


# ------------------------------ trace-time helpers --------------------------

def _out_len(lin, k, s, p):
    return (lin + 2 * p - k) // s + 1


def _even_select(bt, lout, lin):
    """Block-diagonal 0/1 matrix selecting per-sample even rows (stride-2)."""
    s = np.zeros((lout, lin), np.float32)
    s[np.arange(lout), 2 * np.arange(lout)] = 1.0
    return np.kron(np.eye(bt, dtype=np.float32), s)


def _fold_conv_bn(conv, bn):
    """Fold eval-mode BN into conv: (K*Cin, Cout) weight + (1, Cout) shift."""
    w, b = conv                                  # (Cout, Cin, K), (Cout,)
    gamma, beta, mean, var = bn
    scale = gamma / jnp.sqrt(var + BN_EPS)       # (Cout,)
    wmat = (jnp.transpose(w, (2, 1, 0)) * scale).reshape(-1, w.shape[0])
    shift = (beta + (b - mean) * scale).reshape(1, -1)
    return wmat, shift


def _pack_slab(mats, lanes, dtype, row_align):
    """Stack 2-D operands into one (R, lanes) slab; return slab + (row, rows, cols)."""
    pieces, offs, row = [], [], 0
    for m in mats:
        m = jnp.asarray(m)
        rows, cols = m.shape
        rpad = (-rows) % row_align
        pieces.append(jnp.pad(m.astype(dtype), ((0, rpad), (0, lanes - cols))))
        offs.append((row, rows, cols))
        row += rows + rpad
    return jnp.concatenate(pieces, axis=0), offs


def _stem_im2col(x, k, stride, pad):
    """x: (B, L0, Cin) -> (B, L1, K*Cin) im2col of the stem conv (tiny, XLA side)."""
    b, l0, cin = x.shape
    l1 = _out_len(l0, k, stride, pad)
    xp = jnp.pad(x, ((0, 0), (pad, pad), (0, 0)))
    taps = [xp[:, kk: kk + stride * (l1 - 1) + 1: stride, :] for kk in range(k)]
    return jnp.concatenate(taps, axis=-1), l1


# --------------------------------- wrapper -----------------------------------

def forward(x_ncl, params, samples_per_step=None):
    # x_ncl: (B, C_in, L) like PyTorch; channels-last inside the kernel.
    x = jnp.transpose(x_ncl, (0, 2, 1)).astype(jnp.float32)      # (B, L0, Cin)
    b, l0, cin = x.shape
    ncls = params["fc_b"].shape[0]

    # samples stacked per grid step (keep grid >= 2 so 2-TC chips split work)
    if samples_per_step is None:
        bt = 1
        for cand in (8, 4, 2):
            if b % cand == 0 and b // cand >= 2:
                bt = cand
                break
    else:
        bt = samples_per_step
    assert b % bt == 0
    g = b // bt

    l1 = _out_len(l0, 7, 2, 3)     # stem conv
    l2 = _out_len(l1, 3, 2, 1)     # maxpool
    l3 = _out_len(l2, 3, 2, 1)     # layer2 stride-2
    l4 = _out_len(l3, 3, 2, 1)     # layer3 stride-2
    assert l1 % 2 == 0 and l2 % 2 == 0 and l3 % 2 == 0 and l1 > l2 > l3

    # Stem im2col hoisted to XLA (tiny) -> stem becomes one bf16 matmul.
    x_im2col, _ = _stem_im2col(x, 7, 2, 3)                       # (B, L1, 7*Cin)
    x_in = x_im2col.astype(jnp.bfloat16).reshape(g, bt * l1, 7 * cin)

    # ---- pack all small operands into two slabs (bf16 weights, f32 shifts) ----
    wmats, shifts = [], []

    def add_conv(conv, bn):
        wm, sh = _fold_conv_bn(conv, bn)
        wmats.append(wm)
        shifts.append(sh)
        return len(wmats) - 1

    def add_pair(w, bvec):
        wmats.append(w)
        shifts.append(bvec.reshape(1, -1))
        return len(wmats) - 1

    i_stem = add_conv(params["conv0"], params["bn0"])
    block_meta = []
    for blk in params["layer1"] + params["layer2"] + params["layer3"]:
        i1 = add_conv(blk["conv1"], blk["bn1"])
        i2 = add_conv(blk["conv2"], blk["bn2"])
        idn = (add_conv(blk["down_conv"], blk["down_bn"])
               if blk["down_conv"] is not None else None)
        block_meta.append((i1, i2, idn, blk["conv1"][0].shape[1], blk["stride"]))

    aw1, ab1 = params["attn1"]          # (C//8, C, 1), (C//8,)
    aw2, ab2 = params["attn2"]          # (1, C//8, 1), (1,)
    i_aw1 = add_pair(jnp.transpose(aw1[:, :, 0]), ab1)           # (C, C//8)
    i_aw2 = add_pair(jnp.transpose(aw2[:, :, 0]), ab2)           # (C//8, 1)
    i_fc = add_pair(jnp.transpose(params["fc_w"]), params["fc_b"])  # (2C, ncls)

    # stride-2 even-row select matrices (block-diag across bt stacked samples)
    sel_index = {}
    for lin, lout in ((l1, l2), (l2, l3), (l3, l4)):
        wmats.append(jnp.asarray(_even_select(bt, lout, lin)))
        sel_index[lin] = len(wmats) - 1

    w_lanes = max(m.shape[1] for m in wmats)
    s_lanes = max(m.shape[1] for m in shifts)
    w_slab, w_offs = _pack_slab(wmats, w_lanes, jnp.bfloat16, 16)
    sh_slab, sh_offs = _pack_slab(shifts, s_lanes, jnp.float32, 1)

    # ------------------------------- the kernel -------------------------------
    def kernel(x_ref, w_ref, sh_ref, out_ref):
        f32, bf16 = jnp.float32, jnp.bfloat16

        def w_at(i):
            r, n, c = w_offs[i]
            return w_ref[r:r + n, 0:c]

        def sh_at(i):
            r, _, c = sh_offs[i]
            return sh_ref[r:r + 1, 0:c]

        def mm(xb, i, residual=None, relu=True):
            y = jnp.dot(xb, w_at(i), preferred_element_type=f32) + sh_at(i)
            if residual is not None:
                y = y + residual
            return jnp.maximum(y, 0.0) if relu else y

        def shifted(xv, length):
            # per-sample +/-1 sublane shifts with zero edge padding (XLU roll)
            n = xv.shape[0]
            pos = lax.broadcasted_iota(jnp.int32, (n, 1), 0) % length
            left = jnp.where(pos == 0, 0.0, pltpu.roll(xv, 1, axis=0))
            right = jnp.where(pos == length - 1, 0.0, pltpu.roll(xv, n - 1, axis=0))
            return left, right

        def im2col3(xv, length):
            # lane-concat [x[i-1], x[i], x[i+1]] -> (n, 3C) bf16 (one fused matmul later)
            left, right = shifted(xv, length)
            return jnp.concatenate([left, xv, right], axis=-1).astype(bf16)

        # ---- stem conv (im2col precomputed in XLA) + folded BN + ReLU ----
        y = mm(x_ref[0], i_stem)                                  # (bt*L1, 64), >= 0

        # ---- fused MaxPool(3, s2, p1): stride-1 window max + even-row select ----
        left, right = shifted(y, l1)                              # zero pad OK: y >= 0
        z = jnp.maximum(y, jnp.maximum(left, right)).astype(bf16)
        y = jnp.dot(w_at(sel_index[l1]), z, preferred_element_type=f32)  # (bt*L2, 64)

        # ---- residual trunk ----
        cur_l = l2
        for (i1, i2, idn, cin_b, stride) in block_meta:
            if stride == 1:
                h = mm(im2col3(y, cur_l), i1)
                y = mm(im2col3(h, cur_l), i2, residual=y)
            else:
                new_l = _out_len(cur_l, 3, 2, 1)
                zz = jnp.dot(w_at(sel_index[cur_l]), im2col3(y, cur_l),
                             preferred_element_type=f32).astype(bf16)  # (bt*new_l, 3Cin)
                h = mm(zz, i1)
                ident = mm(zz[:, cin_b:2 * cin_b], idn, relu=False)    # reuse centre taps
                y = mm(im2col3(h, new_l), i2, residual=ident)
                cur_l = new_l
        # y: (bt*L4, 256) f32

        # ---- attention + mean pool + fc head (bf16 matmuls, f32 softmax) ----
        h = mm(y.astype(bf16), i_aw1)                             # (bt*L4, C//8)
        s = mm(h.astype(bf16), i_aw2, relu=False)                 # (bt*L4, 1)
        e = jnp.exp(s - jnp.max(s, axis=0, keepdims=True))        # global max stabilizer
        if bt == 1:
            denom = jnp.sum(e, axis=0, keepdims=True)
            attended = jnp.sum(y * e, axis=0, keepdims=True) / denom
            pooled = jnp.mean(y, axis=0, keepdims=True)
        else:
            # per-sample segment sums via a tiny indicator matmul
            seg = (lax.broadcasted_iota(jnp.int32, (bt, bt * l4), 1) // l4 ==
                   lax.broadcasted_iota(jnp.int32, (bt, bt * l4), 0)).astype(f32)
            denom = jnp.dot(seg, e, preferred_element_type=f32)
            attended = jnp.dot(seg, y * e, preferred_element_type=f32) / denom
            pooled = jnp.dot(seg, y, preferred_element_type=f32) / float(l4)
        feat = jnp.concatenate([attended, pooled], axis=-1).astype(bf16)  # (bt, 2C)
        out_ref[0] = mm(feat, i_fc, relu=False).astype(out_ref.dtype)

    out = pl.pallas_call(
        kernel,
        grid=(g,),
        out_shape=jax.ShapeDtypeStruct((g, bt, ncls), jnp.float32),
        in_specs=[
            pl.BlockSpec((1, bt * l1, 7 * cin), lambda gg: (gg, 0, 0)),
            pl.BlockSpec(w_slab.shape, lambda gg: (0, 0)),
            pl.BlockSpec(sh_slab.shape, lambda gg: (0, 0)),
        ],
        out_specs=pl.BlockSpec((1, bt, ncls), lambda gg: (gg, 0, 0)),
        compiler_params=pltpu.CompilerParams(
            dimension_semantics=("parallel",)),
    )(x_in, w_slab, sh_slab)
    return out.reshape(b, ncls)


# --------------------------- parameter init ----------------------------------

def _conv_init(key, cout, cin, k):
    k1, k2 = jax.random.split(key)
    bound = 1.0 / math.sqrt(cin * k)
    w = jax.random.uniform(k1, (cout, cin, k), jnp.float32, -bound, bound)
    b = jax.random.uniform(k2, (cout,), jnp.float32, -bound, bound)
    return w, b


def _bn_init(key, c):
    k1, k2, k3 = jax.random.split(key, 3)
    gamma = 1.0 + 0.1 * jax.random.normal(k1, (c,), jnp.float32)
    beta = 0.1 * jax.random.normal(k2, (c,), jnp.float32)
    mean = 0.1 * jax.random.normal(k3, (c,), jnp.float32)
    var = jnp.ones((c,), jnp.float32)
    return gamma, beta, mean, var


def init_model(key, input_channels=1, num_classes=5):
    keys = iter(jax.random.split(key, 64))
    p = {}
    p["conv0"] = _conv_init(next(keys), 64, input_channels, 7)
    p["bn0"] = _bn_init(next(keys), 64)

    def block(in_c, out_c, stride):
        b = {"stride": stride}
        b["conv1"] = _conv_init(next(keys), out_c, in_c, 3)
        b["bn1"] = _bn_init(next(keys), out_c)
        b["conv2"] = _conv_init(next(keys), out_c, out_c, 3)
        b["bn2"] = _bn_init(next(keys), out_c)
        if stride != 1 or in_c != out_c:
            b["down_conv"] = _conv_init(next(keys), out_c, in_c, 1)
            b["down_bn"] = _bn_init(next(keys), out_c)
        else:
            b["down_conv"] = None
            b["down_bn"] = None
        return b

    p["layer1"] = [block(64, 64, 1), block(64, 64, 1)]
    p["layer2"] = [block(64, 128, 2), block(128, 128, 1)]
    p["layer3"] = [block(128, 256, 2), block(256, 256, 1)]
    p["attn1"] = _conv_init(next(keys), 256 // 8, 256, 1)
    p["attn2"] = _conv_init(next(keys), 1, 256 // 8, 1)
    kf1, kf2 = jax.random.split(next(keys))
    bound = 1.0 / math.sqrt(256 * 2)
    p["fc_w"] = jax.random.uniform(kf1, (num_classes, 256 * 2), jnp.float32, -bound, bound)
    p["fc_b"] = jax.random.uniform(kf2, (num_classes,), jnp.float32, -bound, bound)
    return p


# ----------------------------------- main -------------------------------------

if __name__ == "__main__":
    key = jax.random.PRNGKey(0)
    pkey, xkey = jax.random.split(key)
    params = init_model(pkey, input_channels=1, num_classes=5)

    # Small 1-D signal: batch=2, channels=1, length=64 (PyTorch NCL layout).
    x = jax.random.normal(xkey, (2, 1, 64), dtype=jnp.float32)

    fwd = jax.jit(lambda inp: forward(inp, params))
    out = jax.block_until_ready(fwd(x))
    assert out.shape == (2, 5), out.shape
    assert bool(jnp.all(jnp.isfinite(out)))
    print("KERNEL_OK")
</pallas_src>

<mosaic_0001>
module attributes {stable_mosaic.version = 11 : i64} {
  func.func @kernel(%arg0: i32, %arg1: memref<1x32x7xbf16, #tpu.memory_space<vmem>>, %arg2: memref<5856x256xbf16, #tpu.memory_space<vmem>>, %arg3: memref<18x256xf32, #tpu.memory_space<vmem>>, %arg4: memref<1x1x5xf32, #tpu.memory_space<vmem>>) attributes {dimension_semantics = [#tpu.dimension_semantics<parallel>], iteration_bounds = array<i64: 2>, scalar_prefetch = 0 : i64, scratch_operands = 0 : i64, tpu.core_type = #tpu.core_type<tc>, window_params = [{transform_indices = @transform_0, window_bounds = array<i64: 1, 32, 7>}, {pipeline_mode = #tpu.pipeline_mode<synchronous>, transform_indices = @transform_1, window_bounds = array<i64: 5856, 256>}, {pipeline_mode = #tpu.pipeline_mode<synchronous>, transform_indices = @transform_2, window_bounds = array<i64: 18, 256>}, {transform_indices = @transform_3, window_bounds = array<i64: 1, 1, 5>}]} {
    %c0 = arith.constant 0 : index
    %c0_0 = arith.constant 0 : index
    %c0_1 = arith.constant 0 : index
    %0 = vector.load %arg1[%c0, %c0_0, %c0_1] : memref<1x32x7xbf16, #tpu.memory_space<vmem>>, vector<1x32x7xbf16>
    %1 = vector.shape_cast %0 : vector<1x32x7xbf16> to vector<32x7xbf16>
    %c0_2 = arith.constant 0 : index
    %c0_3 = arith.constant 0 : index
    %2 = vector.load %arg2[%c0_2, %c0_3] : memref<5856x256xbf16, #tpu.memory_space<vmem>>, vector<7x64xbf16>
    %cst = arith.constant dense<0.000000e+00> : vector<32x64xf32>
    %3 = tpu.matmul %1, %2, %cst {dimension_numbers = #tpu.dot_dimension_numbers<[1], [0], [0], [1], [0, 0, 1, 1], [], []>} : vector<32x7xbf16>, vector<7x64xbf16>, vector<32x64xf32> -> vector<32x64xf32>
    %c0_4 = arith.constant 0 : index
    %c0_5 = arith.constant 0 : index
    %4 = vector.load %arg3[%c0_4, %c0_5] : memref<18x256xf32, #tpu.memory_space<vmem>>, vector<1x64xf32>
    %5 = vector.broadcast %4 : vector<1x64xf32> to vector<32x64xf32>
    %6 = arith.addf %3, %5 : vector<32x64xf32>
    %cst_6 = arith.constant 0.000000e+00 : f32
    %7 = vector.broadcast %cst_6 : f32 to vector<32x64xf32>
    %8 = arith.maximumf %6, %7 : vector<32x64xf32>
    %9 = tpu.iota {dimensions = array<i32: 0>} : vector<32x1xi32>
    %c32_i32 = arith.constant 32 : i32
    %c0_i32 = arith.constant 0 : i32
    %10 = arith.cmpi eq, %c32_i32, %c0_i32 : i32
    %c1_i32 = arith.constant 1 : i32
    %11 = arith.select %10, %c1_i32, %c32_i32 : i32
    %12 = vector.broadcast %11 : i32 to vector<32x1xi32>
    %13 = arith.remsi %9, %12 : vector<32x1xi32>
    %c0_i32_7 = arith.constant 0 : i32
    %14 = vector.broadcast %c0_i32_7 : i32 to vector<32x1xi32>
    %15 = arith.cmpi ne, %13, %14 : vector<32x1xi32>
    %c0_i32_8 = arith.constant 0 : i32
    %16 = vector.broadcast %c0_i32_8 : i32 to vector<32x1xi32>
    %17 = arith.cmpi slt, %13, %16 : vector<32x1xi32>
    %c0_i32_9 = arith.constant 0 : i32
    %18 = arith.cmpi slt, %11, %c0_i32_9 : i32
    %19 = vector.broadcast %18 : i1 to vector<32x1xi1>
    %20 = vector.broadcast %19 : vector<32x1xi1> to vector<32x1xi1>
    %21 = arith.xori %17, %20 : vector<32x1xi1>
    %22 = arith.andi %21, %15 : vector<32x1xi1>
    %23 = vector.broadcast %11 : i32 to vector<32x1xi32>
    %24 = arith.addi %13, %23 : vector<32x1xi32>
    %25 = arith.select %22, %24, %13 : vector<32x1xi1>, vector<32x1xi32>
    %c0_i32_10 = arith.constant 0 : i32
    %26 = vector.broadcast %c0_i32_10 : i32 to vector<32x1xi32>
    %27 = arith.cmpi eq, %25, %26 : vector<32x1xi32>
    %c1_i32_11 = arith.constant 1 : i32
    %28 = tpu.dynamic_rotate %8 by %c1_i32_11 dim 0 : vector<32x64xf32>, i32 -> vector<32x64xf32>
    %cst_12 = arith.constant 0.000000e+00 : f32
    %29 = vector.shape_cast %27 : vector<32x1xi1> to vector<32x1xi1>
    %30 = vector.broadcast %29 : vector<32x1xi1> to vector<32x64xi1>
    %31 = vector.broadcast %cst_12 : f32 to vector<32x64xf32>
    %32 = arith.select %30, %31, %28 : vector<32x64xi1>, vector<32x64xf32>
    %c31_i32 = arith.constant 31 : i32
    %33 = vector.broadcast %c31_i32 : i32 to vector<32x1xi32>
    %34 = arith.cmpi eq, %25, %33 : vector<32x1xi32>
    %c31_i32_13 = arith.constant 31 : i32
    %35 = tpu.dynamic_rotate %8 by %c31_i32_13 dim 0 : vector<32x64xf32>, i32 -> vector<32x64xf32>
    %cst_14 = arith.constant 0.000000e+00 : f32
    %36 = vector.shape_cast %34 : vector<32x1xi1> to vector<32x1xi1>
    %37 = vector.broadcast %36 : vector<32x1xi1> to vector<32x64xi1>
    %38 = vector.broadcast %cst_14 : f32 to vector<32x64xf32>
    %39 = arith.select %37, %38, %35 : vector<32x64xi1>, vector<32x64xf32>
    %40 = arith.maximumf %32, %39 : vector<32x64xf32>
    %41 = arith.maximumf %8, %40 : vector<32x64xf32>
    %42 = arith.truncf %41 : vector<32x64xf32> to vector<32x64xbf16>
    %c5808 = arith.constant 5808 : index
    %c0_15 = arith.constant 0 : index
    %43 = vector.load %arg2[%c5808, %c0_15] : memref<5856x256xbf16, #tpu.memory_space<vmem>>, vector<16x32xbf16>
    %cst_16 = arith.constant dense<0.000000e+00> : vector<16x64xf32>
    %44 = tpu.matmul %43, %42, %cst_16 {dimension_numbers = #tpu.dot_dimension_numbers<[1], [0], [0], [1], [0, 0, 1, 1], [], []>} : vector<16x32xbf16>, vector<32x64xbf16>, vector<16x64xf32> -> vector<16x64xf32>
    %45 = tpu.iota {dimensions = array<i32: 0>} : vector<16x1xi32>
    %c16_i32 = arith.constant 16 : i32
    %c0_i32_17 = arith.constant 0 : i32
    %46 = arith.cmpi eq, %c16_i32, %c0_i32_17 : i32
    %c1_i32_18 = arith.constant 1 : i32
    %47 = arith.select %46, %c1_i32_18, %c16_i32 : i32
    %48 = vector.broadcast %47 : i32 to vector<16x1xi32>
    %49 = arith.remsi %45, %48 : vector<16x1xi32>
    %c0_i32_19 = arith.constant 0 : i32
    %50 = vector.broadcast %c0_i32_19 : i32 to vector<16x1xi32>
    %51 = arith.cmpi ne, %49, %50 : vector<16x1xi32>
    %c0_i32_20 = arith.constant 0 : i32
    %52 = vector.broadcast %c0_i32_20 : i32 to vector<16x1xi32>
    %53 = arith.cmpi slt, %49, %52 : vector<16x1xi32>
    %c0_i32_21 = arith.constant 0 : i32
    %54 = arith.cmpi slt, %47, %c0_i32_21 : i32
    %55 = vector.broadcast %54 : i1 to vector<16x1xi1>
    %56 = vector.broadcast %55 : vector<16x1xi1> to vector<16x1xi1>
    %57 = arith.xori %53, %56 : vector<16x1xi1>
    %58 = arith.andi %57, %51 : vector<16x1xi1>
    %59 = vector.broadcast %47 : i32 to vector<16x1xi32>
    %60 = arith.addi %49, %59 : vector<16x1xi32>
    %61 = arith.select %58, %60, %49 : vector<16x1xi1>, vector<16x1xi32>
    %c0_i32_22 = arith.constant 0 : i32
    %62 = vector.broadcast %c0_i32_22 : i32 to vector<16x1xi32>
    %63 = arith.cmpi eq, %61, %62 : vector<16x1xi32>
    %c1_i32_23 = arith.constant 1 : i32
    %64 = tpu.dynamic_rotate %44 by %c1_i32_23 dim 0 : vector<16x64xf32>, i32 -> vector<16x64xf32>
    %cst_24 = arith.constant 0.000000e+00 : f32
    %65 = vector.shape_cast %63 : vector<16x1xi1> to vector<16x1xi1>
    %66 = vector.broadcast %65 : vector<16x1xi1> to vector<16x64xi1>
    %67 = vector.broadcast %cst_24 : f32 to vector<16x64xf32>
    %68 = arith.select %66, %67, %64 : vector<16x64xi1>, vector<16x64xf32>
    %c15_i32 = arith.constant 15 : i32
    %69 = vector.broadcast %c15_i32 : i32 to vector<16x1xi32>
    %70 = arith.cmpi eq, %61, %69 : vector<16x1xi32>
    %c15_i32_25 = arith.constant 15 : i32
    %71 = tpu.dynamic_rotate %44 by %c15_i32_25 dim 0 : vector<16x64xf32>, i32 -> vector<16x64xf32>
    %cst_26 = arith.constant 0.000000e+00 : f32
    %72 = vector.shape_cast %70 : vector<16x1xi1> to vector<16x1xi1>
    %73 = vector.broadcast %72 : vector<16x1xi1> to vector<16x64xi1>
    %74 = vector.broadcast %cst_26 : f32 to vector<16x64xf32>
    %75 = arith.select %73, %74, %71 : vector<16x64xi1>, vector<16x64xf32>
    %76 = tpu.concatenate %68, %44, %75 in 1 : vector<16x64xf32>, vector<16x64xf32>, vector<16x64xf32> -> vector<16x192xf32>
    %77 = arith.truncf %76 : vector<16x192xf32> to vector<16x192xbf16>
    %c16 = arith.constant 16 : index
    %c0_27 = arith.constant 0 : index
    %78 = vector.load %arg2[%c16, %c0_27] : memref<5856x256xbf16, #tpu.memory_space<vmem>>, vector<192x64xbf16>
    %cst_28 = arith.constant dense<0.000000e+00> : vector<16x64xf32>
    %79 = tpu.matmul %77, %78, %cst_28 {dimension_numbers = #tpu.dot_dimension_numbers<[1], [0], [0], [1], [0, 0, 1, 1], [], []>} : vector<16x192xbf16>, vector<192x64xbf16>, vector<16x64xf32> -> vector<16x64xf32>
    %c1 = arith.constant 1 : index
    %c0_29 = arith.constant 0 : index
    %80 = vector.load %arg3[%c1, %c0_29] : memref<18x256xf32, #tpu.memory_space<vmem>>, vector<1x64xf32>
    %81 = vector.broadcast %80 : vector<1x64xf32> to vector<16x64xf32>
    %82 = arith.addf %79, %81 : vector<16x64xf32>
    %cst_30 = arith.constant 0.000000e+00 : f32
    %83 = vector.broadcast %cst_30 : f32 to vector<16x64xf32>
    %84 = arith.maximumf %82, %83 : vector<16x64xf32>
    %85 = tpu.iota {dimensions = array<i32: 0>} : vector<16x1xi32>
    %c16_i32_31 = arith.constant 16 : i32
    %c0_i32_32 = arith.constant 0 : i32
    %86 = arith.cmpi eq, %c16_i32_31, %c0_i32_32 : i32
    %c1_i32_33 = arith.constant 1 : i32
    %87 = arith.select %86, %c1_i32_33, %c16_i32_31 : i32
    %88 = vector.broadcast %87 : i32 to vector<16x1xi32>
    %89 = arith.remsi %85, %88 : vector<16x1xi32>
    %c0_i32_34 = arith.constant 0 : i32
    %90 = vector.broadcast %c0_i32_34 : i32 to vector<16x1xi32>
    %91 = arith.cmpi ne, %89, %90 : vector<16x1xi32>
    %c0_i32_35 = arith.constant 0 : i32
    %92 = vector.broadcast %c0_i32_35 : i32 to vector<16x1xi32>
    %93 = arith.cmpi slt, %89, %92 : vector<16x1xi32>
    %c0_i32_36 = arith.constant 0 : i32
    %94 = arith.cmpi slt, %87, %c0_i32_36 : i32
    %95 = vector.broadcast %94 : i1 to vector<16x1xi1>
    %96 = vector.broadcast %95 : vector<16x1xi1> to vector<16x1xi1>
    %97 = arith.xori %93, %96 : vector<16x1xi1>
    %98 = arith.andi %97, %91 : vector<16x1xi1>
    %99 = vector.broadcast %87 : i32 to vector<16x1xi32>
    %100 = arith.addi %89, %99 : vector<16x1xi32>
    %101 = arith.select %98, %100, %89 : vector<16x1xi1>, vector<16x1xi32>
    %c0_i32_37 = arith.constant 0 : i32
    %102 = vector.broadcast %c0_i32_37 : i32 to vector<16x1xi32>
    %103 = arith.cmpi eq, %101, %102 : vector<16x1xi32>
    %c1_i32_38 = arith.constant 1 : i32
    %104 = tpu.dynamic_rotate %84 by %c1_i32_38 dim 0 : vector<16x64xf32>, i32 -> vector<16x64xf32>
    %cst_39 = arith.constant 0.000000e+00 : f32
    %105 = vector.shape_cast %103 : vector<16x1xi1> to vector<16x1xi1>
    %106 = vector.broadcast %105 : vector<16x1xi1> to vector<16x64xi1>
    %107 = vector.broadcast %cst_39 : f32 to vector<16x64xf32>
    %108 = arith.select %106, %107, %104 : vector<16x64xi1>, vector<16x64xf32>
    %c15_i32_40 = arith.constant 15 : i32
    %109 = vector.broadcast %c15_i32_40 : i32 to vector<16x1xi32>
    %110 = arith.cmpi eq, %101, %109 : vector<16x1xi32>
    %c15_i32_41 = arith.constant 15 : i32
    %111 = tpu.dynamic_rotate %84 by %c15_i32_41 dim 0 : vector<16x64xf32>, i32 -> vector<16x64xf32>
    %cst_42 = arith.constant 0.000000e+00 : f32
    %112 = vector.shape_cast %110 : vector<16x1xi1> to vector<16x1xi1>
    %113 = vector.broadcast %112 : vector<16x1xi1> to vector<16x64xi1>
    %114 = vector.broadcast %cst_42 : f32 to vector<16x64xf32>
    %115 = arith.select %113, %114, %111 : vector<16x64xi1>, vector<16x64xf32>
    %116 = tpu.concatenate %108, %84, %115 in 1 : vector<16x64xf32>, vector<16x64xf32>, vector<16x64xf32> -> vector<16x192xf32>
    %117 = arith.truncf %116 : vector<16x192xf32> to vector<16x192xbf16>
    %c208 = arith.constant 208 : index
    %c0_43 = arith.constant 0 : index
    %118 = vector.load %arg2[%c208, %c0_43] : memref<5856x256xbf16, #tpu.memory_space<vmem>>, vector<192x64xbf16>
    %cst_44 = arith.constant dense<0.000000e+00> : vector<16x64xf32>
    %119 = tpu.matmul %117, %118, %cst_44 {dimension_numbers = #tpu.dot_dimension_numbers<[1], [0], [0], [1], [0, 0, 1, 1], [], []>} : vector<16x192xbf16>, vector<192x64xbf16>, vector<16x64xf32> -> vector<16x64xf32>
    %c2 = arith.constant 2 : index
    %c0_45 = arith.constant 0 : index
    %120 = vector.load %arg3[%c2, %c0_45] : memref<18x256xf32, #tpu.memory_space<vmem>>, vector<1x64xf32>
    %121 = vector.broadcast %120 : vector<1x64xf32> to vector<16x64xf32>
    %122 = arith.addf %119, %121 : vector<16x64xf32>
    %123 = arith.addf %122, %44 : vector<16x64xf32>
    %cst_46 = arith.constant 0.000000e+00 : f32
    %124 = vector.broadcast %cst_46 : f32 to vector<16x64xf32>
    %125 = arith.maximumf %123, %124 : vector<16x64xf32>
    %126 = tpu.iota {dimensions = array<i32: 0>} : vector<16x1xi32>
    %c16_i32_47 = arith.constant 16 : i32
    %c0_i32_48 = arith.constant 0 : i32
    %127 = arith.cmpi eq, %c16_i32_47, %c0_i32_48 : i32
    %c1_i32_49 = arith.constant 1 : i32
    %128 = arith.select %127, %c1_i32_49, %c16_i32_47 : i32
    %129 = vector.broadcast %128 : i32 to vector<16x1xi32>
    %130 = arith.remsi %126, %129 : vector<16x1xi32>
    %c0_i32_50 = arith.constant 0 : i32
    %131 = vector.broadcast %c0_i32_50 : i32 to vector<16x1xi32>
    %132 = arith.cmpi ne, %130, %131 : vector<16x1xi32>
    %c0_i32_51 = arith.constant 0 : i32
    %133 = vector.broadcast %c0_i32_51 : i32 to vector<16x1xi32>
    %134 = arith.cmpi slt, %130, %133 : vector<16x1xi32>
    %c0_i32_52 = arith.constant 0 : i32
    %135 = arith.cmpi slt, %128, %c0_i32_52 : i32
    %136 = vector.broadcast %135 : i1 to vector<16x1xi1>
    %137 = vector.broadcast %136 : vector<16x1xi1> to vector<16x1xi1>
    %138 = arith.xori %134, %137 : vector<16x1xi1>
    %139 = arith.andi %138, %132 : vector<16x1xi1>
    %140 = vector.broadcast %128 : i32 to vector<16x1xi32>
    %141 = arith.addi %130, %140 : vector<16x1xi32>
    %142 = arith.select %139, %141, %130 : vector<16x1xi1>, vector<16x1xi32>
    %c0_i32_53 = arith.constant 0 : i32
    %143 = vector.broadcast %c0_i32_53 : i32 to vector<16x1xi32>
    %144 = arith.cmpi eq, %142, %143 : vector<16x1xi32>
    %c1_i32_54 = arith.constant 1 : i32
    %145 = tpu.dynamic_rotate %125 by %c1_i32_54 dim 0 : vector<16x64xf32>, i32 -> vector<16x64xf32>
    %cst_55 = arith.constant 0.000000e+00 : f32
    %146 = vector.shape_cast %144 : vector<16x1xi1> to vector<16x1xi1>
    %147 = vector.broadcast %146 : vector<16x1xi1> to vector<16x64xi1>
    %148 = vector.broadcast %cst_55 : f32 to vector<16x64xf32>
    %149 = arith.select %147, %148, %145 : vector<16x64xi1>, vector<16x64xf32>
    %c15_i32_56 = arith.constant 15 : i32
    %150 = vector.broadcast %c15_i32_56 : i32 to vector<16x1xi32>
    %151 = arith.cmpi eq, %142, %150 : vector<16x1xi32>
    %c15_i32_57 = arith.constant 15 : i32
    %152 = tpu.dynamic_rotate %125 by %c15_i32_57 dim 0 : vector<16x64xf32>, i32 -> vector<16x64xf32>
    %cst_58 = arith.constant 0.000000e+00 : f32
    %153 = vector.shape_cast %151 : vector<16x1xi1> to vector<16x1xi1>
    %154 = vector.broadcast %153 : vector<16x1xi1> to vector<16x64xi1>
    %155 = vector.broadcast %cst_58 : f32 to vector<16x64xf32>
    %156 = arith.select %154, %155, %152 : vector<16x64xi1>, vector<16x64xf32>
    %157 = tpu.concatenate %149, %125, %156 in 1 : vector<16x64xf32>, vector<16x64xf32>, vector<16x64xf32> -> vector<16x192xf32>
    %158 = arith.truncf %157 : vector<16x192xf32> to vector<16x192xbf16>
    %c400 = arith.constant 400 : index
    %c0_59 = arith.constant 0 : index
    %159 = vector.load %arg2[%c400, %c0_59] : memref<5856x256xbf16, #tpu.memory_space<vmem>>, vector<192x64xbf16>
    %cst_60 = arith.constant dense<0.000000e+00> : vector<16x64xf32>
    %160 = tpu.matmul %158, %159, %cst_60 {dimension_numbers = #tpu.dot_dimension_numbers<[1], [0], [0], [1], [0, 0, 1, 1], [], []>} : vector<16x192xbf16>, vector<192x64xbf16>, vector<16x64xf32> -> vector<16x64xf32>
    %c3 = arith.constant 3 : index
    %c0_61 = arith.constant 0 : index
    %161 = vector.load %arg3[%c3, %c0_61] : memref<18x256xf32, #tpu.memory_space<vmem>>, vector<1x64xf32>
    %162 = vector.broadcast %161 : vector<1x64xf32> to vector<16x64xf32>
    %163 = arith.addf %160, %162 : vector<16x64xf32>
    %cst_62 = arith.constant 0.000000e+00 : f32
    %164 = vector.broadcast %cst_62 : f32 to vector<16x64xf32>
    %165 = arith.maximumf %163, %164 : vector<16x64xf32>
    %166 = tpu.iota {dimensions = array<i32: 0>} : vector<16x1xi32>
    %c16_i32_63 = arith.constant 16 : i32
    %c0_i32_64 = arith.constant 0 : i32
    %167 = arith.cmpi eq, %c16_i32_63, %c0_i32_64 : i32
    %c1_i32_65 = arith.constant 1 : i32
    %168 = arith.select %167, %c1_i32_65, %c16_i32_63 : i32
    %169 = vector.broadcast %168 : i32 to vector<16x1xi32>
    %170 = arith.remsi %166, %169 : vector<16x1xi32>
    %c0_i32_66 = arith.constant 0 : i32
    %171 = vector.broadcast %c0_i32_66 : i32 to vector<16x1xi32>
    %172 = arith.cmpi ne, %170, %171 : vector<16x1xi32>
    %c0_i32_67 = arith.constant 0 : i32
    %173 = vector.broadcast %c0_i32_67 : i32 to vector<16x1xi32>
    %174 = arith.cmpi slt, %170, %173 : vector<16x1xi32>
    %c0_i32_68 = arith.constant 0 : i32
    %175 = arith.cmpi slt, %168, %c0_i32_68 : i32
    %176 = vector.broadcast %175 : i1 to vector<16x1xi1>
    %177 = vector.broadcast %176 : vector<16x1xi1> to vector<16x1xi1>
    %178 = arith.xori %174, %177 : vector<16x1xi1>
    %179 = arith.andi %178, %172 : vector<16x1xi1>
    %180 = vector.broadcast %168 : i32 to vector<16x1xi32>
    %181 = arith.addi %170, %180 : vector<16x1xi32>
    %182 = arith.select %179, %181, %170 : vector<16x1xi1>, vector<16x1xi32>
    %c0_i32_69 = arith.constant 0 : i32
    %183 = vector.broadcast %c0_i32_69 : i32 to vector<16x1xi32>
    %184 = arith.cmpi eq, %182, %183 : vector<16x1xi32>
    %c1_i32_70 = arith.constant 1 : i32
    %185 = tpu.dynamic_rotate %165 by %c1_i32_70 dim 0 : vector<16x64xf32>, i32 -> vector<16x64xf32>
    %cst_71 = arith.constant 0.000000e+00 : f32
    %186 = vector.shape_cast %184 : vector<16x1xi1> to vector<16x1xi1>
    %187 = vector.broadcast %186 : vector<16x1xi1> to vector<16x64xi1>
    %188 = vector.broadcast %cst_71 : f32 to vector<16x64xf32>
    %189 = arith.select %187, %188, %185 : vector<16x64xi1>, vector<16x64xf32>
    %c15_i32_72 = arith.constant 15 : i32
    %190 = vector.broadcast %c15_i32_72 : i32 to vector<16x1xi32>
    %191 = arith.cmpi eq, %182, %190 : vector<16x1xi32>
    %c15_i32_73 = arith.constant 15 : i32
    %192 = tpu.dynamic_rotate %165 by %c15_i32_73 dim 0 : vector<16x64xf32>, i32 -> vector<16x64xf32>
    %cst_74 = arith.constant 0.000000e+00 : f32
    %193 = vector.shape_cast %191 : vector<16x1xi1> to vector<16x1xi1>
    %194 = vector.broadcast %193 : vector<16x1xi1> to vector<16x64xi1>
    %195 = vector.broadcast %cst_74 : f32 to vector<16x64xf32>
    %196 = arith.select %194, %195, %192 : vector<16x64xi1>, vector<16x64xf32>
    %197 = tpu.concatenate %189, %165, %196 in 1 : vector<16x64xf32>, vector<16x64xf32>, vector<16x64xf32> -> vector<16x192xf32>
    %198 = arith.truncf %197 : vector<16x192xf32> to vector<16x192xbf16>
    %c592 = arith.constant 592 : index
    %c0_75 = arith.constant 0 : index
    %199 = vector.load %arg2[%c592, %c0_75] : memref<5856x256xbf16, #tpu.memory_space<vmem>>, vector<192x64xbf16>
    %cst_76 = arith.constant dense<0.000000e+00> : vector<16x64xf32>
    %200 = tpu.matmul %198, %199, %cst_76 {dimension_numbers = #tpu.dot_dimension_numbers<[1], [0], [0], [1], [0, 0, 1, 1], [], []>} : vector<16x192xbf16>, vector<192x64xbf16>, vector<16x64xf32> -> vector<16x64xf32>
    %c4 = arith.constant 4 : index
    %c0_77 = arith.constant 0 : index
    %201 = vector.load %arg3[%c4, %c0_77] : memref<18x256xf32, #tpu.memory_space<vmem>>, vector<1x64xf32>
    %202 = vector.broadcast %201 : vector<1x64xf32> to vector<16x64xf32>
    %203 = arith.addf %200, %202 : vector<16x64xf32>
    %204 = arith.addf %203, %125 : vector<16x64xf32>
    %cst_78 = arith.constant 0.000000e+00 : f32
    %205 = vector.broadcast %cst_78 : f32 to vector<16x64xf32>
    %206 = arith.maximumf %204, %205 : vector<16x64xf32>
    %c5824 = arith.constant 5824 : index
    %c0_79 = arith.constant 0 : index
    %207 = vector.load %arg2[%c5824, %c0_79] : memref<5856x256xbf16, #tpu.memory_space<vmem>>, vector<8x16xbf16>
    %208 = tpu.iota {dimensions = array<i32: 0>} : vector<16x1xi32>
    %c16_i32_80 = arith.constant 16 : i32
    %c0_i32_81 = arith.constant 0 : i32
    %209 = arith.cmpi eq, %c16_i32_80, %c0_i32_81 : i32
    %c1_i32_82 = arith.constant 1 : i32
    %210 = arith.select %209, %c1_i32_82, %c16_i32_80 : i32
    %211 = vector.broadcast %210 : i32 to vector<16x1xi32>
    %212 = arith.remsi %208, %211 : vector<16x1xi32>
    %c0_i32_83 = arith.constant 0 : i32
    %213 = vector.broadcast %c0_i32_83 : i32 to vector<16x1xi32>
    %214 = arith.cmpi ne, %212, %213 : vector<16x1xi32>
    %c0_i32_84 = arith.constant 0 : i32
    %215 = vector.broadcast %c0_i32_84 : i32 to vector<16x1xi32>
    %216 = arith.cmpi slt, %212, %215 : vector<16x1xi32>
    %c0_i32_85 = arith.constant 0 : i32
    %217 = arith.cmpi slt, %210, %c0_i32_85 : i32
    %218 = vector.broadcast %217 : i1 to vector<16x1xi1>
    %219 = vector.broadcast %218 : vector<16x1xi1> to vector<16x1xi1>
    %220 = arith.xori %216, %219 : vector<16x1xi1>
    %221 = arith.andi %220, %214 : vector<16x1xi1>
    %222 = vector.broadcast %210 : i32 to vector<16x1xi32>
    %223 = arith.addi %212, %222 : vector<16x1xi32>
    %224 = arith.select %221, %223, %212 : vector<16x1xi1>, vector<16x1xi32>
    %c0_i32_86 = arith.constant 0 : i32
    %225 = vector.broadcast %c0_i32_86 : i32 to vector<16x1xi32>
    %226 = arith.cmpi eq, %224, %225 : vector<16x1xi32>
    %c1_i32_87 = arith.constant 1 : i32
    %227 = tpu.dynamic_rotate %206 by %c1_i32_87 dim 0 : vector<16x64xf32>, i32 -> vector<16x64xf32>
    %cst_88 = arith.constant 0.000000e+00 : f32
    %228 = vector.shape_cast %226 : vector<16x1xi1> to vector<16x1xi1>
    %229 = vector.broadcast %228 : vector<16x1xi1> to vector<16x64xi1>
    %230 = vector.broadcast %cst_88 : f32 to vector<16x64xf32>
    %231 = arith.select %229, %230, %227 : vector<16x64xi1>, vector<16x64xf32>
    %c15_i32_89 = arith.constant 15 : i32
    %232 = vector.broadcast %c15_i32_89 : i32 to vector<16x1xi32>
    %233 = arith.cmpi eq, %224, %232 : vector<16x1xi32>
    %c15_i32_90 = arith.constant 15 : i32
    %234 = tpu.dynamic_rotate %206 by %c15_i32_90 dim 0 : vector<16x64xf32>, i32 -> vector<16x64xf32>
    %cst_91 = arith.constant 0.000000e+00 : f32
    %235 = vector.shape_cast %233 : vector<16x1xi1> to vector<16x1xi1>
    %236 = vector.broadcast %235 : vector<16x1xi1> to vector<16x64xi1>
    %237 = vector.broadcast %cst_91 : f32 to vector<16x64xf32>
    %238 = arith.select %236, %237, %234 : vector<16x64xi1>, vector<16x64xf32>
    %239 = tpu.concatenate %231, %206, %238 in 1 : vector<16x64xf32>, vector<16x64xf32>, vector<16x64xf32> -> vector<16x192xf32>
    %240 = arith.truncf %239 : vector<16x192xf32> to vector<16x192xbf16>
    %cst_92 = arith.constant dense<0.000000e+00> : vector<8x192xf32>
    %241 = tpu.matmul %207, %240, %cst_92 {dimension_numbers = #tpu.dot_dimension_numbers<[1], [0], [0], [1], [0, 0, 1, 1], [], []>} : vector<8x16xbf16>, vector<16x192xbf16>, vector<8x192xf32> -> vector<8x192xf32>
    %242 = arith.truncf %241 : vector<8x192xf32> to vector<8x192xbf16>
    %c784 = arith.constant 784 : index
    %c0_93 = arith.constant 0 : index
    %243 = vector.load %arg2[%c784, %c0_93] : memref<5856x256xbf16, #tpu.memory_space<vmem>>, vector<192x128xbf16>
    %cst_94 = arith.constant dense<0.000000e+00> : vector<8x128xf32>
    %244 = tpu.matmul %242, %243, %cst_94 {dimension_numbers = #tpu.dot_dimension_numbers<[1], [0], [0], [1], [0, 0, 1, 1], [], []>} : vector<8x192xbf16>, vector<192x128xbf16>, vector<8x128xf32> -> vector<8x128xf32>
    %c5 = arith.constant 5 : index
    %c0_95 = arith.constant 0 : index
    %245 = vector.load %arg3[%c5, %c0_95] : memref<18x256xf32, #tpu.memory_space<vmem>>, vector<1x128xf32>
    %246 = vector.broadcast %245 : vector<1x128xf32> to vector<8x128xf32>
    %247 = arith.addf %244, %246 : vector<8x128xf32>
    %cst_96 = arith.constant 0.000000e+00 : f32
    %248 = vector.broadcast %cst_96 : f32 to vector<8x128xf32>
    %249 = arith.maximumf %247, %248 : vector<8x128xf32>
    %250 = vector.extract_strided_slice %242 {offsets = [0, 64], sizes = [8, 64], strides = [1, 1]} : vector<8x192xbf16> to vector<8x64xbf16>
    %c1360 = arith.constant 1360 : index
    %c0_97 = arith.constant 0 : index
    %251 = vector.load %arg2[%c1360, %c0_97] : memref<5856x256xbf16, #tpu.memory_space<vmem>>, vector<64x128xbf16>
    %cst_98 = arith.constant dense<0.000000e+00> : vector<8x128xf32>
    %252 = tpu.matmul %250, %251, %cst_98 {dimension_numbers = #tpu.dot_dimension_numbers<[1], [0], [0], [1], [0, 0, 1, 1], [], []>} : vector<8x64xbf16>, vector<64x128xbf16>, vector<8x128xf32> -> vector<8x128xf32>
    %c7 = arith.constant 7 : index
    %c0_99 = arith.constant 0 : index
    %253 = vector.load %arg3[%c7, %c0_99] : memref<18x256xf32, #tpu.memory_space<vmem>>, vector<1x128xf32>
    %254 = vector.broadcast %253 : vector<1x128xf32> to vector<8x128xf32>
    %255 = arith.addf %252, %254 : vector<8x128xf32>
    %256 = tpu.iota {dimensions = array<i32: 0>} : vector<8x1xi32>
    %c8_i32 = arith.constant 8 : i32
    %c0_i32_100 = arith.constant 0 : i32
    %257 = arith.cmpi eq, %c8_i32, %c0_i32_100 : i32
    %c1_i32_101 = arith.constant 1 : i32
    %258 = arith.select %257, %c1_i32_101, %c8_i32 : i32
    %259 = vector.broadcast %258 : i32 to vector<8x1xi32>
    %260 = arith.remsi %256, %259 : vector<8x1xi32>
    %c0_i32_102 = arith.constant 0 : i32
    %261 = vector.broadcast %c0_i32_102 : i32 to vector<8x1xi32>
    %262 = arith.cmpi ne, %260, %261 : vector<8x1xi32>
    %c0_i32_103 = arith.constant 0 : i32
    %263 = vector.broadcast %c0_i32_103 : i32 to vector<8x1xi32>
    %264 = arith.cmpi slt, %260, %263 : vector<8x1xi32>
    %c0_i32_104 = arith.constant 0 : i32
    %265 = arith.cmpi slt, %258, %c0_i32_104 : i32
    %266 = vector.broadcast %265 : i1 to vector<8x1xi1>
    %267 = vector.broadcast %266 : vector<8x1xi1> to vector<8x1xi1>
    %268 = arith.xori %264, %267 : vector<8x1xi1>
    %269 = arith.andi %268, %262 : vector<8x1xi1>
    %270 = vector.broadcast %258 : i32 to vector<8x1xi32>
    %271 = arith.addi %260, %270 : vector<8x1xi32>
    %272 = arith.select %269, %271, %260 : vector<8x1xi1>, vector<8x1xi32>
    %c0_i32_105 = arith.constant 0 : i32
    %273 = vector.broadcast %c0_i32_105 : i32 to vector<8x1xi32>
    %274 = arith.cmpi eq, %272, %273 : vector<8x1xi32>
    %c1_i32_106 = arith.constant 1 : i32
    %275 = tpu.dynamic_rotate %249 by %c1_i32_106 dim 0 : vector<8x128xf32>, i32 -> vector<8x128xf32>
    %cst_107 = arith.constant 0.000000e+00 : f32
    %276 = vector.shape_cast %274 : vector<8x1xi1> to vector<8x1xi1>
    %277 = vector.broadcast %276 : vector<8x1xi1> to vector<8x128xi1>
    %278 = vector.broadcast %cst_107 : f32 to vector<8x128xf32>
    %279 = arith.select %277, %278, %275 : vector<8x128xi1>, vector<8x128xf32>
    %c7_i32 = arith.constant 7 : i32
    %280 = vector.broadcast %c7_i32 : i32 to vector<8x1xi32>
    %281 = arith.cmpi eq, %272, %280 : vector<8x1xi32>
    %c7_i32_108 = arith.constant 7 : i32
    %282 = tpu.dynamic_rotate %249 by %c7_i32_108 dim 0 : vector<8x128xf32>, i32 -> vector<8x128xf32>
    %cst_109 = arith.constant 0.000000e+00 : f32
    %283 = vector.shape_cast %281 : vector<8x1xi1> to vector<8x1xi1>
    %284 = vector.broadcast %283 : vector<8x1xi1> to vector<8x128xi1>
    %285 = vector.broadcast %cst_109 : f32 to vector<8x128xf32>
    %286 = arith.select %284, %285, %282 : vector<8x128xi1>, vector<8x128xf32>
    %287 = tpu.concatenate %279, %249, %286 in 1 : vector<8x128xf32>, vector<8x128xf32>, vector<8x128xf32> -> vector<8x384xf32>
    %288 = arith.truncf %287 : vector<8x384xf32> to vector<8x384xbf16>
    %c976 = arith.constant 976 : index
    %c0_110 = arith.constant 0 : index
    %289 = vector.load %arg2[%c976, %c0_110] : memref<5856x256xbf16, #tpu.memory_space<vmem>>, vector<384x128xbf16>
    %cst_111 = arith.constant dense<0.000000e+00> : vector<8x128xf32>
    %290 = tpu.matmul %288, %289, %cst_111 {dimension_numbers = #tpu.dot_dimension_numbers<[1], [0], [0], [1], [0, 0, 1, 1], [], []>} : vector<8x384xbf16>, vector<384x128xbf16>, vector<8x128xf32> -> vector<8x128xf32>
    %c6 = arith.constant 6 : index
    %c0_112 = arith.constant 0 : index
    %291 = vector.load %arg3[%c6, %c0_112] : memref<18x256xf32, #tpu.memory_space<vmem>>, vector<1x128xf32>
    %292 = vector.broadcast %291 : vector<1x128xf32> to vector<8x128xf32>
    %293 = arith.addf %290, %292 : vector<8x128xf32>
    %294 = arith.addf %293, %255 : vector<8x128xf32>
    %cst_113 = arith.constant 0.000000e+00 : f32
    %295 = vector.broadcast %cst_113 : f32 to vector<8x128xf32>
    %296 = arith.maximumf %294, %295 : vector<8x128xf32>
    %297 = tpu.iota {dimensions = array<i32: 0>} : vector<8x1xi32>
    %c8_i32_114 = arith.constant 8 : i32
    %c0_i32_115 = arith.constant 0 : i32
    %298 = arith.cmpi eq, %c8_i32_114, %c0_i32_115 : i32
    %c1_i32_116 = arith.constant 1 : i32
    %299 = arith.select %298, %c1_i32_116, %c8_i32_114 : i32
    %300 = vector.broadcast %299 : i32 to vector<8x1xi32>
    %301 = arith.remsi %297, %300 : vector<8x1xi32>
    %c0_i32_117 = arith.constant 0 : i32
    %302 = vector.broadcast %c0_i32_117 : i32 to vector<8x1xi32>
    %303 = arith.cmpi ne, %301, %302 : vector<8x1xi32>
    %c0_i32_118 = arith.constant 0 : i32
    %304 = vector.broadcast %c0_i32_118 : i32 to vector<8x1xi32>
    %305 = arith.cmpi slt, %301, %304 : vector<8x1xi32>
    %c0_i32_119 = arith.constant 0 : i32
    %306 = arith.cmpi slt, %299, %c0_i32_119 : i32
    %307 = vector.broadcast %306 : i1 to vector<8x1xi1>
    %308 = vector.broadcast %307 : vector<8x1xi1> to vector<8x1xi1>
    %309 = arith.xori %305, %308 : vector<8x1xi1>
    %310 = arith.andi %309, %303 : vector<8x1xi1>
    %311 = vector.broadcast %299 : i32 to vector<8x1xi32>
    %312 = arith.addi %301, %311 : vector<8x1xi32>
    %313 = arith.select %310, %312, %301 : vector<8x1xi1>, vector<8x1xi32>
    %c0_i32_120 = arith.constant 0 : i32
    %314 = vector.broadcast %c0_i32_120 : i32 to vector<8x1xi32>
    %315 = arith.cmpi eq, %313, %314 : vector<8x1xi32>
    %c1_i32_121 = arith.constant 1 : i32
    %316 = tpu.dynamic_rotate %296 by %c1_i32_121 dim 0 : vector<8x128xf32>, i32 -> vector<8x128xf32>
    %cst_122 = arith.constant 0.000000e+00 : f32
    %317 = vector.shape_cast %315 : vector<8x1xi1> to vector<8x1xi1>
    %318 = vector.broadcast %317 : vector<8x1xi1> to vector<8x128xi1>
    %319 = vector.broadcast %cst_122 : f32 to vector<8x128xf32>
    %320 = arith.select %318, %319, %316 : vector<8x128xi1>, vector<8x128xf32>
    %c7_i32_123 = arith.constant 7 : i32
    %321 = vector.broadcast %c7_i32_123 : i32 to vector<8x1xi32>
    %322 = arith.cmpi eq, %313, %321 : vector<8x1xi32>
    %c7_i32_124 = arith.constant 7 : i32
    %323 = tpu.dynamic_rotate %296 by %c7_i32_124 dim 0 : vector<8x128xf32>, i32 -> vector<8x128xf32>
    %cst_125 = arith.constant 0.000000e+00 : f32
    %324 = vector.shape_cast %322 : vector<8x1xi1> to vector<8x1xi1>
    %325 = vector.broadcast %324 : vector<8x1xi1> to vector<8x128xi1>
    %326 = vector.broadcast %cst_125 : f32 to vector<8x128xf32>
    %327 = arith.select %325, %326, %323 : vector<8x128xi1>, vector<8x128xf32>
    %328 = tpu.concatenate %320, %296, %327 in 1 : vector<8x128xf32>, vector<8x128xf32>, vector<8x128xf32> -> vector<8x384xf32>
    %329 = arith.truncf %328 : vector<8x384xf32> to vector<8x384xbf16>
    %c1424 = arith.constant 1424 : index
    %c0_126 = arith.constant 0 : index
    %330 = vector.load %arg2[%c1424, %c0_126] : memref<5856x256xbf16, #tpu.memory_space<vmem>>, vector<384x128xbf16>
    %cst_127 = arith.constant dense<0.000000e+00> : vector<8x128xf32>
    %331 = tpu.matmul %329, %330, %cst_127 {dimension_numbers = #tpu.dot_dimension_numbers<[1], [0], [0], [1], [0, 0, 1, 1], [], []>} : vector<8x384xbf16>, vector<384x128xbf16>, vector<8x128xf32> -> vector<8x128xf32>
    %c8 = arith.constant 8 : index
    %c0_128 = arith.constant 0 : index
    %332 = vector.load %arg3[%c8, %c0_128] : memref<18x256xf32, #tpu.memory_space<vmem>>, vector<1x128xf32>
    %333 = vector.broadcast %332 : vector<1x128xf32> to vector<8x128xf32>
    %334 = arith.addf %331, %333 : vector<8x128xf32>
    %cst_129 = arith.constant 0.000000e+00 : f32
    %335 = vector.broadcast %cst_129 : f32 to vector<8x128xf32>
    %336 = arith.maximumf %334, %335 : vector<8x128xf32>
    %337 = tpu.iota {dimensions = array<i32: 0>} : vector<8x1xi32>
    %c8_i32_130 = arith.constant 8 : i32
    %c0_i32_131 = arith.constant 0 : i32
    %338 = arith.cmpi eq, %c8_i32_130, %c0_i32_131 : i32
    %c1_i32_132 = arith.constant 1 : i32
    %339 = arith.select %338, %c1_i32_132, %c8_i32_130 : i32
    %340 = vector.broadcast %339 : i32 to vector<8x1xi32>
    %341 = arith.remsi %337, %340 : vector<8x1xi32>
    %c0_i32_133 = arith.constant 0 : i32
    %342 = vector.broadcast %c0_i32_133 : i32 to vector<8x1xi32>
    %343 = arith.cmpi ne, %341, %342 : vector<8x1xi32>
    %c0_i32_134 = arith.constant 0 : i32
    %344 = vector.broadcast %c0_i32_134 : i32 to vector<8x1xi32>
    %345 = arith.cmpi slt, %341, %344 : vector<8x1xi32>
    %c0_i32_135 = arith.constant 0 : i32
    %346 = arith.cmpi slt, %339, %c0_i32_135 : i32
    %347 = vector.broadcast %346 : i1 to vector<8x1xi1>
    %348 = vector.broadcast %347 : vector<8x1xi1> to vector<8x1xi1>
    %349 = arith.xori %345, %348 : vector<8x1xi1>
    %350 = arith.andi %349, %343 : vector<8x1xi1>
    %351 = vector.broadcast %339 : i32 to vector<8x1xi32>
    %352 = arith.addi %341, %351 : vector<8x1xi32>
    %353 = arith.select %350, %352, %341 : vector<8x1xi1>, vector<8x1xi32>
    %c0_i32_136 = arith.constant 0 : i32
    %354 = vector.broadcast %c0_i32_136 : i32 to vector<8x1xi32>
    %355 = arith.cmpi eq, %353, %354 : vector<8x1xi32>
    %c1_i32_137 = arith.constant 1 : i32
    %356 = tpu.dynamic_rotate %336 by %c1_i32_137 dim 0 : vector<8x128xf32>, i32 -> vector<8x128xf32>
    %cst_138 = arith.constant 0.000000e+00 : f32
    %357 = vector.shape_cast %355 : vector<8x1xi1> to vector<8x1xi1>
    %358 = vector.broadcast %357 : vector<8x1xi1> to vector<8x128xi1>
    %359 = vector.broadcast %cst_138 : f32 to vector<8x128xf32>
    %360 = arith.select %358, %359, %356 : vector<8x128xi1>, vector<8x128xf32>
    %c7_i32_139 = arith.constant 7 : i32
    %361 = vector.broadcast %c7_i32_139 : i32 to vector<8x1xi32>
    %362 = arith.cmpi eq, %353, %361 : vector<8x1xi32>
    %c7_i32_140 = arith.constant 7 : i32
    %363 = tpu.dynamic_rotate %336 by %c7_i32_140 dim 0 : vector<8x128xf32>, i32 -> vector<8x128xf32>
    %cst_141 = arith.constant 0.000000e+00 : f32
    %364 = vector.shape_cast %362 : vector<8x1xi1> to vector<8x1xi1>
    %365 = vector.broadcast %364 : vector<8x1xi1> to vector<8x128xi1>
    %366 = vector.broadcast %cst_141 : f32 to vector<8x128xf32>
    %367 = arith.select %365, %366, %363 : vector<8x128xi1>, vector<8x128xf32>
    %368 = tpu.concatenate %360, %336, %367 in 1 : vector<8x128xf32>, vector<8x128xf32>, vector<8x128xf32> -> vector<8x384xf32>
    %369 = arith.truncf %368 : vector<8x384xf32> to vector<8x384xbf16>
    %c1808 = arith.constant 1808 : index
    %c0_142 = arith.constant 0 : index
    %370 = vector.load %arg2[%c1808, %c0_142] : memref<5856x256xbf16, #tpu.memory_space<vmem>>, vector<384x128xbf16>
    %cst_143 = arith.constant dense<0.000000e+00> : vector<8x128xf32>
    %371 = tpu.matmul %369, %370, %cst_143 {dimension_numbers = #tpu.dot_dimension_numbers<[1], [0], [0], [1], [0, 0, 1, 1], [], []>} : vector<8x384xbf16>, vector<384x128xbf16>, vector<8x128xf32> -> vector<8x128xf32>
    %c9 = arith.constant 9 : index
    %c0_144 = arith.constant 0 : index
    %372 = vector.load %arg3[%c9, %c0_144] : memref<18x256xf32, #tpu.memory_space<vmem>>, vector<1x128xf32>
    %373 = vector.broadcast %372 : vector<1x128xf32> to vector<8x128xf32>
    %374 = arith.addf %371, %373 : vector<8x128xf32>
    %375 = arith.addf %374, %296 : vector<8x128xf32>
    %cst_145 = arith.constant 0.000000e+00 : f32
    %376 = vector.broadcast %cst_145 : f32 to vector<8x128xf32>
    %377 = arith.maximumf %375, %376 : vector<8x128xf32>
    %c5840 = arith.constant 5840 : index
    %c0_146 = arith.constant 0 : index
    %378 = vector.load %arg2[%c5840, %c0_146] : memref<5856x256xbf16, #tpu.memory_space<vmem>>, vector<4x8xbf16>
    %379 = tpu.iota {dimensions = array<i32: 0>} : vector<8x1xi32>
    %c8_i32_147 = arith.constant 8 : i32
    %c0_i32_148 = arith.constant 0 : i32
    %380 = arith.cmpi eq, %c8_i32_147, %c0_i32_148 : i32
    %c1_i32_149 = arith.constant 1 : i32
    %381 = arith.select %380, %c1_i32_149, %c8_i32_147 : i32
    %382 = vector.broadcast %381 : i32 to vector<8x1xi32>
    %383 = arith.remsi %379, %382 : vector<8x1xi32>
    %c0_i32_150 = arith.constant 0 : i32
    %384 = vector.broadcast %c0_i32_150 : i32 to vector<8x1xi32>
    %385 = arith.cmpi ne, %383, %384 : vector<8x1xi32>
    %c0_i32_151 = arith.constant 0 : i32
    %386 = vector.broadcast %c0_i32_151 : i32 to vector<8x1xi32>
    %387 = arith.cmpi slt, %383, %386 : vector<8x1xi32>
    %c0_i32_152 = arith.constant 0 : i32
    %388 = arith.cmpi slt, %381, %c0_i32_152 : i32
    %389 = vector.broadcast %388 : i1 to vector<8x1xi1>
    %390 = vector.broadcast %389 : vector<8x1xi1> to vector<8x1xi1>
    %391 = arith.xori %387, %390 : vector<8x1xi1>
    %392 = arith.andi %391, %385 : vector<8x1xi1>
    %393 = vector.broadcast %381 : i32 to vector<8x1xi32>
    %394 = arith.addi %383, %393 : vector<8x1xi32>
    %395 = arith.select %392, %394, %383 : vector<8x1xi1>, vector<8x1xi32>
    %c0_i32_153 = arith.constant 0 : i32
    %396 = vector.broadcast %c0_i32_153 : i32 to vector<8x1xi32>
    %397 = arith.cmpi eq, %395, %396 : vector<8x1xi32>
    %c1_i32_154 = arith.constant 1 : i32
    %398 = tpu.dynamic_rotate %377 by %c1_i32_154 dim 0 : vector<8x128xf32>, i32 -> vector<8x128xf32>
    %cst_155 = arith.constant 0.000000e+00 : f32
    %399 = vector.shape_cast %397 : vector<8x1xi1> to vector<8x1xi1>
    %400 = vector.broadcast %399 : vector<8x1xi1> to vector<8x128xi1>
    %401 = vector.broadcast %cst_155 : f32 to vector<8x128xf32>
    %402 = arith.select %400, %401, %398 : vector<8x128xi1>, vector<8x128xf32>
    %c7_i32_156 = arith.constant 7 : i32
    %403 = vector.broadcast %c7_i32_156 : i32 to vector<8x1xi32>
    %404 = arith.cmpi eq, %395, %403 : vector<8x1xi32>
    %c7_i32_157 = arith.constant 7 : i32
    %405 = tpu.dynamic_rotate %377 by %c7_i32_157 dim 0 : vector<8x128xf32>, i32 -> vector<8x128xf32>
    %cst_158 = arith.constant 0.000000e+00 : f32
    %406 = vector.shape_cast %404 : vector<8x1xi1> to vector<8x1xi1>
    %407 = vector.broadcast %406 : vector<8x1xi1> to vector<8x128xi1>
    %408 = vector.broadcast %cst_158 : f32 to vector<8x128xf32>
    %409 = arith.select %407, %408, %405 : vector<8x128xi1>, vector<8x128xf32>
    %410 = tpu.concatenate %402, %377, %409 in 1 : vector<8x128xf32>, vector<8x128xf32>, vector<8x128xf32> -> vector<8x384xf32>
    %411 = arith.truncf %410 : vector<8x384xf32> to vector<8x384xbf16>
    %cst_159 = arith.constant dense<0.000000e+00> : vector<4x384xf32>
    %412 = tpu.matmul %378, %411, %cst_159 {dimension_numbers = #tpu.dot_dimension_numbers<[1], [0], [0], [1], [0, 0, 1, 1], [], []>} : vector<4x8xbf16>, vector<8x384xbf16>, vector<4x384xf32> -> vector<4x384xf32>
    %413 = arith.truncf %412 : vector<4x384xf32> to vector<4x384xbf16>
    %c2192 = arith.constant 2192 : index
    %c0_160 = arith.constant 0 : index
    %414 = vector.load %arg2[%c2192, %c0_160] : memref<5856x256xbf16, #tpu.memory_space<vmem>>, vector<384x256xbf16>
    %cst_161 = arith.constant dense<0.000000e+00> : vector<4x256xf32>
    %415 = tpu.matmul %413, %414, %cst_161 {dimension_numbers = #tpu.dot_dimension_numbers<[1], [0], [0], [1], [0, 0, 1, 1], [], []>} : vector<4x384xbf16>, vector<384x256xbf16>, vector<4x256xf32> -> vector<4x256xf32>
    %c10 = arith.constant 10 : index
    %c0_162 = arith.constant 0 : index
    %416 = vector.load %arg3[%c10, %c0_162] : memref<18x256xf32, #tpu.memory_space<vmem>>, vector<1x256xf32>
    %417 = vector.broadcast %416 : vector<1x256xf32> to vector<4x256xf32>
    %418 = arith.addf %415, %417 : vector<4x256xf32>
    %cst_163 = arith.constant 0.000000e+00 : f32
    %419 = vector.broadcast %cst_163 : f32 to vector<4x256xf32>
    %420 = arith.maximumf %418, %419 : vector<4x256xf32>
    %421 = vector.extract_strided_slice %413 {offsets = [0, 128], sizes = [4, 128], strides = [1, 1]} : vector<4x384xbf16> to vector<4x128xbf16>
    %c3344 = arith.constant 3344 : index
    %c0_164 = arith.constant 0 : index
    %422 = vector.load %arg2[%c3344, %c0_164] : memref<5856x256xbf16, #tpu.memory_space<vmem>>, vector<128x256xbf16>
    %cst_165 = arith.constant dense<0.000000e+00> : vector<4x256xf32>
    %423 = tpu.matmul %421, %422, %cst_165 {dimension_numbers = #tpu.dot_dimension_numbers<[1], [0], [0], [1], [0, 0, 1, 1], [], []>} : vector<4x128xbf16>, vector<128x256xbf16>, vector<4x256xf32> -> vector<4x256xf32>
    %c12 = arith.constant 12 : index
    %c0_166 = arith.constant 0 : index
    %424 = vector.load %arg3[%c12, %c0_166] : memref<18x256xf32, #tpu.memory_space<vmem>>, vector<1x256xf32>
    %425 = vector.broadcast %424 : vector<1x256xf32> to vector<4x256xf32>
    %426 = arith.addf %423, %425 : vector<4x256xf32>
    %427 = tpu.iota {dimensions = array<i32: 0>} : vector<4x1xi32>
    %c4_i32 = arith.constant 4 : i32
    %c0_i32_167 = arith.constant 0 : i32
    %428 = arith.cmpi eq, %c4_i32, %c0_i32_167 : i32
    %c1_i32_168 = arith.constant 1 : i32
    %429 = arith.select %428, %c1_i32_168, %c4_i32 : i32
    %430 = vector.broadcast %429 : i32 to vector<4x1xi32>
    %431 = arith.remsi %427, %430 : vector<4x1xi32>
    %c0_i32_169 = arith.constant 0 : i32
    %432 = vector.broadcast %c0_i32_169 : i32 to vector<4x1xi32>
    %433 = arith.cmpi ne, %431, %432 : vector<4x1xi32>
    %c0_i32_170 = arith.constant 0 : i32
    %434 = vector.broadcast %c0_i32_170 : i32 to vector<4x1xi32>
    %435 = arith.cmpi slt, %431, %434 : vector<4x1xi32>
    %c0_i32_171 = arith.constant 0 : i32
    %436 = arith.cmpi slt, %429, %c0_i32_171 : i32
    %437 = vector.broadcast %436 : i1 to vector<4x1xi1>
    %438 = vector.broadcast %437 : vector<4x1xi1> to vector<4x1xi1>
    %439 = arith.xori %435, %438 : vector<4x1xi1>
    %440 = arith.andi %439, %433 : vector<4x1xi1>
    %441 = vector.broadcast %429 : i32 to vector<4x1xi32>
    %442 = arith.addi %431, %441 : vector<4x1xi32>
    %443 = arith.select %440, %442, %431 : vector<4x1xi1>, vector<4x1xi32>
    %c0_i32_172 = arith.constant 0 : i32
    %444 = vector.broadcast %c0_i32_172 : i32 to vector<4x1xi32>
    %445 = arith.cmpi eq, %443, %444 : vector<4x1xi32>
    %c1_i32_173 = arith.constant 1 : i32
    %446 = tpu.dynamic_rotate %420 by %c1_i32_173 dim 0 : vector<4x256xf32>, i32 -> vector<4x256xf32>
    %cst_174 = arith.constant 0.000000e+00 : f32
    %447 = vector.shape_cast %445 : vector<4x1xi1> to vector<4x1xi1>
    %448 = vector.broadcast %447 : vector<4x1xi1> to vector<4x256xi1>
    %449 = vector.broadcast %cst_174 : f32 to vector<4x256xf32>
    %450 = arith.select %448, %449, %446 : vector<4x256xi1>, vector<4x256xf32>
    %c3_i32 = arith.constant 3 : i32
    %451 = vector.broadcast %c3_i32 : i32 to vector<4x1xi32>
    %452 = arith.cmpi eq, %443, %451 : vector<4x1xi32>
    %c3_i32_175 = arith.constant 3 : i32
    %453 = tpu.dynamic_rotate %420 by %c3_i32_175 dim 0 : vector<4x256xf32>, i32 -> vector<4x256xf32>
    %cst_176 = arith.constant 0.000000e+00 : f32
    %454 = vector.shape_cast %452 : vector<4x1xi1> to vector<4x1xi1>
    %455 = vector.broadcast %454 : vector<4x1xi1> to vector<4x256xi1>
    %456 = vector.broadcast %cst_176 : f32 to vector<4x256xf32>
    %457 = arith.select %455, %456, %453 : vector<4x256xi1>, vector<4x256xf32>
    %458 = tpu.concatenate %450, %420, %457 in 1 : vector<4x256xf32>, vector<4x256xf32>, vector<4x256xf32> -> vector<4x768xf32>
    %459 = arith.truncf %458 : vector<4x768xf32> to vector<4x768xbf16>
    %c2576 = arith.constant 2576 : index
    %c0_177 = arith.constant 0 : index
    %460 = vector.load %arg2[%c2576, %c0_177] : memref<5856x256xbf16, #tpu.memory_space<vmem>>, vector<768x256xbf16>
    %cst_178 = arith.constant dense<0.000000e+00> : vector<4x256xf32>
    %461 = tpu.matmul %459, %460, %cst_178 {dimension_numbers = #tpu.dot_dimension_numbers<[1], [0], [0], [1], [0, 0, 1, 1], [], []>} : vector<4x768xbf16>, vector<768x256xbf16>, vector<4x256xf32> -> vector<4x256xf32>
    %c11 = arith.constant 11 : index
    %c0_179 = arith.constant 0 : index
    %462 = vector.load %arg3[%c11, %c0_179] : memref<18x256xf32, #tpu.memory_space<vmem>>, vector<1x256xf32>
    %463 = vector.broadcast %462 : vector<1x256xf32> to vector<4x256xf32>
    %464 = arith.addf %461, %463 : vector<4x256xf32>
    %465 = arith.addf %464, %426 : vector<4x256xf32>
    %cst_180 = arith.constant 0.000000e+00 : f32
    %466 = vector.broadcast %cst_180 : f32 to vector<4x256xf32>
    %467 = arith.maximumf %465, %466 : vector<4x256xf32>
    %468 = tpu.iota {dimensions = array<i32: 0>} : vector<4x1xi32>
    %c4_i32_181 = arith.constant 4 : i32
    %c0_i32_182 = arith.constant 0 : i32
    %469 = arith.cmpi eq, %c4_i32_181, %c0_i32_182 : i32
    %c1_i32_183 = arith.constant 1 : i32
    %470 = arith.select %469, %c1_i32_183, %c4_i32_181 : i32
    %471 = vector.broadcast %470 : i32 to vector<4x1xi32>
    %472 = arith.remsi %468, %471 : vector<4x1xi32>
    %c0_i32_184 = arith.constant 0 : i32
    %473 = vector.broadcast %c0_i32_184 : i32 to vector<4x1xi32>
    %474 = arith.cmpi ne, %472, %473 : vector<4x1xi32>
    %c0_i32_185 = arith.constant 0 : i32
    %475 = vector.broadcast %c0_i32_185 : i32 to vector<4x1xi32>
    %476 = arith.cmpi slt, %472, %475 : vector<4x1xi32>
    %c0_i32_186 = arith.constant 0 : i32
    %477 = arith.cmpi slt, %470, %c0_i32_186 : i32
    %478 = vector.broadcast %477 : i1 to vector<4x1xi1>
    %479 = vector.broadcast %478 : vector<4x1xi1> to vector<4x1xi1>
    %480 = arith.xori %476, %479 : vector<4x1xi1>
    %481 = arith.andi %480, %474 : vector<4x1xi1>
    %482 = vector.broadcast %470 : i32 to vector<4x1xi32>
    %483 = arith.addi %472, %482 : vector<4x1xi32>
    %484 = arith.select %481, %483, %472 : vector<4x1xi1>, vector<4x1xi32>
    %c0_i32_187 = arith.constant 0 : i32
    %485 = vector.broadcast %c0_i32_187 : i32 to vector<4x1xi32>
    %486 = arith.cmpi eq, %484, %485 : vector<4x1xi32>
    %c1_i32_188 = arith.constant 1 : i32
    %487 = tpu.dynamic_rotate %467 by %c1_i32_188 dim 0 : vector<4x256xf32>, i32 -> vector<4x256xf32>
    %cst_189 = arith.constant 0.000000e+00 : f32
    %488 = vector.shape_cast %486 : vector<4x1xi1> to vector<4x1xi1>
    %489 = vector.broadcast %488 : vector<4x1xi1> to vector<4x256xi1>
    %490 = vector.broadcast %cst_189 : f32 to vector<4x256xf32>
    %491 = arith.select %489, %490, %487 : vector<4x256xi1>, vector<4x256xf32>
    %c3_i32_190 = arith.constant 3 : i32
    %492 = vector.broadcast %c3_i32_190 : i32 to vector<4x1xi32>
    %493 = arith.cmpi eq, %484, %492 : vector<4x1xi32>
    %c3_i32_191 = arith.constant 3 : i32
    %494 = tpu.dynamic_rotate %467 by %c3_i32_191 dim 0 : vector<4x256xf32>, i32 -> vector<4x256xf32>
    %cst_192 = arith.constant 0.000000e+00 : f32
    %495 = vector.shape_cast %493 : vector<4x1xi1> to vector<4x1xi1>
    %496 = vector.broadcast %495 : vector<4x1xi1> to vector<4x256xi1>
    %497 = vector.broadcast %cst_192 : f32 to vector<4x256xf32>
    %498 = arith.select %496, %497, %494 : vector<4x256xi1>, vector<4x256xf32>
    %499 = tpu.concatenate %491, %467, %498 in 1 : vector<4x256xf32>, vector<4x256xf32>, vector<4x256xf32> -> vector<4x768xf32>
    %500 = arith.truncf %499 : vector<4x768xf32> to vector<4x768xbf16>
    %c3472 = arith.constant 3472 : index
    %c0_193 = arith.constant 0 : index
    %501 = vector.load %arg2[%c3472, %c0_193] : memref<5856x256xbf16, #tpu.memory_space<vmem>>, vector<768x256xbf16>
    %cst_194 = arith.constant dense<0.000000e+00> : vector<4x256xf32>
    %502 = tpu.matmul %500, %501, %cst_194 {dimension_numbers = #tpu.dot_dimension_numbers<[1], [0], [0], [1], [0, 0, 1, 1], [], []>} : vector<4x768xbf16>, vector<768x256xbf16>, vector<4x256xf32> -> vector<4x256xf32>
    %c13 = arith.constant 13 : index
    %c0_195 = arith.constant 0 : index
    %503 = vector.load %arg3[%c13, %c0_195] : memref<18x256xf32, #tpu.memory_space<vmem>>, vector<1x256xf32>
    %504 = vector.broadcast %503 : vector<1x256xf32> to vector<4x256xf32>
    %505 = arith.addf %502, %504 : vector<4x256xf32>
    %cst_196 = arith.constant 0.000000e+00 : f32
    %506 = vector.broadcast %cst_196 : f32 to vector<4x256xf32>
    %507 = arith.maximumf %505, %506 : vector<4x256xf32>
    %508 = tpu.iota {dimensions = array<i32: 0>} : vector<4x1xi32>
    %c4_i32_197 = arith.constant 4 : i32
    %c0_i32_198 = arith.constant 0 : i32
    %509 = arith.cmpi eq, %c4_i32_197, %c0_i32_198 : i32
    %c1_i32_199 = arith.constant 1 : i32
    %510 = arith.select %509, %c1_i32_199, %c4_i32_197 : i32
    %511 = vector.broadcast %510 : i32 to vector<4x1xi32>
    %512 = arith.remsi %508, %511 : vector<4x1xi32>
    %c0_i32_200 = arith.constant 0 : i32
    %513 = vector.broadcast %c0_i32_200 : i32 to vector<4x1xi32>
    %514 = arith.cmpi ne, %512, %513 : vector<4x1xi32>
    %c0_i32_201 = arith.constant 0 : i32
    %515 = vector.broadcast %c0_i32_201 : i32 to vector<4x1xi32>
    %516 = arith.cmpi slt, %512, %515 : vector<4x1xi32>
    %c0_i32_202 = arith.constant 0 : i32
    %517 = arith.cmpi slt, %510, %c0_i32_202 : i32
    %518 = vector.broadcast %517 : i1 to vector<4x1xi1>
    %519 = vector.broadcast %518 : vector<4x1xi1> to vector<4x1xi1>
    %520 = arith.xori %516, %519 : vector<4x1xi1>
    %521 = arith.andi %520, %514 : vector<4x1xi1>
    %522 = vector.broadcast %510 : i32 to vector<4x1xi32>
    %523 = arith.addi %512, %522 : vector<4x1xi32>
    %524 = arith.select %521, %523, %512 : vector<4x1xi1>, vector<4x1xi32>
    %c0_i32_203 = arith.constant 0 : i32
    %525 = vector.broadcast %c0_i32_203 : i32 to vector<4x1xi32>
    %526 = arith.cmpi eq, %524, %525 : vector<4x1xi32>
    %c1_i32_204 = arith.constant 1 : i32
    %527 = tpu.dynamic_rotate %507 by %c1_i32_204 dim 0 : vector<4x256xf32>, i32 -> vector<4x256xf32>
    %cst_205 = arith.constant 0.000000e+00 : f32
    %528 = vector.shape_cast %526 : vector<4x1xi1> to vector<4x1xi1>
    %529 = vector.broadcast %528 : vector<4x1xi1> to vector<4x256xi1>
    %530 = vector.broadcast %cst_205 : f32 to vector<4x256xf32>
    %531 = arith.select %529, %530, %527 : vector<4x256xi1>, vector<4x256xf32>
    %c3_i32_206 = arith.constant 3 : i32
    %532 = vector.broadcast %c3_i32_206 : i32 to vector<4x1xi32>
    %533 = arith.cmpi eq, %524, %532 : vector<4x1xi32>
    %c3_i32_207 = arith.constant 3 : i32
    %534 = tpu.dynamic_rotate %507 by %c3_i32_207 dim 0 : vector<4x256xf32>, i32 -> vector<4x256xf32>
    %cst_208 = arith.constant 0.000000e+00 : f32
    %535 = vector.shape_cast %533 : vector<4x1xi1> to vector<4x1xi1>
    %536 = vector.broadcast %535 : vector<4x1xi1> to vector<4x256xi1>
    %537 = vector.broadcast %cst_208 : f32 to vector<4x256xf32>
    %538 = arith.select %536, %537, %534 : vector<4x256xi1>, vector<4x256xf32>
    %539 = tpu.concatenate %531, %507, %538 in 1 : vector<4x256xf32>, vector<4x256xf32>, vector<4x256xf32> -> vector<4x768xf32>
    %540 = arith.truncf %539 : vector<4x768xf32> to vector<4x768xbf16>
    %c4240 = arith.constant 4240 : index
    %c0_209 = arith.constant 0 : index
    %541 = vector.load %arg2[%c4240, %c0_209] : memref<5856x256xbf16, #tpu.memory_space<vmem>>, vector<768x256xbf16>
    %cst_210 = arith.constant dense<0.000000e+00> : vector<4x256xf32>
    %542 = tpu.matmul %540, %541, %cst_210 {dimension_numbers = #tpu.dot_dimension_numbers<[1], [0], [0], [1], [0, 0, 1, 1], [], []>} : vector<4x768xbf16>, vector<768x256xbf16>, vector<4x256xf32> -> vector<4x256xf32>
    %c14 = arith.constant 14 : index
    %c0_211 = arith.constant 0 : index
    %543 = vector.load %arg3[%c14, %c0_211] : memref<18x256xf32, #tpu.memory_space<vmem>>, vector<1x256xf32>
    %544 = vector.broadcast %543 : vector<1x256xf32> to vector<4x256xf32>
    %545 = arith.addf %542, %544 : vector<4x256xf32>
    %546 = arith.addf %545, %467 : vector<4x256xf32>
    %cst_212 = arith.constant 0.000000e+00 : f32
    %547 = vector.broadcast %cst_212 : f32 to vector<4x256xf32>
    %548 = arith.maximumf %546, %547 : vector<4x256xf32>
    %549 = arith.truncf %548 : vector<4x256xf32> to vector<4x256xbf16>
    %c5008 = arith.constant 5008 : index
    %c0_213 = arith.constant 0 : index
    %550 = vector.load %arg2[%c5008, %c0_213] : memref<5856x256xbf16, #tpu.memory_space<vmem>>, vector<256x32xbf16>
    %cst_214 = arith.constant dense<0.000000e+00> : vector<4x32xf32>
    %551 = tpu.matmul %549, %550, %cst_214 {dimension_numbers = #tpu.dot_dimension_numbers<[1], [0], [0], [1], [0, 0, 1, 1], [], []>} : vector<4x256xbf16>, vector<256x32xbf16>, vector<4x32xf32> -> vector<4x32xf32>
    %c15 = arith.constant 15 : index
    %c0_215 = arith.constant 0 : index
    %552 = vector.load %arg3[%c15, %c0_215] : memref<18x256xf32, #tpu.memory_space<vmem>>, vector<1x32xf32>
    %553 = vector.broadcast %552 : vector<1x32xf32> to vector<4x32xf32>
    %554 = arith.addf %551, %553 : vector<4x32xf32>
    %cst_216 = arith.constant 0.000000e+00 : f32
    %555 = vector.broadcast %cst_216 : f32 to vector<4x32xf32>
    %556 = arith.maximumf %554, %555 : vector<4x32xf32>
    %557 = arith.truncf %556 : vector<4x32xf32> to vector<4x32xbf16>
    %c5264 = arith.constant 5264 : index
    %c0_217 = arith.constant 0 : index
    %558 = vector.load %arg2[%c5264, %c0_217] : memref<5856x256xbf16, #tpu.memory_space<vmem>>, vector<32x1xbf16>
    %cst_218 = arith.constant dense<0.000000e+00> : vector<4x1xf32>
    %559 = tpu.matmul %557, %558, %cst_218 {dimension_numbers = #tpu.dot_dimension_numbers<[1], [0], [0], [1], [0, 0, 1, 1], [], []>} : vector<4x32xbf16>, vector<32x1xbf16>, vector<4x1xf32> -> vector<4x1xf32>
    %c16_219 = arith.constant 16 : index
    %c0_220 = arith.constant 0 : index
    %560 = vector.load %arg3[%c16_219, %c0_220] : memref<18x256xf32, #tpu.memory_space<vmem>>, vector<1x1xf32>
    %561 = vector.broadcast %560 : vector<1x1xf32> to vector<4x1xf32>
    %562 = arith.addf %559, %561 : vector<4x1xf32>
    %cst_221 = arith.constant dense<0xFF800000> : vector<1xf32>
    %563 = vector.multi_reduction <maximumf>, %562, %cst_221 [0] : vector<4x1xf32> to vector<1xf32>
    %564 = vector.shape_cast %563 : vector<1xf32> to vector<1x1xf32>
    %565 = vector.broadcast %564 : vector<1x1xf32> to vector<4x1xf32>
    %566 = arith.subf %562, %565 : vector<4x1xf32>
    %567 = math.exp %566 : vector<4x1xf32>
    %cst_222 = arith.constant dense<0.000000e+00> : vector<1xf32>
    %568 = vector.multi_reduction <add>, %567, %cst_222 [0] : vector<4x1xf32> to vector<1xf32>
    %569 = vector.shape_cast %568 : vector<1xf32> to vector<1x1xf32>
    %570 = vector.broadcast %567 : vector<4x1xf32> to vector<4x256xf32>
    %571 = arith.mulf %548, %570 : vector<4x256xf32>
    %cst_223 = arith.constant dense<0.000000e+00> : vector<256xf32>
    %572 = vector.multi_reduction <add>, %571, %cst_223 [0] : vector<4x256xf32> to vector<256xf32>
    %573 = vector.shape_cast %572 : vector<256xf32> to vector<1x256xf32>
    %574 = vector.broadcast %569 : vector<1x1xf32> to vector<1x256xf32>
    %575 = arith.divf %573, %574 : vector<1x256xf32>
    %cst_224 = arith.constant dense<0.000000e+00> : vector<256xf32>
    %576 = vector.multi_reduction <add>, %548, %cst_224 [0] : vector<4x256xf32> to vector<256xf32>
    %577 = vector.shape_cast %576 : vector<256xf32> to vector<1x256xf32>
    %cst_225 = arith.constant 4.000000e+00 : f32
    %578 = vector.broadcast %cst_225 : f32 to vector<1x256xf32>
    %579 = arith.divf %577, %578 : vector<1x256xf32>
    %580 = tpu.concatenate %575, %579 in 1 : vector<1x256xf32>, vector<1x256xf32> -> vector<1x512xf32>
    %581 = arith.truncf %580 : vector<1x512xf32> to vector<1x512xbf16>
    %c5296 = arith.constant 5296 : index
    %c0_226 = arith.constant 0 : index
    %582 = vector.load %arg2[%c5296, %c0_226] : memref<5856x256xbf16, #tpu.memory_space<vmem>>, vector<512x5xbf16>
    %cst_227 = arith.constant dense<0.000000e+00> : vector<1x5xf32>
    %583 = tpu.matmul %581, %582, %cst_227 {dimension_numbers = #tpu.dot_dimension_numbers<[1], [0], [0], [1], [0, 0, 1, 1], [], []>} : vector<1x512xbf16>, vector<512x5xbf16>, vector<1x5xf32> -> vector<1x5xf32>
    %c17 = arith.constant 17 : index
    %c0_228 = arith.constant 0 : index
    %584 = vector.load %arg3[%c17, %c0_228] : memref<18x256xf32, #tpu.memory_space<vmem>>, vector<1x5xf32>
    %585 = arith.addf %583, %584 : vector<1x5xf32>
    %c0_229 = arith.constant 0 : index
    %c0_230 = arith.constant 0 : index
    %c0_231 = arith.constant 0 : index
    %586 = vector.load %arg4[%c0_229, %c0_230, %c0_231] : memref<1x1x5xf32, #tpu.memory_space<vmem>>, vector<1x1x5xf32>
    %587 = vector.shape_cast %586 : vector<1x1x5xf32> to vector<1x5xf32>
    %588 = vector.shape_cast %585 : vector<1x5xf32> to vector<1x1x5xf32>
    tpu.vector_store %arg4[%c0_229, %c0_230, %c0_231], %588 {strides = array<i32>} : memref<1x1x5xf32, #tpu.memory_space<vmem>>, vector<1x1x5xf32>,
    return
  }
  func.func @transform_0(%arg0: i32) -> (i32, i32, i32) {
    %c0_i32 = arith.constant 0 : i32
    %c0_i32_0 = arith.constant 0 : i32
    %c0_i32_1 = arith.constant 0 : i32
    return %arg0, %c0_i32, %c0_i32_0 : i32, i32, i32
  }
  func.func @transform_1(%arg0: i32) -> (i32, i32) {
    %c0_i32 = arith.constant 0 : i32
    %c0_i32_0 = arith.constant 0 : i32
    %c0_i32_1 = arith.constant 0 : i32
    return %c0_i32, %c0_i32_0 : i32, i32
  }
  func.func @transform_2(%arg0: i32) -> (i32, i32) {
    %c0_i32 = arith.constant 0 : i32
    %c0_i32_0 = arith.constant 0 : i32
    %c0_i32_1 = arith.constant 0 : i32
    return %c0_i32, %c0_i32_0 : i32, i32
  }
  func.func @transform_3(%arg0: i32) -> (i32, i32, i32) {
    %c0_i32 = arith.constant 0 : i32
    %c0_i32_0 = arith.constant 0 : i32
    %c0_i32_1 = arith.constant 0 : i32
    return %arg0, %c0_i32, %c0_i32_0 : i32, i32, i32
  }
}

</mosaic_0001>

<bundles_post_ra>
// kernel: _lambda_.1
= control target key start
LH: loop header
LB: loop body
LE: loop exit
PB: predicated region body
PF: predicated region fallthrough
CT: control target
= control target key end

     0   :  { %8 = vsyncpa [#allocation3], 0  ;;  %s8404_s0 = inlined_call_operand.vmem [shape: bf16[2,32,7], index: 0, kind: input, shape index: {}]   ;;  %s8405_s1 = inlined_call_operand.hbm [shape: bf16[5856,256], index: 1, kind: input, shape index: {}]   ;;  %s8406_s2 = inlined_call_operand.hbm [shape: f32[18,256], index: 2, kind: input, shape index: {}]   ;;  %s8407_s3 = inlined_call_operand.hbm [shape: f32[2,1,5], index: 3, kind: output, shape index: {}]  }
   0x1   :  { %9 = vsyncpa [#allocation6], 0 }
   0x2   :  { %10 = vsyncpa [#allocation4], 0 }
   0x3   :  { %12 = vsyncpa [#allocation4 + $0x1], 0  ;;  %s7843_s12 = smov 0   ;;  %s7845_s13 = smov 0  }
   0x4   :  { %s7847_s14 = smov 0   ;;  %s7849_s15 = smov 0  }
   0x5 LB: > { %s7864_s16 = sadd.s32 4294967295, %s7808_s15   ;;  %s5930_s17 = sadd.s32 4294967294, %s7808_s15   ;;  %s7808_s15 = sphi %s7849_s15, %s8441_s15   ;;  %s7804_s14 = sphi %s7847_s14, %s8440_s14   ;;  %s7800_s13 = sphi %s7845_s13, %s8439_s13   ;;  %s7796_s12 = sphi %s7843_s12, %s8438_s12  }
   0x6   : > { %s7868_s18 = sadd.s32 1, %s7808_s15   ;;  %s93_s19 = sadd.s32 1, %s7804_s14 }
   0x7   : > { %s90_s20 = ssub.s32 %s7808_s15, %s7868_s18  ;;  %p103_p0 = scmp.ne.s32.totalorder %s7804_s14, %s7800_s13 }
   0x8   : > { %p91_p1 = scmp.eq.s32.totalorder %s90_s20, 0  ;;  %p104_p2 = scmp.eq.s32.totalorder %s7864_s16, 1 }
   0x9   : > { %p109_p3 = scmp.ne.s32.totalorder %s7800_s13, %s7796_s12  ;;  %p110_p4 = scmp.eq.s32.totalorder %s5930_s17, 1 }
   0xa   : > { %s7879_s21 = scalar_select %p91_p1, %s7804_s14, %s93_s19  }
   0xb   : > { %p7881_p5 = por %p104_p2, %p103_p0  ;;  %p7885_p6 = por %p110_p4, %p109_p3 }
   0xc   : > { %p5931_p7 = scmp.ge.s32.totalorder %s7808_s15, 1  ;;  %p117_p8 = scmp.lt.s32.totalorder %s7808_s15, 3 }
   0xd   : > { %s8410_s23 = scalar_select %p7885_p6, 1, 0 }
   0xe   : > { %p8408_p9 = scmp.eq.s32.totalorder %s7864_s16, 0  ;;  %p7892_p10 = pnand %p5931_p7, %p117_p8 }
   0xf   : > { %s7810_s25 = smov [#allocation2]   ;;  %s7811_s28 = smov [#allocation5]  }
  0x10   : > { %s129_s26 = sshll.u32 %s7810_s25, 4  ;;  %p6880_p11 = pneg %p7892_p10  ;;  %s130_s26 = int_to_ptr.vmem [resolvable:$true] %s129_s26 }
  0x11   : > { %s142_s29 = sshll.u32 %s7811_s28, 4  ;;  %s7699_s30 = scalar_lea.vmem %s130_s26, 93696  ;;  %s143_s29 = int_to_ptr.vmem [resolvable:$true] %s142_s29 }
  0x12   : > { %p7900_p12 = pnand %p8408_p9, %p6880_p11  ;;  %p7700_p0 = scmp.ne.s32.totalorder %s130_s26, %s7699_s30 }
  0x13   : > { %p7707_p3 = scmp.lt.s32.totalorder %s130_s26, %s130_s26  ;;  %p7708_p4 = scmp.lt.s32.totalorder %s7699_s30, %s7699_s30 }
  0x14   : > { %p7690_p13 = pneg %p7900_p12 }
  0x15   : > { %p7709_p7 = por %p7708_p4, %p7707_p3 }
  0x16   : > { %p7702_p1 = pnand %p7700_p0, %p7690_p13 }
  0x18   : > { %p7703_p2 = pneg %p7702_p1 }
  0x1a   : > { %p7710_p8 = pnand %p7709_p7, %p7703_p2 }
  0x1c   : > { %7713 = shalt.err (!%p7710_p8)
}
  0x1d   : > { %s7812_s4 = smov 128   ;;  %s7813_s5 = smov 8  }
  0x1e   : > { %6883 = dma.hbm_to_vmem [thread:$0]  (!%p7900_p12), %s8405_s1, 93696, %s130_s26, [#allocation3], %s7812_s4, %s7812_s4, %s7813_s5  }
  0x1f   : > { %s7725_s8 = scalar_lea.vmem %s143_s29, 768  ;;  %p7733_p9 = scmp.lt.s32.totalorder %s143_s29, %s143_s29 }
  0x20   : > { %p7726_p11 = scmp.ne.s32.totalorder %s143_s29, %s7725_s8  ;;  %p7734_p6 = scmp.lt.s32.totalorder %s7725_s8, %s7725_s8 }
  0x22   : > { %p7728_p0 = pnand %p7726_p11, %p7690_p13  ;;  %p7735_p3 = por %p7734_p6, %p7733_p9 }
  0x24   : > { %p7729_p1 = pneg %p7728_p0 }
  0x26   : > { %p7736_p2 = pnand %p7735_p3, %p7729_p1 }
  0x28   : > { %7739 = shalt.err (!%p7736_p2)
}
  0x29   : > { %s7814_s9 = smov 256   ;;  %s7815_s10 = smov 16  }
  0x2a   : > { %6886 = dma.hbm_to_vmem [thread:$0]  (!%p7900_p12), %s8406_s2, 768, %s143_s29, [#allocation6], %s7814_s9, %s7814_s9, %s7815_s10  }
  0x2b   : > { %166 = sbr.rel (%p7892_p10) target bundleno = 4957 (0x135d), region = 32  ;;  %p8413_p4 = scmp.eq.s32.totalorder (!%p7892_p10), %s7864_s16, 0 }
  0x30   : > { %7783 = dma.done.wait (%p8413_p4), [#allocation3], 93696   ;;  %p8414_p13 = pmov %p8413_p4 }
  0x31   : > { %p8415_p6 = pmov %p8413_p4 }
  0x32   : > { %7785 = vsyncadd (%p8414_p13), [#allocation3], 4294873600 }
  0x33   : > { %7787 = dma.done.wait (%p8415_p6), [#allocation6], 768   ;;  %p8416_p9 = pmov %p8413_p4 }
  0x34   : > { %vm222_vm0 = vcmask 1042432   ;;  %p193_p7 = scmp.lt.s32.totalorder %s7864_s16, 1  ;;  %vm223_vm1 = vcmask 1043456   ;;  %v7816_v0 = vmov 65535   ;;  %vm215_vm2 = vcmask 56320   ;;  %s7820_s27 = smov 64  }
  0x35   : > { %7789 = vsyncadd (%p8416_p9), [#allocation6], 4294966528  ;;  %v224_v1 = vsel %vm222_vm0, 4294967295, %v7816_v0  ;;  %v203_v3 = vld [vmem:[#allocation2] sm:$0xf]  ;;  %v7817_v7 = vmov 0.0   ;;  %v282_v8 = vlaneseq }
  0x36   : > { %s194_s19 = scalar_select %p193_p7, %s7864_s16, 1  ;;  %v225_v2 = vsel %vm223_vm1, %v224_v1, 0  ;;  %vm7818_vm3 = vmmov 0   ;;  %v204_v10 = vld [vmem:[#allocation5] ss:$0 sm:$0xff]  ;;  %vm402_vm8 = vcmask 261120  }
  0x37   : > { %v227_v4 = vand.u32 %v225_v2, %v203_v3  ;;  %v7941_v9 = vshrl.u32 %v282_v8, 7  ;;  %v6969_v55 = vld [vmem:[#allocation2 + $0x16b0] ss:$8 sps:$4 sm:$0xff]   ;;  %v6970_v57 = vld [vmem:[#allocation2 + $0x80] ss:$8 sps:$4 sm:$0xff]   ;;  %v7819_v58 = vmov 0  }
  0x38   : > { %s6592_s20 = sshll.u32 %s194_s19, 4  ;;  %608 = vmatprep.subr.bf16.mxu0 %v7819_v58  ;;  %v6971_v59 = vld [vmem:[#allocation2 + $0x70] ss:$8 sps:$4 sm:$0xff]   ;;  %6965 = vset.pattern.permute.xlu0 %v7819_v58  ;;  %v6972_v60 = vld [vmem:[#allocation2 + $0x60] ss:$8 sps:$4 sm:$0xff]   ;;  %vm503_vm10 = vcmask 523264  }
  0x39   : > { %s197_s26 = scalar_lea.vmem %s8404_s0, %s6592_s20  ;;  %6770 = vmatprep.subr.bf16.mxu1 %v227_v4  ;;  %v286_v11 = vadd.s32 24, %v7941_v9  ;;  %v291_v15 = vand.u32 31, %v7941_v9  ;;  %vm343_vm5 = vcmp.lt.s32.totalorder %v7941_v9, 1  ;;  %vm368_vm7 = vcmp.lt.s32.totalorder %v7941_v9, 7  ;;  %609 = vmatpush1.bf16.msra.mxu0 %v6970_v57  ;;  %v6973_v61 = vld [vmem:[#allocation2 + $0x50] ss:$8 sps:$4 sm:$0xff]  }
  0x3a   : > { %v6967_v5 = vld [vmem:[%s197_s26] sm:$0xff]   ;;  %v6968_v6 = vld [vmem:[%s197_s26 + $0x8] sm:$0xff]   ;;  %6771 = vmatpush3.bf16.msra.mxu1 %v227_v4  ;;  %610 = vmatprep.subr.bf16.mxu0 %v7819_v58  ;;  %v6975_v63 = vld [vmem:[#allocation2 + $0x30] ss:$8 sps:$4 sm:$0xff]   ;;  %vm7821_vm13 = vmmov 1   ;;  %vm1181_vm15 = vcmask 130048  }
  0x3b   : > { %6772 = vmatprep.mubr.msk.bf16.mxu1 %vm215_vm2, %v6967_v5  ;;  %6776 = vmatprep.subr.bf16.mxu1 %v7817_v7  ;;  %v312_v17 = vand.u32 31, %v286_v11  ;;  %vm7945_vm4 = vcmp.eq.s32.totalorder %v291_v15, 0  ;;  %v6974_v62 = vld [vmem:[#allocation2 + $0x40] ss:$8 sps:$4 sm:$0xff]   ;;  %v6977_v1 = vld [vmem:[#allocation2 + $0x10] ss:$8 sps:$4 sm:$0xff]  }
  0x3c   : > { %6966 = vset.pattern.permute.xlu1 %v7819_v58  ;;  %v6976_v0 = vld [vmem:[#allocation2 + $0x20] ss:$8 sps:$4 sm:$0xff]   ;;  %v6979_v3 = vld [vmem:[#allocation2 + $0xb0] ss:$8 sps:$4 sm:$0xff]   ;;  %s191_s28 = sand.u32 1, %s7800_s13   ;;  %s6589_s29 = sshll.u32 %s7864_s16, 4 }
  0x3d   : > { %6773 = vmatmul.mubr.msk.bf16.vlgmr.msra.gmra.mxu1 %vm215_vm2, %v6968_v6  ;;  %vm7950_vm6 = vcmp.eq.s32.totalorder %v312_v17, 31  ;;  %611 = vmatpush1.bf16.msra.mxu0 %v6971_v59  ;;  %v6978_v2 = vld [vmem:[#allocation2 + $0xc0] ss:$8 sps:$4 sm:$0xff]   ;;  %v6981_v5 = vld [vmem:[#allocation2 + $0x90] ss:$8 sps:$4 sm:$0xff]   ;;  %v284_v6 = vadd.s32 8, %v7941_v9  ;;  %s5851_s7 = scalar_lea.hbm %s8407_s3, %s6589_s29 }
  0x3e   : > { %6780 = vmatprep.mubr.msk.bf16.mxu1 %vm7818_vm3, %v7817_v7  ;;  %612 = vmatprep.subr.bf16.mxu0 %v7819_v58  ;;  %v6980_v4 = vld [vmem:[#allocation2 + $0xa0] ss:$8 sps:$4 sm:$0xff]   ;;  %s192_s30 = scalar_lea.vmem [#allocation7], %s191_s28  ;;  %s5841_s8 = scalar_lea.sflag [#allocation4], %s191_s28 }
  0x3f   : > { %v7030_v25 = vld [vmem:[#allocation2 + $0x580] ss:$8 sps:$4 sm:$0xff]   ;;  %s5853_s4 = sshll.u32 %s192_s30, 4  ;;  %s7822_s16 = smov [#allocation7]   ;;  %s5854_s4 = int_to_ptr.vmem [resolvable:$true] %s5853_s4 }
  0x40   : > { %s7740_s9 = scalar_lea.vmem %s5854_s4, 16  ;;  %s7744_s10 = sshll.u32 %s7822_s16, 4  ;;  %s7745_s10 = int_to_ptr.vmem [resolvable:$false] %s7744_s10 }
  0x41   : > { %613 = vmatpush1.bf16.msra.mxu0 %v6972_v60  ;;  %p7741_p10 = scmp.ne.s32.totalorder %s5854_s4, %s7740_s9  ;;  %s7746_s11 = scalar_lea.vmem %s7745_s10, 32 }
  0x42   : > { %614 = vmatprep.subr.bf16.mxu0 %v7819_v58  ;;  %p7747_p11 = scmp.lt.s32.totalorder %s5854_s4, %s7745_s10  ;;  %p7748_p0 = scmp.lt.s32.totalorder %s7746_s11, %s7740_s9 }
  0x43   : > { %p7742_p12 = pnand %p7741_p10, %p7881_p5 }
  0x44   : > { %p7749_p1 = por %p7748_p0, %p7747_p11 }
  0x45   : > { %615 = vmatpush1.bf16.msra.mxu0 %v6973_v61  ;;  %p7743_p8 = pneg %p7742_p12 }
  0x46   : > { %616 = vmatprep.subr.bf16.mxu0 %v7819_v58 }
  0x47   : > { %p7750_p3 = pnand %p7749_p1, %p7743_p8 }
  0x49   : > { %617 = vmatpush1.bf16.msra.mxu0 %v6974_v62 }
  0x4a   : > { %618 = vmatprep.subr.bf16.mxu0 %v7819_v58 }
  0x4d   : > { %619 = vmatpush1.bf16.msra.mxu0 %v6975_v63 }
  0x4e   : > { %620 = vmatprep.subr.bf16.mxu0 %v7819_v58 }
  0x51   : > { %621 = vmatpush1.bf16.msra.mxu0 %v6976_v0 }
  0x52   : > { %622 = vmatprep.subr.bf16.mxu0 %v7819_v58 }
  0x55   : > { %623 = vmatpush1.bf16.msra.mxu0 %v6977_v1 }
  0x56   : > { %632 = vmatprep.subr.bf16.mxu0 %v7819_v58 }
  0x59   : > { %633 = vmatpush2.bf16.msra.mxu0 %v6978_v2 }
  0x5a   : > { %634 = vmatprep.subr.bf16.mxu0 %v7819_v58 }
  0x5d   : > { %635 = vmatpush2.bf16.msra.mxu0 %v6979_v3 }
  0x5e   : > { %636 = vmatprep.subr.bf16.mxu0 %v7819_v58 }
  0x61   : > { %637 = vmatpush2.bf16.msra.mxu0 %v6980_v4 }
  0x62   : > { %638 = vmatprep.subr.bf16.mxu0 %v7819_v58 }
  0x65   : > { %639 = vmatpush2.bf16.msra.mxu0 %v6981_v5 }
  0x66   : > { %944 = vmatprep.subr.bf16.mxu0 %v7819_v58 }
  0xfd   : > { %v6774_v12 = vpop.f32.mrf.mxu1 }
  0xfe   : > { %v272_v13 = vadd.f32 %v6774_v12, %v204_v10 }
  0xff   : > { %v263_v14 = vpop.f32.mrf.mxu1 }
 0x100   : > { %v264_v16 = vadd.f32 %v263_v14, %v204_v10  ;;  %v280_v18 = vmax.f32 %v272_v13, 0.0 }
 0x101   : > { %v6775_v19 = vpop.f32.mrf.mxu1 }
 0x102   : > { %v278_v20 = vmax.f32 %v264_v16, 0.0  ;;  %v275_v21 = vadd.f32 %v6775_v19, %v204_v10  ;;  %v341_v27 = vrot.slane %v280_v18, 7  ;;  %v366_v33 = vrot.slane %v280_v18, 1 }
 0x103   : > { %v266_v23 = vpop.f32.mrf.mxu1 }
 0x104   : > { %v281_v24 = vmax.f32 %v275_v21, 0.0  ;;  %v267_v26 = vadd.f32 %v266_v23, %v204_v10  ;;  %v339_v28 = vrot.slane %v278_v20, 7  ;;  %v364_v29 = vrot.slane %v278_v20, 1 }
 0x105   : > { %v458_v10 = vand.u32 15, %v284_v6  ;;  %v451_v23 = vand.u32 15, %v7941_v9 }
 0x106   : > { %v342_v30 = vrot.slane %v281_v24, 7  ;;  %v367_v31 = vrot.slane %v281_v24, 1  ;;  %v279_v32 = vmax.f32 %v267_v26, 0.0 }
 0x107   : > { %vm8002_vm9 = vcmp.eq.s32.totalorder %v458_v10, 15  ;;  %vm8017_vm11 = vcmp.eq.s32.totalorder %v451_v23, 0  ;;  %v7001_v23 = vld [vmem:[#allocation2 + $0x190] ss:$8 sps:$4 sm:$0xff]  }
 0x108   : > { %v344_v34 = vsel %vm343_vm5, %v341_v27, %v342_v30  ;;  %v347_v35 = vsel %vm343_vm5, %v342_v30, %v339_v28  ;;  %v372_v36 = vsel %vm368_vm7, %v367_v31, %v364_v29  ;;  %v340_v39 = vrot.slane %v279_v32, 7  ;;  %vm5998_vm12 = vmneg %vm8002_vm9 }
 0x109   : > { %v356_v37 = vsel %vm7945_vm4, 0.0, %v347_v35  ;;  %v384_v38 = vsel %vm7950_vm6, 0.0, %v372_v36  ;;  %v365_v40 = vrot.slane %v279_v32, 1  ;;  %v369_v41 = vsel %vm368_vm7, %v366_v33, %v367_v31  ;;  %v6982_v35 = vld [vmem:[#allocation2 + $0x140] ss:$8 sps:$4 sm:$0xff]   ;;  %vm5999_vm14 = vmpackc.low %vm5998_vm12, %vm7821_vm13 }
 0x10a   : > { %v388_v42 = vmax.f32 %v344_v34, %v384_v38  ;;  %v345_v43 = vsel %vm343_vm5, %v340_v39, %v341_v27  ;;  %v346_v44 = vsel %vm343_vm5, %v339_v28, %v340_v39  ;;  %v6983_v36 = vld [vmem:[#allocation2 + $0x130] ss:$8 sps:$4 sm:$0xff]   ;;  %v6986_v39 = vld [vmem:[#allocation2 + $0x100] ss:$8 sps:$4 sm:$0xff]  }
 0x10b   : > { %v370_v45 = vsel %vm368_vm7, %v365_v40, %v366_v33  ;;  %v371_v46 = vsel %vm368_vm7, %v364_v29, %v365_v40  ;;  %v387_v50 = vmax.f32 %v345_v43, %v369_v41  ;;  %v6985_v38 = vld [vmem:[#allocation2 + $0x110] ss:$8 sps:$4 sm:$0xff]   ;;  %v6988_v41 = vld [vmem:[#allocation2 + $0xe0] ss:$8 sps:$4 sm:$0xff]  }
 0x10c   : > { %v392_v47 = vmax.f32 %v281_v24, %v388_v42  ;;  %v385_v48 = vmax.f32 %v356_v37, %v371_v46  ;;  %v386_v49 = vmax.f32 %v346_v44, %v370_v45  ;;  %v6984_v37 = vld [vmem:[#allocation2 + $0x120] ss:$8 sps:$4 sm:$0xff]   ;;  %v6987_v40 = vld [vmem:[#allocation2 + $0xf0] ss:$8 sps:$4 sm:$0xff]  }
 0x10d   : > { %v391_v51 = vmax.f32 %v280_v18, %v387_v50  ;;  %v6989_v42 = vld [vmem:[#allocation2 + $0xd0] ss:$8 sps:$4 sm:$0xff]   ;;  %v6990_v43 = vld [vmem:[#allocation2 + $0x180] ss:$8 sps:$4 sm:$0xff]  }
 0x10e   : > { %v390_v52 = vmax.f32 %v279_v32, %v386_v49  ;;  %v389_v54 = vmax.f32 %v278_v20, %v385_v48  ;;  %v6991_v44 = vld [vmem:[#allocation2 + $0x170] ss:$8 sps:$4 sm:$0xff]   ;;  %v6992_v45 = vld [vmem:[#allocation2 + $0x160] ss:$8 sps:$4 sm:$0xff]  }
 0x10f   : > { %v394_v53 = vpack.c.bf16 %v392_v47, %v391_v51  ;;  %v532_v46 = vld [vmem:[#allocation5 + $0x1] ss:$0 sm:$0xff]  ;;  %v6993_v47 = vld [vmem:[#allocation2 + $0x150] ss:$8 sps:$4 sm:$0xff]  }
 0x110   : > { %v393_v56 = vpack.c.bf16 %v390_v52, %v389_v54 }
 0x111   : > { %6777 = vmatpush3.bf16.msra.mxu1 %v394_v53 }
 0x112   : > { %6778 = vmatprep.subr.bf16.mxu1 %v7817_v7 }
 0x115   : > { %6779 = vmatpush3.bf16.msra.mxu1 %v393_v56 }
 0x116   : > { %775 = vmatprep.subr.bf16.mxu1 %v7819_v58 }
 0x118   : > { %6781 = vmatmul.mubr.msk.bf16.vlgmr.msra.gmra.mxu1 %vm402_vm8, %v6969_v55 }
 0x119   : > { %776 = vmatpush1.bf16.msra.mxu1 %v6982_v35 }
 0x11a   : > { %777 = vmatprep.subr.bf16.mxu1 %v7819_v58 }
 0x11d   : > { %778 = vmatpush1.bf16.msra.mxu1 %v6983_v36 }
 0x11e   : > { %779 = vmatprep.subr.bf16.mxu1 %v7819_v58 }
 0x121   : > { %780 = vmatpush1.bf16.msra.mxu1 %v6984_v37 }
 0x122   : > { %781 = vmatprep.subr.bf16.mxu1 %v7819_v58 }
 0x125   : > { %782 = vmatpush1.bf16.msra.mxu1 %v6985_v38 }
 0x126   : > { %783 = vmatprep.subr.bf16.mxu1 %v7819_v58 }
 0x129   : > { %784 = vmatpush1.bf16.msra.mxu1 %v6986_v39 }
 0x12a   : > { %785 = vmatprep.subr.bf16.mxu1 %v7819_v58 }
 0x12d   : > { %786 = vmatpush1.bf16.msra.mxu1 %v6987_v40 }
 0x12e   : > { %787 = vmatprep.subr.bf16.mxu1 %v7819_v58 }
 0x131   : > { %788 = vmatpush1.bf16.msra.mxu1 %v6988_v41 }
 0x132   : > { %789 = vmatprep.subr.bf16.mxu1 %v7819_v58 }
 0x135   : > { %790 = vmatpush1.bf16.msra.mxu1 %v6989_v42 }
 0x136   : > { %799 = vmatprep.subr.bf16.mxu1 %v7819_v58 }
 0x139   : > { %800 = vmatpush2.bf16.msra.mxu1 %v6990_v43 }
 0x13a   : > { %801 = vmatprep.subr.bf16.mxu1 %v7819_v58 }
 0x13d   : > { %802 = vmatpush2.bf16.msra.mxu1 %v6991_v44 }
 0x13e   : > { %803 = vmatprep.subr.bf16.mxu1 %v7819_v58 }
 0x141   : > { %804 = vmatpush2.bf16.msra.mxu1 %v6992_v45 }
 0x142   : > { %805 = vmatprep.subr.bf16.mxu1 %v7819_v58 }
 0x145   : > { %806 = vmatpush2.bf16.msra.mxu1 %v6993_v47 }
 0x146   : > { %1111 = vmatprep.subr.bf16.mxu1 %v7819_v58 }
 0x1d8   : > { %v7994_v8 = vpop.f32.mrf.mxu1 }
 0x1d9   : > { %v485_v13 = vrot.slane %v7994_v8, 1  ;;  %v473_v24 = vrot.slane %v7994_v8, 7 }
 0x1da   : > { %v6782_v11 = vpop.f32.mrf.mxu1 }
 0x1dc   : > { %v7996_v12 = vpop.f32.mrf.mxu1 }
 0x1dd   : > { %v486_v14 = vrot.slane %v7996_v12, 1  ;;  %v6940_v15 = vpack.i.bf16 %v7996_v12, %v7994_v8  ;;  %v474_v22 = vrot.slane %v7996_v12, 7 }
 0x1de   : > { %v6783_v17 = vpop.f32.mrf.mxu1 }
 0x1df   : > { %6941 = vrot.lane.b32.xlu0 %v6940_v15, %s7820_s27  ;;  %v487_v18 = vsel %vm368_vm7, %v485_v13, %v486_v14  ;;  %v488_v19 = vsel %vm368_vm7, %v486_v14, %v485_v13  ;;  %v476_v26 = vsel %vm343_vm5, %v474_v22, %v473_v24  ;;  %v475_v30 = vsel %vm343_vm5, %v473_v24, %v474_v22  ;;  %v6994_v15 = vld [vmem:[#allocation2 + $0x200] ss:$8 sps:$4 sm:$0xff]   ;;  %v6995_v17 = vld [vmem:[#allocation2 + $0x1f0] ss:$8 sps:$4 sm:$0xff]  }
 0x1e0   : > { %v494_v20 = vsel %vm8002_vm9, 0.0, %v488_v19  ;;  %v481_v31 = vsel %vm8017_vm11, 0.0, %v476_v26  ;;  %v6997_v19 = vld [vmem:[#allocation2 + $0x1d0] ss:$8 sps:$4 sm:$0xff]   ;;  %v7000_v22 = vld [vmem:[#allocation2 + $0x1a0] ss:$8 sps:$4 sm:$0xff]  }
 0x1e1   : > { %v507_v21 = vpack.c.bf16 %v494_v20, %v487_v18  ;;  %v6996_v18 = vld [vmem:[#allocation2 + $0x1e0] ss:$8 sps:$4 sm:$0xff]   ;;  %v7003_v26 = vld [vmem:[#allocation2 + $0x230] ss:$8 sps:$4 sm:$0xff]  }
 0x1e2   : > { %v6998_v20 = vld [vmem:[#allocation2 + $0x1c0] ss:$8 sps:$4 sm:$0xff]  }
 0x1e3   : > { %5958 = vmatprep.mubr.msk.bf16.mxu0 %vm503_vm10, %v507_v21  ;;  %v6999_v21 = vld [vmem:[#allocation2 + $0x1b0] ss:$8 sps:$4 sm:$0xff]   ;;  %v7002_v24 = vld [vmem:[#allocation2 + $0x240] ss:$8 sps:$4 sm:$0xff]  }
 0x251   : > { %v6942_v27 = vpop.permute.xlu0 %6941 }
 0x252   : > { %v6944_v28 = vunpack.i.h.bf16 %v6942_v27  ;;  %v6943_v29 = vunpack.i.l.bf16 %v6942_v27  ;;  %v7004_v27 = vld [vmem:[#allocation2 + $0x220] ss:$8 sps:$4 sm:$0xff]  }
 0x254   : > { %v504_v32 = vsel %vm503_vm10, %v481_v31, %v6943_v29  ;;  %v505_v33 = vsel %vm503_vm10, %v475_v30, %v6944_v28  ;;  %v699_v28 = vld [vmem:[#allocation5 + $0x2] ss:$0 sm:$0xff]  ;;  %v7005_v30 = vld [vmem:[#allocation2 + $0x210] ss:$8 sps:$4 sm:$0xff]  }
 0x255   : > { %v506_v34 = vpack.c.bf16 %v505_v33, %v504_v32 }
 0x257   : > { %641 = vmatmul.mubr.bf16.vlgmr.msra.gmra.mxu0 %v506_v34 }
 0x258   : > { %945 = vmatpush1.bf16.msra.mxu0 %v6994_v15 }
 0x259   : > { %946 = vmatprep.subr.bf16.mxu0 %v7819_v58 }
 0x25c   : > { %947 = vmatpush1.bf16.msra.mxu0 %v6995_v17 }
 0x25d   : > { %948 = vmatprep.subr.bf16.mxu0 %v7819_v58 }
 0x260   : > { %949 = vmatpush1.bf16.msra.mxu0 %v6996_v18 }
 0x261   : > { %950 = vmatprep.subr.bf16.mxu0 %v7819_v58 }
 0x264   : > { %951 = vmatpush1.bf16.msra.mxu0 %v6997_v19 }
 0x265   : > { %952 = vmatprep.subr.bf16.mxu0 %v7819_v58 }
 0x268   : > { %953 = vmatpush1.bf16.msra.mxu0 %v6998_v20 }
 0x269   : > { %954 = vmatprep.subr.bf16.mxu0 %v7819_v58 }
 0x26c   : > { %955 = vmatpush1.bf16.msra.mxu0 %v6999_v21 }
 0x26d   : > { %956 = vmatprep.subr.bf16.mxu0 %v7819_v58 }
 0x270   : > { %957 = vmatpush1.bf16.msra.mxu0 %v7000_v22 }
 0x271   : > { %958 = vmatprep.subr.bf16.mxu0 %v7819_v58 }
 0x274   : > { %959 = vmatpush1.bf16.msra.mxu0 %v7001_v23 }
 0x275   : > { %968 = vmatprep.subr.bf16.mxu0 %v7819_v58 }
 0x278   : > { %969 = vmatpush2.bf16.msra.mxu0 %v7002_v24 }
 0x279   : > { %970 = vmatprep.subr.bf16.mxu0 %v7819_v58 }
 0x27c   : > { %971 = vmatpush2.bf16.msra.mxu0 %v7003_v26 }
 0x27d   : > { %972 = vmatprep.subr.bf16.mxu0 %v7819_v58 }
 0x280   : > { %973 = vmatpush2.bf16.msra.mxu0 %v7004_v27 }
 0x281   : > { %974 = vmatprep.subr.bf16.mxu0 %v7819_v58 }
 0x284   : > { %975 = vmatpush2.bf16.msra.mxu0 %v7005_v30 }
 0x317   : > { %v642_v48 = vpop.f32.mrf.mxu0 }
 0x318   : > { %v643_v49 = vadd.f32 %v642_v48, %v532_v46 }
 0x319   : > { %v644_v50 = vpop.f32.mrf.mxu0 }
 0x31a   : > { %v649_v51 = vmax.f32 %v643_v49, 0.0 }
 0x31b   : > { %v645_v52 = vpop.f32.mrf.mxu0 }
 0x31c   : > { %v646_v53 = vadd.f32 %v645_v52, %v532_v46  ;;  %v651_v56 = vrot.slane %v649_v51, 7  ;;  %v657_v57 = vrot.slane %v649_v51, 1 }
 0x31d   : > { %v647_v54 = vpop.f32.mrf.mxu0 }
 0x31e   : > { %v650_v55 = vmax.f32 %v646_v53, 0.0 }
 0x320   : > { %v652_v59 = vrot.slane %v650_v55, 7  ;;  %v658_v60 = vrot.slane %v650_v55, 1  ;;  %v6945_v61 = vpack.i.bf16 %v650_v55, %v649_v51 }
 0x322   : > { %6946 = vrot.lane.b32.xlu0 %v6945_v61, %s7820_s27  ;;  %v659_v62 = vsel %vm368_vm7, %v657_v57, %v658_v60  ;;  %v660_v63 = vsel %vm368_vm7, %v658_v60, %v657_v57  ;;  %v653_v0 = vsel %vm343_vm5, %v651_v56, %v652_v59  ;;  %v654_v1 = vsel %vm343_vm5, %v652_v59, %v651_v56  ;;  %v7006_v56 = vld [vmem:[#allocation2 + $0x2c0] ss:$8 sps:$4 sm:$0xff]   ;;  %v7007_v57 = vld [vmem:[#allocation2 + $0x2b0] ss:$8 sps:$4 sm:$0xff]  }
 0x323   : > { %v662_v2 = vsel %vm8002_vm9, 0.0, %v660_v63  ;;  %v655_v10 = vsel %vm8017_vm11, 0.0, %v654_v1  ;;  %v7008_v59 = vld [vmem:[#allocation2 + $0x2a0] ss:$8 sps:$4 sm:$0xff]   ;;  %v7009_v60 = vld [vmem:[#allocation2 + $0x290] ss:$8 sps:$4 sm:$0xff]  }
 0x324   : > { %v674_v3 = vpack.c.bf16 %v662_v2, %v659_v62  ;;  %v7010_v61 = vld [vmem:[#allocation2 + $0x280] ss:$8 sps:$4 sm:$0xff]   ;;  %v7011_v62 = vld [vmem:[#allocation2 + $0x270] ss:$8 sps:$4 sm:$0xff]  }
 0x325   : > { %v7012_v63 = vld [vmem:[#allocation2 + $0x260] ss:$8 sps:$4 sm:$0xff]   ;;  %v7015_v2 = vld [vmem:[#allocation2 + $0x2f0] ss:$8 sps:$4 sm:$0xff]  }
 0x326   : > { %5971 = vmatprep.mubr.msk.bf16.mxu1 %vm503_vm10, %v674_v3  ;;  %v7014_v1 = vld [vmem:[#allocation2 + $0x300] ss:$8 sps:$4 sm:$0xff]  }
 0x327   : > { %v7016_v3 = vld [vmem:[#allocation2 + $0x2e0] ss:$8 sps:$4 sm:$0xff]  }
 0x394   : > { %v6947_v4 = vpop.permute.xlu0 %6946 }
 0x395   : > { %v6949_v5 = vunpack.i.h.bf16 %v6947_v4  ;;  %v6948_v6 = vunpack.i.l.bf16 %v6947_v4  ;;  %v868_v4 = vld [vmem:[#allocation5 + $0x3] ss:$0 sm:$0xff] }
 0x397   : > { %v671_v11 = vsel %vm503_vm10, %v655_v10, %v6948_v6  ;;  %v672_v13 = vsel %vm503_vm10, %v653_v0, %v6949_v5  ;;  %v7013_v0 = vld [vmem:[#allocation2 + $0x250] ss:$8 sps:$4 sm:$0xff]  }
 0x398   : > { %v673_v14 = vpack.c.bf16 %v672_v13, %v671_v11  ;;  %v7017_v5 = vld [vmem:[#allocation2 + $0x2d0] ss:$8 sps:$4 sm:$0xff]  }
 0x39a   : > { %808 = vmatmul.mubr.bf16.vlgmr.msra.gmra.mxu1 %v673_v14 }
 0x39b   : > { %1112 = vmatpush1.bf16.msra.mxu1 %v7006_v56 }
 0x39c   : > { %1113 = vmatprep.subr.bf16.mxu1 %v7819_v58 }
 0x39f   : > { %1114 = vmatpush1.bf16.msra.mxu1 %v7007_v57 }
 0x3a0   : > { %1115 = vmatprep.subr.bf16.mxu1 %v7819_v58 }
 0x3a3   : > { %1116 = vmatpush1.bf16.msra.mxu1 %v7008_v59  ;;  %v7020_v59 = vld [vmem:[#allocation2 + $0x360] ss:$8 sps:$4 sm:$0xff]  }
 0x3a4   : > { %1117 = vmatprep.subr.bf16.mxu1 %v7819_v58 }
 0x3a7   : > { %1118 = vmatpush1.bf16.msra.mxu1 %v7009_v60  ;;  %v7021_v60 = vld [vmem:[#allocation2 + $0x350] ss:$8 sps:$4 sm:$0xff]  }
 0x3a8   : > { %1119 = vmatprep.subr.bf16.mxu1 %v7819_v58 }
 0x3ab   : > { %1120 = vmatpush1.bf16.msra.mxu1 %v7010_v61  ;;  %v7022_v61 = vld [vmem:[#allocation2 + $0x340] ss:$8 sps:$4 sm:$0xff]  }
 0x3ac   : > { %1121 = vmatprep.subr.bf16.mxu1 %v7819_v58 }
 0x3af   : > { %1122 = vmatpush1.bf16.msra.mxu1 %v7011_v62  ;;  %v7023_v62 = vld [vmem:[#allocation2 + $0x330] ss:$8 sps:$4 sm:$0xff]  }
 0x3b0   : > { %1123 = vmatprep.subr.bf16.mxu1 %v7819_v58 }
 0x3b3   : > { %1124 = vmatpush1.bf16.msra.mxu1 %v7012_v63  ;;  %v7024_v63 = vld [vmem:[#allocation2 + $0x320] ss:$8 sps:$4 sm:$0xff]  }
 0x3b4   : > { %1125 = vmatprep.subr.bf16.mxu1 %v7819_v58 }
 0x3b7   : > { %1126 = vmatpush1.bf16.msra.mxu1 %v7013_v0  ;;  %v7025_v0 = vld [vmem:[#allocation2 + $0x310] ss:$8 sps:$4 sm:$0xff]  }
 0x3b8   : > { %1135 = vmatprep.subr.bf16.mxu1 %v7819_v58 }
 0x3bb   : > { %1136 = vmatpush2.bf16.msra.mxu1 %v7014_v1  ;;  %v7026_v1 = vld [vmem:[#allocation2 + $0x3c0] ss:$8 sps:$4 sm:$0xff]  }
 0x3bc   : > { %1137 = vmatprep.subr.bf16.mxu1 %v7819_v58 }
 0x3bf   : > { %1138 = vmatpush2.bf16.msra.mxu1 %v7015_v2  ;;  %v7027_v2 = vld [vmem:[#allocation2 + $0x3b0] ss:$8 sps:$4 sm:$0xff]  }
 0x3c0   : > { %1139 = vmatprep.subr.bf16.mxu1 %v7819_v58 }
 0x3c3   : > { %1140 = vmatpush2.bf16.msra.mxu1 %v7016_v3  ;;  %v7028_v3 = vld [vmem:[#allocation2 + $0x3a0] ss:$8 sps:$4 sm:$0xff]  }
 0x3c4   : > { %1141 = vmatprep.subr.bf16.mxu1 %v7819_v58 }
 0x3c7   : > { %1142 = vmatpush2.bf16.msra.mxu1 %v7017_v5 }
 0x3c8   : > { %1328 = vmatprep.subr.bf16.mxu1 %v7819_v58 }
 0x45a   : > { %v809_v29 = vpop.f32.mrf.mxu1 }
 0x45b   : > { %v810_v31 = vadd.f32 %v809_v29, %v699_v28 }
 0x45c   : > { %v811_v32 = vpop.f32.mrf.mxu1 }
 0x45d   : > { %v816_v33 = vadd.f32 %v810_v31, %v7994_v8 }
 0x45e   : > { %v812_v34 = vpop.f32.mrf.mxu1 }
 0x45f   : > { %v813_v35 = vadd.f32 %v812_v34, %v699_v28  ;;  %v8069_v37 = vmax.f32 %v816_v33, 0.0 }
 0x460   : > { %v814_v36 = vpop.f32.mrf.mxu1 }
 0x461   : > { %v817_v38 = vadd.f32 %v813_v35, %v7996_v12  ;;  %v826_v40 = vrot.slane %v8069_v37, 1  ;;  %v820_v46 = vrot.slane %v8069_v37, 7 }
 0x463   : > { %v8072_v39 = vmax.f32 %v817_v38, 0.0 }
 0x465   : > { %v827_v41 = vrot.slane %v8072_v39, 1  ;;  %v6950_v42 = vpack.i.bf16 %v8072_v39, %v8069_v37  ;;  %v821_v45 = vrot.slane %v8072_v39, 7 }
 0x467   : > { %6951 = vrot.lane.b32.xlu1 %v6950_v42, %s7820_s27  ;;  %v828_v8 = vsel %vm368_vm7, %v826_v40, %v827_v41  ;;  %v829_v43 = vsel %vm368_vm7, %v827_v41, %v826_v40  ;;  %v823_v47 = vsel %vm343_vm5, %v821_v45, %v820_v46  ;;  %v822_v51 = vsel %vm343_vm5, %v820_v46, %v821_v45  ;;  %v1035_v40 = vld [vmem:[#allocation5 + $0x4] ss:$0 sm:$0xff] }
 0x468   : > { %v831_v12 = vsel %vm8002_vm9, 0.0, %v829_v43  ;;  %v824_v52 = vsel %vm8017_vm11, 0.0, %v823_v47 }
 0x469   : > { %v843_v44 = vpack.c.bf16 %v831_v12, %v828_v8 }
 0x46b   : > { %5984 = vmatprep.mubr.msk.bf16.mxu0 %vm503_vm10, %v843_v44 }
 0x4d9   : > { %v6952_v48 = vpop.permute.xlu1 %6951 }
 0x4da   : > { %v6954_v49 = vunpack.i.h.bf16 %v6952_v48  ;;  %v6953_v50 = vunpack.i.l.bf16 %v6952_v48  ;;  %v7018_v48 = vld [vmem:[#allocation2 + $0x380] ss:$8 sps:$4 sm:$0xff]  }
 0x4dc   : > { %v840_v53 = vsel %vm503_vm10, %v824_v52, %v6953_v50  ;;  %v841_v54 = vsel %vm503_vm10, %v822_v51, %v6954_v49  ;;  %v7019_v51 = vld [vmem:[#allocation2 + $0x370] ss:$8 sps:$4 sm:$0xff]  }
 0x4dd   : > { %v842_v55 = vpack.c.bf16 %v841_v54, %v840_v53 }
 0x4df   : > { %977 = vmatmul.mubr.bf16.vlgmr.msra.gmra.mxu0 %v842_v55 }
 0x4e0   : > { %1217 = vmatprep.mubr.bf16.mxu0 %v7819_v58 }
 0x59f   : > { %v978_v6 = vpop.f32.mrf.mxu0 }
 0x5a0   : > { %v979_v10 = vadd.f32 %v978_v6, %v868_v4 }
 0x5a1   : > { %v980_v11 = vpop.f32.mrf.mxu0 }
 0x5a2   : > { %v985_v13 = vmax.f32 %v979_v10, 0.0 }
 0x5a3   : > { %v981_v14 = vpop.f32.mrf.mxu0 }
 0x5a4   : > { %v982_v15 = vadd.f32 %v981_v14, %v868_v4  ;;  %v987_v19 = vrot.slane %v985_v13, 7  ;;  %v993_v20 = vrot.slane %v985_v13, 1 }
 0x5a5   : > { %v983_v17 = vpop.f32.mrf.mxu0 }
 0x5a6   : > { %v986_v18 = vmax.f32 %v982_v15, 0.0  ;;  %v1156_v15 = vld [vmem:[#allocation2 + $0x16c0] sm:$0xf]  ;;  %v7029_v17 = vld [vmem:[#allocation2 + $0x390] ss:$8 sps:$4 sm:$0xff]  }
 0x5a8   : > { %v988_v21 = vrot.slane %v986_v18, 7  ;;  %v994_v22 = vrot.slane %v986_v18, 1  ;;  %v6955_v23 = vpack.i.bf16 %v986_v18, %v985_v13  ;;  %v7031_v18 = vld [vmem:[#allocation2 + $0x570] ss:$8 sps:$4 sm:$0xff]  }
 0x5aa   : > { %6956 = vrot.lane.b32.xlu1 %v6955_v23, %s7820_s27  ;;  %v995_v24 = vsel %vm368_vm7, %v993_v20, %v994_v22  ;;  %v996_v26 = vsel %vm368_vm7, %v994_v22, %v993_v20  ;;  %v989_v27 = vsel %vm343_vm5, %v987_v19, %v988_v21  ;;  %v990_v28 = vsel %vm343_vm5, %v988_v21, %v987_v19  ;;  %v7032_v19 = vld [vmem:[#allocation2 + $0x560] ss:$8 sps:$4 sm:$0xff]   ;;  %v7033_v20 = vld [vmem:[#allocation2 + $0x550] ss:$8 sps:$4 sm:$0xff]  }
 0x5ab   : > { %v998_v29 = vsel %vm8002_vm9, 0.0, %v996_v26  ;;  %v991_v34 = vsel %vm8017_vm11, 0.0, %v990_v28  ;;  %v7034_v21 = vld [vmem:[#allocation2 + $0x4c0] ss:$8 sps:$4 sm:$0xff]   ;;  %vm2319_vm9 = vcmask 64512  }
 0x5ac   : > { %v1010_v30 = vpack.c.bf16 %v998_v29, %v995_v24 }
 0x5ae   : > { %5997 = vmatprep.mubr.msk.bf16.mxu1 %vm503_vm10, %v1010_v30  ;;  %v7039_v30 = vld [vmem:[#allocation2 + $0x530] ss:$8 sps:$4 sm:$0xff]  }
 0x61c   : > { %v6957_v31 = vpop.permute.xlu1 %6956 }
 0x61d   : > { %v6959_v32 = vunpack.i.h.bf16 %v6957_v31  ;;  %v6958_v33 = vunpack.i.l.bf16 %v6957_v31  ;;  %v7042_v31 = vld [vmem:[#allocation2 + $0x520] ss:$8 sps:$4 sm:$0xff]  }
 0x61f   : > { %v1007_v35 = vsel %vm503_vm10, %v991_v34, %v6958_v33  ;;  %v1008_v36 = vsel %vm503_vm10, %v989_v27, %v6959_v32  ;;  %v7036_v27 = vld [vmem:[#allocation2 + $0x540] ss:$8 sps:$4 sm:$0xff]   ;;  %v7045_v32 = vld [vmem:[#allocation2 + $0x510] ss:$8 sps:$4 sm:$0xff]  }
 0x620   : > { %v1009_v38 = vpack.c.bf16 %v1008_v36, %v1007_v35  ;;  %v7048_v33 = vld [vmem:[#allocation2 + $0x500] ss:$8 sps:$4 sm:$0xff]   ;;  %v7051_v34 = vld [vmem:[#allocation2 + $0x4f0] ss:$8 sps:$4 sm:$0xff]  }
 0x621   : > { %v7054_v35 = vld [vmem:[#allocation2 + $0x4e0] ss:$8 sps:$4 sm:$0xff]   ;;  %v7057_v36 = vld [vmem:[#allocation2 + $0x4d0] ss:$8 sps:$4 sm:$0xff]  }
 0x622   : > { %1144 = vmatmul.mubr.bf16.vlgmr.msra.gmra.mxu1 %v1009_v38  ;;  %v7035_v38 = vld [vmem:[#allocation2 + $0x440] ss:$8 sps:$4 sm:$0xff]  }
 0x623   : > { %1329 = vmatpush1.bf16.msra.mxu1 %v7018_v48  ;;  %v7050_v48 = vld [vmem:[#allocation2 + $0x3f0] ss:$8 sps:$4 sm:$0xff]  }
 0x624   : > { %1330 = vmatprep.subr.bf16.mxu1 %v7819_v58 }
 0x627   : > { %1331 = vmatpush1.bf16.msra.mxu1 %v7019_v51  ;;  %v7055_v51 = vld [vmem:[#allocation2 + $0x450] ss:$8 sps:$4 sm:$0xff]  }
 0x628   : > { %1332 = vmatprep.subr.bf16.mxu1 %v7819_v58 }
 0x62b   : > { %1333 = vmatpush1.bf16.msra.mxu1 %v7020_v59 }
 0x62c   : > { %1334 = vmatprep.subr.bf16.mxu1 %v7819_v58 }
 0x62f   : > { %1335 = vmatpush1.bf16.msra.mxu1 %v7021_v60 }
 0x630   : > { %1336 = vmatprep.subr.bf16.mxu1 %v7819_v58 }
 0x633   : > { %1337 = vmatpush1.bf16.msra.mxu1 %v7022_v61 }
 0x634   : > { %1338 = vmatprep.subr.bf16.mxu1 %v7819_v58 }
 0x637   : > { %1339 = vmatpush1.bf16.msra.mxu1 %v7023_v62 }
 0x638   : > { %1340 = vmatprep.subr.bf16.mxu1 %v7819_v58 }
 0x63b   : > { %1341 = vmatpush1.bf16.msra.mxu1 %v7024_v63 }
 0x63c   : > { %1342 = vmatprep.subr.bf16.mxu1 %v7819_v58 }
 0x63f   : > { %1343 = vmatpush1.bf16.msra.mxu1 %v7025_v0  ;;  %v7154_v0 = vld [vmem:[#allocation2 + $0x9d0] ss:$8 sps:$4 sm:$0xff]  }
 0x640   : > { %1352 = vmatprep.subr.bf16.mxu1 %v7819_v58 }
 0x643   : > { %1353 = vmatpush2.bf16.msra.mxu1 %v7026_v1 }
 0x644   : > { %1354 = vmatprep.subr.bf16.mxu1 %v7819_v58 }
 0x647   : > { %1355 = vmatpush2.bf16.msra.mxu1 %v7027_v2  ;;  %v7160_v2 = vld [vmem:[#allocation2 + $0x9c0] ss:$8 sps:$4 sm:$0xff]  }
 0x648   : > { %1356 = vmatprep.subr.bf16.mxu1 %v7819_v58 }
 0x64b   : > { %1357 = vmatpush2.bf16.msra.mxu1 %v7028_v3  ;;  %v7059_v3 = vld [vmem:[#allocation2 + $0x600] ss:$8 sps:$4 sm:$0xff]  }
 0x64c   : > { %1358 = vmatprep.subr.bf16.mxu1 %v7819_v58 }
 0x64f   : > { %1359 = vmatpush2.bf16.msra.mxu1 %v7029_v17  ;;  %v7066_v17 = vld [vmem:[#allocation2 + $0x6e0] ss:$8 sps:$4 sm:$0xff]  }
 0x650   : > { %6796 = vmatprep.subr.bf16.mxu1 %v7817_v7 }
 0x6e2   : > { %v1145_v41 = vpop.f32.mrf.mxu1 }
 0x6e3   : > { %v1146_v42 = vadd.f32 %v1145_v41, %v1035_v40 }
 0x6e4   : > { %v1147_v8 = vpop.f32.mrf.mxu1 }
 0x6e5   : > { %v1152_v43 = vadd.f32 %v1146_v42, %v8069_v37  ;;  %v7038_v42 = vld [vmem:[#allocation2 + $0x430] ss:$8 sps:$4 sm:$0xff]   ;;  %v7040_v8 = vld [vmem:[#allocation2 + $0x4a0] ss:$8 sps:$4 sm:$0xff]  }
 0x6e6   : > { %v1148_v12 = vpop.f32.mrf.mxu1 }
 0x6e7   : > { %v1149_v44 = vadd.f32 %v1148_v12, %v1035_v40  ;;  %v1154_v45 = vmax.f32 %v1152_v43, 0.0  ;;  %v7037_v40 = vld [vmem:[#allocation2 + $0x4b0] ss:$8 sps:$4 sm:$0xff]   ;;  %v7041_v43 = vld [vmem:[#allocation2 + $0x420] ss:$8 sps:$4 sm:$0xff]  }
 0x6e8   : > { %v1150_v46 = vpop.f32.mrf.mxu1  ;;  %v7043_v12 = vld [vmem:[#allocation2 + $0x490] ss:$8 sps:$4 sm:$0xff]  }
 0x6e9   : > { %v1153_v47 = vadd.f32 %v1149_v44, %v8072_v39  ;;  %v1157_v50 = vrot.slane %v1154_v45, 7  ;;  %v1163_v52 = vrot.slane %v1154_v45, 1  ;;  %v7044_v44 = vld [vmem:[#allocation2 + $0x410] ss:$8 sps:$4 sm:$0xff]   ;;  %v7047_v46 = vld [vmem:[#allocation2 + $0x400] ss:$8 sps:$4 sm:$0xff]  }
 0x6eb   : > { %v1155_v49 = vmax.f32 %v1153_v47, 0.0  ;;  %v7049_v47 = vld [vmem:[#allocation2 + $0x470] ss:$8 sps:$4 sm:$0xff]  }
 0x6ed   : > { %v1158_v53 = vrot.slane %v1155_v49, 7  ;;  %v1164_v54 = vrot.slane %v1155_v49, 1  ;;  %v6960_v55 = vpack.i.bf16 %v1155_v49, %v1154_v45  ;;  %v7046_v45 = vld [vmem:[#allocation2 + $0x480] ss:$8 sps:$4 sm:$0xff]  }
 0x6ee   : > { %v7052_v49 = vld [vmem:[#allocation2 + $0x460] ss:$8 sps:$4 sm:$0xff]  }
 0x6ef   : > { %6961 = vrot.lane.b32.xlu0 %v6960_v55, %s7820_s27  ;;  %v1165_v37 = vsel %vm368_vm7, %v1163_v52, %v1164_v54  ;;  %v1166_v39 = vsel %vm368_vm7, %v1164_v54, %v1163_v52  ;;  %v1159_v16 = vsel %vm343_vm5, %v1157_v50, %v1158_v53  ;;  %v1160_v56 = vsel %vm343_vm5, %v1158_v53, %v1157_v50  ;;  %v7053_v50 = vld [vmem:[#allocation2 + $0x3e0] ss:$8 sps:$4 sm:$0xff]   ;;  %v7056_v52 = vld [vmem:[#allocation2 + $0x3d0] ss:$8 sps:$4 sm:$0xff]   ;;  %v1252_v55 = vld [vmem:[#allocation5 + $0x5] ss:$0 sm:$0xff] }
 0x6f0   : > { %v6000_v57 = vpack.c.bf16 %v1166_v39, %v1165_v37  ;;  %v1161_v10 = vsel %vm8017_vm11, 0.0, %v1160_v56  ;;  %v7058_v53 = vld [vmem:[#allocation2 + $0x680] ss:$8 sps:$4 sm:$0xff]   ;;  %v1452_v54 = vand.u32 7, %v7941_v9 }
 0x6f1   : > { %v7106_v37 = vld [vmem:[#allocation2 + $0x900] ss:$8 sps:$4 sm:$0xff]  }
 0x6f2   : > { %6001 = vmatprep.subr.msk.bf16.mxu0 %vm5999_vm14, %v6000_v57  ;;  %vm8174_vm0 = vcmp.eq.s32.totalorder %v1452_v54, 0  ;;  %vm8178_vm2 = vcmp.eq.s32.totalorder %v1452_v54, 7 }
 0x6f3   : > { %vm6045_vm4 = vmneg %vm8174_vm0 }
 0x6f4   : > { %vm6050_vm5 = vmneg %vm8178_vm2 }
 0x6f5   : > { %vm8186_vm6 = vmpackc.low %vm6045_vm4, %vm6045_vm4 }
 0x6f6   : > { %vm8190_vm7 = vmpackc.low %vm6050_vm5, %vm6050_vm5 }
 0x761   : > { %v6962_v4 = vpop.permute.xlu0 %6961 }
 0x762   : > { %v6964_v5 = vunpack.i.h.bf16 %v6962_v4  ;;  %v6963_v6 = vunpack.i.l.bf16 %v6962_v4  ;;  %v7060_v4 = vld [vmem:[#allocation2 + $0x700] ss:$8 sps:$4 sm:$0xff]  }
 0x764   : > { %v1177_v11 = vsel %vm503_vm10, %v1161_v10, %v6963_v6  ;;  %v1178_v13 = vsel %vm503_vm10, %v1159_v16, %v6964_v5  ;;  %v7061_v10 = vld [vmem:[#allocation2 + $0x670] ss:$8 sps:$4 sm:$0xff]   ;;  %v7111_v16 = vld [vmem:[#allocation2 + $0x8f4] ss:$8 sps:$4 sm:$0xff]  }
 0x765   : > { %v1179_v14 = vpack.c.bf16 %v1178_v13, %v1177_v11  ;;  %v7062_v11 = vld [vmem:[#allocation2 + $0x5f0] ss:$8 sps:$4 sm:$0xff]  }
 0x766   : > { %v7063_v13 = vld [vmem:[#allocation2 + $0x6f0] ss:$8 sps:$4 sm:$0xff]  }
 0x767   : > { %1200 = vmatpush1.bf16.msra.mxu0 %v1179_v14  ;;  %v7064_v14 = vld [vmem:[#allocation2 + $0x660] ss:$8 sps:$4 sm:$0xff]  }
 0x768   : > { %6784 = vmatprep.subr.bf16.mxu0 %v7817_v7 }
 0x76a   : > { %6002 = vmatmul.mubr.msk.bf16.vlgmr.msra.gmra.mxu0 %vm1181_vm15, %v1156_v15  ;;  %v7065_v15 = vld [vmem:[#allocation2 + $0x5e0] ss:$8 sps:$4 sm:$0xff]  }
 0x76b   : > { %6792 = vmatprep.mubr.msk.bf16.mxu0 %vm7818_vm3, %v7817_v7  ;;  %6785 = vmatpush3.bf16.msra.mxu0 %v7030_v25  ;;  %v7067_v25 = vld [vmem:[#allocation2 + $0x650] ss:$8 sps:$4 sm:$0xff]  }
 0x76c   : > { %6786 = vmatprep.subr.bf16.mxu0 %v7817_v7 }
 0x76f   : > { %6787 = vmatpush3.bf16.msra.mxu0 %v7031_v18  ;;  %v7068_v18 = vld [vmem:[#allocation2 + $0x5d0] ss:$8 sps:$4 sm:$0xff]  }
 0x770   : > { %6788 = vmatprep.subr.bf16.mxu0 %v7817_v7 }
 0x773   : > { %6789 = vmatpush3.bf16.msra.mxu0 %v7032_v19  ;;  %v7069_v19 = vld [vmem:[#allocation2 + $0x6d0] ss:$8 sps:$4 sm:$0xff]  }
 0x774   : > { %6790 = vmatprep.subr.bf16.mxu0 %v7817_v7 }
 0x777   : > { %6791 = vmatpush3.bf16.msra.mxu0 %v7033_v20  ;;  %v7070_v20 = vld [vmem:[#allocation2 + $0x640] ss:$8 sps:$4 sm:$0xff]  }
 0x778   : > { %6606 = vmatprep.subr.bf16.mxu0 %v7034_v21  ;;  %v7071_v21 = vld [vmem:[#allocation2 + $0x5c0] ss:$8 sps:$4 sm:$0xff]  }
 0x82a   : > { %v1219_v22 = vpop.f32.mrf.mxu0 }
 0x82b   : > { %v1226_v23 = vpack.c.bf16 %v1219_v22, %v1219_v22  ;;  %v7072_v22 = vld [vmem:[#allocation2 + $0x6c0] ss:$8 sps:$4 sm:$0xff]  }
 0x82c   : > { %v1221_v24 = vpop.f32.mrf.mxu0 }
 0x82d   : > { %v1227_v26 = vpack.c.bf16 %v1221_v24, %v1221_v24  ;;  %1379 = vrot.lane.b32.xlu1 %v1226_v23, %s7820_s27  ;;  %v7074_v24 = vld [vmem:[#allocation2 + $0x5b0] ss:$8 sps:$4 sm:$0xff]  }
 0x82e   : > { %v1223_v28 = vpop.f32.mrf.mxu0 }
 0x82f   : > { %6015 = vmatprep.mubr.msk.bf16.mxu1 %vm503_vm10, %v1227_v26  ;;  %v7075_v26 = vld [vmem:[#allocation2 + $0x6b0] ss:$8 sps:$4 sm:$0xff]   ;;  %v7077_v28 = vld [vmem:[#allocation2 + $0x5a0] ss:$8 sps:$4 sm:$0xff]  }
 0x830   : > { %v1224_v29 = vpop.f32.mrf.mxu0  ;;  %1361 = vmatmul.mubr.bf16.vlgmr.msra.gmra.mxu1 %v1226_v23  ;;  %v7073_v23 = vld [vmem:[#allocation2 + $0x630] ss:$8 sps:$4 sm:$0xff]  }
 0x831   : > { %6797 = vmatpush3.bf16.msra.mxu1 %v7036_v27  ;;  %6812 = vmatprep.mubr.msk.bf16.mxu1 %vm7818_vm3, %v7817_v7  ;;  %v7076_v27 = vld [vmem:[#allocation2 + $0x620] ss:$8 sps:$4 sm:$0xff]  }
 0x832   : > { %6798 = vmatprep.subr.bf16.mxu1 %v7817_v7  ;;  %v7078_v29 = vld [vmem:[#allocation2 + $0x6a0] ss:$8 sps:$4 sm:$0xff]  }
 0x835   : > { %6799 = vmatpush3.bf16.msra.mxu1 %v7039_v30  ;;  %v7079_v30 = vld [vmem:[#allocation2 + $0x610] ss:$8 sps:$4 sm:$0xff]  }
 0x836   : > { %6800 = vmatprep.subr.bf16.mxu1 %v7817_v7 }
 0x839   : > { %6801 = vmatpush3.bf16.msra.mxu1 %v7042_v31  ;;  %v7080_v31 = vld [vmem:[#allocation2 + $0x590] ss:$8 sps:$4 sm:$0xff]  }
 0x83a   : > { %6802 = vmatprep.subr.bf16.mxu1 %v7817_v7 }
 0x83d   : > { %6803 = vmatpush3.bf16.msra.mxu1 %v7045_v32  ;;  %v7081_v32 = vld [vmem:[#allocation2 + $0x690] ss:$8 sps:$4 sm:$0xff]  }
 0x83e   : > { %6804 = vmatprep.subr.bf16.mxu1 %v7817_v7 }
 0x841   : > { %6805 = vmatpush3.bf16.msra.mxu1 %v7048_v33  ;;  %v7082_v33 = vld [vmem:[#allocation2 + $0x800] ss:$8 sps:$4 sm:$0xff]  }
 0x842   : > { %6806 = vmatprep.subr.bf16.mxu1 %v7817_v7 }
 0x845   : > { %6807 = vmatpush3.bf16.msra.mxu1 %v7051_v34 }
 0x846   : > { %6808 = vmatprep.subr.bf16.mxu1 %v7817_v7 }
 0x849   : > { %6809 = vmatpush3.bf16.msra.mxu1 %v7054_v35 }
 0x84a   : > { %6810 = vmatprep.subr.bf16.mxu1 %v7817_v7 }
 0x84d   : > { %6811 = vmatpush3.bf16.msra.mxu1 %v7057_v36 }
 0x84e   : > { %6816 = vmatprep.subr.bf16.mxu1 %v7817_v7 }
 0x89f   : > { %v1380_v41 = vpop.permute.xlu1 %1379 }
 0x8a0   : > { %6793 = vmatmul.mubr.msk.bf16.vlgmr.msra.gmra.mxu0 %vm503_vm10, %v1380_v41  ;;  %vm2964_vm10 = vcmask 1047556  }
 0x8a1   : > { %6607 = vmatpush3.bf16.msra.mxu0 %v7035_v38 }
 0x8a2   : > { %6608 = vmatprep.subr.bf16.mxu0 %v7037_v40 }
 0x8a5   : > { %6609 = vmatpush3.bf16.msra.mxu0 %v7038_v42  ;;  %v1521_v42 = vld [vmem:[#allocation5 + $0x6] ss:$0 sm:$0xff] }
 0x8a6   : > { %6610 = vmatprep.subr.bf16.mxu0 %v7040_v8 }
 0x8a9   : > { %6611 = vmatpush3.bf16.msra.mxu0 %v7041_v43 }
 0x8aa   : > { %6612 = vmatprep.subr.bf16.mxu0 %v7043_v12 }
 0x8ad   : > { %6613 = vmatpush3.bf16.msra.mxu0 %v7044_v44  ;;  %v1377_v44 = vld [vmem:[#allocation5 + $0x7] ss:$0 sm:$0xff] }
 0x8ae   : > { %6614 = vmatprep.subr.bf16.mxu0 %v7046_v45 }
 0x8b1   : > { %6615 = vmatpush3.bf16.msra.mxu0 %v7047_v46 }
 0x8b2   : > { %6616 = vmatprep.subr.bf16.mxu0 %v7049_v47 }
 0x8b5   : > { %6617 = vmatpush3.bf16.msra.mxu0 %v7050_v48 }
 0x8b6   : > { %6618 = vmatprep.subr.bf16.mxu0 %v7052_v49 }
 0x8b9   : > { %6619 = vmatpush3.bf16.msra.mxu0 %v7053_v50 }
 0x8ba   : > { %6620 = vmatprep.subr.bf16.mxu0 %v7055_v51 }
 0x8bd   : > { %6621 = vmatpush3.bf16.msra.mxu0 %v7056_v52 }
 0x8be   : > { %6637 = vmatprep.subr.bf16.mxu0 %v7058_v53 }
 0x8f0   : > { %v1362_v39 = vpop.f32.mrf.mxu1 }
 0x8f1   : > { %v1363_v56 = vadd.f32 %v1362_v39, %v1252_v55 }
 0x8f2   : > { %v1364_v57 = vpop.f32.mrf.mxu1 }
 0x8f3   : > { %v1368_v59 = vmax.f32 %v1363_v56, 0.0  ;;  %v7083_v56 = vld [vmem:[#allocation2 + $0x780] ss:$8 sps:$4 sm:$0xff]  }
 0x8f4   : > { %v1365_v60 = vpop.f32.mrf.mxu1  ;;  %v7084_v57 = vld [vmem:[#allocation2 + $0x880] ss:$8 sps:$4 sm:$0xff]  }
 0x8f5   : > { %v1461_v61 = vrot.slane %v1368_v59, 7  ;;  %v1466_v62 = vrot.slane %v1368_v59, 1  ;;  %v1471_v63 = vpack.c.bf16 %v1368_v59, %v1368_v59 }
 0x8f6   : > { %v1366_v1 = vpop.f32.mrf.mxu1 }
 0x8f7   : > { %v6048_v5 = vpack.c.bf16 %v1461_v61, %v1461_v61  ;;  %v6053_v6 = vpack.c.bf16 %v1466_v62, %v1466_v62  ;;  %1698 = vmatprep.mubr.bf16.mxu0 %v1471_v63  ;;  %v7085_v61 = vld [vmem:[#allocation2 + $0x7f0] ss:$8 sps:$4 sm:$0xff]   ;;  %v7088_v1 = vld [vmem:[#allocation2 + $0x7e0] ss:$8 sps:$4 sm:$0xff]  }
 0x8f8   : > { %v7086_v62 = vld [vmem:[#allocation2 + $0x770] ss:$8 sps:$4 sm:$0xff]  }
 0x8f9   : > { %6049 = vmatmul.mubr.msk.bf16.vlgmr.msra.gmra.mxu0 %vm8186_vm6, %v6048_v5  ;;  %6813 = vmatmul.mubr.msk.bf16.vlgmr.msra.gmra.mxu1 %vm8190_vm7, %v6053_v6  ;;  %v7087_v63 = vld [vmem:[#allocation2 + $0x870] ss:$8 sps:$4 sm:$0xff]  }
 0x8fa   : > { %6638 = vmatpush3.bf16.msra.mxu0 %v7059_v3  ;;  %6817 = vmatpush3.bf16.msra.mxu1 %v7060_v4  ;;  %v7089_v3 = vld [vmem:[#allocation2 + $0x760] ss:$8 sps:$4 sm:$0xff]   ;;  %v7091_v5 = vld [vmem:[#allocation2 + $0x7d0] ss:$8 sps:$4 sm:$0xff]  }
 0x8fb   : > { %6639 = vmatprep.subr.bf16.mxu0 %v7061_v10  ;;  %6818 = vmatprep.subr.bf16.mxu1 %v7817_v7  ;;  %v7090_v4 = vld [vmem:[#allocation2 + $0x860] ss:$8 sps:$4 sm:$0xff]   ;;  %v7092_v6 = vld [vmem:[#allocation2 + $0x750] ss:$8 sps:$4 sm:$0xff]  }
 0x8fc   : > { %6832 = vmatprep.mubr.msk.bf16.mxu1 %vm7818_vm3, %v7817_v7  ;;  %v7093_v10 = vld [vmem:[#allocation2 + $0x850] ss:$8 sps:$4 sm:$0xff]  }
 0x8fe   : > { %6640 = vmatpush3.bf16.msra.mxu0 %v7062_v11  ;;  %6819 = vmatpush3.bf16.msra.mxu1 %v7063_v13  ;;  %v7094_v11 = vld [vmem:[#allocation2 + $0x7c0] ss:$8 sps:$4 sm:$0xff]  }
 0x8ff   : > { %6641 = vmatprep.subr.bf16.mxu0 %v7064_v14  ;;  %6820 = vmatprep.subr.bf16.mxu1 %v7817_v7  ;;  %v7095_v13 = vld [vmem:[#allocation2 + $0x740] ss:$8 sps:$4 sm:$0xff]  }
 0x900   : > { %v7096_v14 = vld [vmem:[#allocation2 + $0x840] ss:$8 sps:$4 sm:$0xff]  }
 0x902   : > { %6642 = vmatpush3.bf16.msra.mxu0 %v7065_v15  ;;  %6821 = vmatpush3.bf16.msra.mxu1 %v7066_v17  ;;  %v7097_v15 = vld [vmem:[#allocation2 + $0x7b0] ss:$8 sps:$4 sm:$0xff]  }
 0x903   : > { %6643 = vmatprep.subr.bf16.mxu0 %v7067_v25  ;;  %6822 = vmatprep.subr.bf16.mxu1 %v7817_v7  ;;  %v7098_v17 = vld [vmem:[#allocation2 + $0x730] ss:$8 sps:$4 sm:$0xff]  }
 0x904   : > { %v7099_v25 = vld [vmem:[#allocation2 + $0x830] ss:$8 sps:$4 sm:$0xff]  }
 0x906   : > { %6644 = vmatpush3.bf16.msra.mxu0 %v7068_v18  ;;  %6823 = vmatpush3.bf16.msra.mxu1 %v7069_v19  ;;  %v7100_v18 = vld [vmem:[#allocation2 + $0x7a0] ss:$8 sps:$4 sm:$0xff]  }
 0x907   : > { %6824 = vmatprep.subr.bf16.mxu1 %v7817_v7  ;;  %6645 = vmatprep.subr.bf16.mxu0 %v7070_v20  ;;  %v7101_v19 = vld [vmem:[#allocation2 + $0x720] ss:$8 sps:$4 sm:$0xff]  }
 0x908   : > { %v7102_v20 = vld [vmem:[#allocation2 + $0x820] ss:$8 sps:$4 sm:$0xff]  }
 0x90a   : > { %6646 = vmatpush3.bf16.msra.mxu0 %v7071_v21  ;;  %6825 = vmatpush3.bf16.msra.mxu1 %v7072_v22  ;;  %v7103_v21 = vld [vmem:[#allocation2 + $0x790] ss:$8 sps:$4 sm:$0xff]  }
 0x90b   : > { %6826 = vmatprep.subr.bf16.mxu1 %v7817_v7  ;;  %6647 = vmatprep.subr.bf16.mxu0 %v7073_v23  ;;  %v7104_v22 = vld [vmem:[#allocation2 + $0x710] ss:$8 sps:$4 sm:$0xff]  }
 0x90c   : > { %v7105_v23 = vld [vmem:[#allocation2 + $0x810] ss:$8 sps:$4 sm:$0xff]  }
 0x90e   : > { %6648 = vmatpush3.bf16.msra.mxu0 %v7074_v24  ;;  %6827 = vmatpush3.bf16.msra.mxu1 %v7075_v26 }
 0x90f   : > { %6828 = vmatprep.subr.bf16.mxu1 %v7817_v7  ;;  %6649 = vmatprep.subr.bf16.mxu0 %v7076_v27  ;;  %v1803_v27 = vld [vmem:[#allocation5 + $0x10] ss:$0 sm:$0xff] }
 0x912   : > { %6650 = vmatpush3.bf16.msra.mxu0 %v7077_v28  ;;  %6829 = vmatpush3.bf16.msra.mxu1 %v7078_v29 }
 0x913   : > { %6830 = vmatprep.subr.bf16.mxu1 %v7817_v7  ;;  %6651 = vmatprep.subr.bf16.mxu0 %v7079_v30 }
 0x916   : > { %6652 = vmatpush3.bf16.msra.mxu0 %v7080_v31  ;;  %6831 = vmatpush3.bf16.msra.mxu1 %v7081_v32 }
 0x917   : > { %6836 = vmatprep.subr.bf16.mxu1 %v7817_v7  ;;  %6668 = vmatprep.subr.bf16.mxu0 %v7082_v33 }
 0x960   : > { %v1442_v34 = vpop.f32.mrf.mxu0 }
 0x961   : > { %v1443_v50 = vadd.f32 %v1442_v34, %v1377_v44  ;;  %v7138_v44 = vld [vmem:[#allocation2 + $0xa04] ss:$8 sps:$4 sm:$0xff]  }
 0x962   : > { %v6794_v35 = vpop.f32.mrf.mxu0 }
 0x964   : > { %v1445_v36 = vpop.f32.mrf.mxu0 }
 0x966   : > { %v6795_v38 = vpop.f32.mrf.mxu0 }
 0x9b9   : > { %v6622_v40 = vpop.f32.mrf.mxu0  ;;  %v1740_v41 = vpop.f32.mrf.mxu1 }
 0x9bb   : > { %v6623_v8 = vpop.f32.mrf.mxu0  ;;  %v6814_v43 = vpop.f32.mrf.mxu1 }
 0x9bc   : > { %v6624_v12 = vadd.f32 %v6623_v8, %v6622_v40 }
 0x9bd   : > { %v6625_v45 = vpop.f32.mrf.mxu0  ;;  %v1743_v46 = vpop.f32.mrf.mxu1 }
 0x9be   : > { %v1701_v47 = vadd.f32 %v6624_v12, %v1521_v42  ;;  %v7136_v12 = vld [vmem:[#allocation2 + $0xa00] ss:$8 sps:$4 sm:$0xff]   ;;  %v7142_v45 = vld [vmem:[#allocation2 + $0x9f0] ss:$8 sps:$4 sm:$0xff]   ;;  %v7144_v46 = vld [vmem:[#allocation2 + $0x9f4] ss:$8 sps:$4 sm:$0xff]  }
 0x9bf   : > { %v6626_v48 = vpop.f32.mrf.mxu0  ;;  %v6815_v49 = vpop.f32.mrf.mxu1 }
 0x9c0   : > { %v1741_v51 = vadd.f32 %v1740_v41, %v1701_v47  ;;  %v7148_v47 = vld [vmem:[#allocation2 + $0x9e0] ss:$8 sps:$4 sm:$0xff]   ;;  %v7150_v48 = vld [vmem:[#allocation2 + $0x9e4] ss:$8 sps:$4 sm:$0xff]   ;;  %v7156_v49 = vld [vmem:[#allocation2 + $0x9d4] ss:$8 sps:$4 sm:$0xff]  }
 0x9c2   : > { %v1746_v52 = vadd.f32 %v1741_v51, %v1443_v50  ;;  %v7162_v50 = vld [vmem:[#allocation2 + $0x9c4] ss:$8 sps:$4 sm:$0xff]   ;;  %v7166_v51 = vld [vmem:[#allocation2 + $0x9b0] ss:$8 sps:$4 sm:$0xff]  }
 0x9c4   : > { %v8208_v53 = vmax.f32 %v1746_v52, 0.0  ;;  %v7168_v52 = vld [vmem:[#allocation2 + $0x9b4] ss:$8 sps:$4 sm:$0xff]  }
 0x9c6   : > { %v1753_v54 = vpack.c.bf16 %v8208_v53, %v8208_v53  ;;  %v1748_v55 = vrot.slane %v8208_v53, 7  ;;  %v1750_v39 = vrot.slane %v8208_v53, 1 }
 0x9c8   : > { %1980 = vmatprep.mubr.bf16.mxu0 %v1753_v54  ;;  %v6082_v59 = vpack.c.bf16 %v1748_v55, %v1748_v55  ;;  %v6087_v60 = vpack.c.bf16 %v1750_v39, %v1750_v39  ;;  %v2084_v39 = vld [vmem:[#allocation5 + $0x11] ss:$0 sm:$0xff] }
 0x9ca   : > { %6083 = vmatmul.mubr.msk.bf16.vlgmr.msra.gmra.mxu0 %vm8186_vm6, %v6082_v59  ;;  %6833 = vmatmul.mubr.msk.bf16.vlgmr.msra.gmra.mxu1 %vm8190_vm7, %v6087_v60 }
 0x9cb   : > { %6669 = vmatpush3.bf16.msra.mxu0 %v7083_v56  ;;  %6837 = vmatpush3.bf16.msra.mxu1 %v7084_v57 }
 0x9cc   : > { %6670 = vmatprep.subr.bf16.mxu0 %v7085_v61  ;;  %6838 = vmatprep.subr.bf16.mxu1 %v7817_v7 }
 0x9cd   : > { %6852 = vmatprep.mubr.msk.bf16.mxu1 %vm7818_vm3, %v7817_v7 }
 0x9cf   : > { %6671 = vmatpush3.bf16.msra.mxu0 %v7086_v62  ;;  %6839 = vmatpush3.bf16.msra.mxu1 %v7087_v63 }
 0x9d0   : > { %6672 = vmatprep.subr.bf16.mxu0 %v7088_v1  ;;  %6840 = vmatprep.subr.bf16.mxu1 %v7817_v7 }
 0x9d3   : > { %6673 = vmatpush3.bf16.msra.mxu0 %v7089_v3  ;;  %6841 = vmatpush3.bf16.msra.mxu1 %v7090_v4 }
 0x9d4   : > { %6674 = vmatprep.subr.bf16.mxu0 %v7091_v5  ;;  %6842 = vmatprep.subr.bf16.mxu1 %v7817_v7 }
 0x9d7   : > { %6675 = vmatpush3.bf16.msra.mxu0 %v7092_v6  ;;  %6843 = vmatpush3.bf16.msra.mxu1 %v7093_v10 }
 0x9d8   : > { %6676 = vmatprep.subr.bf16.mxu0 %v7094_v11  ;;  %6844 = vmatprep.subr.bf16.mxu1 %v7817_v7 }
 0x9db   : > { %6677 = vmatpush3.bf16.msra.mxu0 %v7095_v13  ;;  %6845 = vmatpush3.bf16.msra.mxu1 %v7096_v14 }
 0x9dc   : > { %6846 = vmatprep.subr.bf16.mxu1 %v7817_v7  ;;  %6678 = vmatprep.subr.bf16.mxu0 %v7097_v15 }
 0x9df   : > { %6679 = vmatpush3.bf16.msra.mxu0 %v7098_v17  ;;  %6847 = vmatpush3.bf16.msra.mxu1 %v7099_v25 }
 0x9e0   : > { %6848 = vmatprep.subr.bf16.mxu1 %v7817_v7  ;;  %6680 = vmatprep.subr.bf16.mxu0 %v7100_v18  ;;  %v2311_v18 = vld [vmem:[#allocation2 + $0x16d0] sm:$0x3] }
 0x9e3   : > { %6681 = vmatpush3.bf16.msra.mxu0 %v7101_v19  ;;  %6849 = vmatpush3.bf16.msra.mxu1 %v7102_v20  ;;  %v7109_v20 = vld [vmem:[#allocation2 + $0x8f0] ss:$8 sps:$4 sm:$0xff]  }
 0x9e4   : > { %6850 = vmatprep.subr.bf16.mxu1 %v7817_v7  ;;  %6682 = vmatprep.subr.bf16.mxu0 %v7103_v21  ;;  %v7114_v21 = vld [vmem:[#allocation2 + $0x8e4] ss:$8 sps:$4 sm:$0xff]  }
 0x9e7   : > { %6683 = vmatpush3.bf16.msra.mxu0 %v7104_v22  ;;  %6851 = vmatpush3.bf16.msra.mxu1 %v7105_v23  ;;  %v7112_v22 = vld [vmem:[#allocation2 + $0x8e0] ss:$8 sps:$4 sm:$0xff]   ;;  %v7117_v23 = vld [vmem:[#allocation2 + $0x8d4] ss:$8 sps:$4 sm:$0xff]  }
 0x9e8   : > { %2758 = vmatprep.subr.bf16.mxu1 %v7138_v44  ;;  %v7159_v44 = vld [vmem:[#allocation2 + $0x934] ss:$8 sps:$4 sm:$0xff]  }
 0xa8a   : > { %v6653_v24 = vpop.f32.mrf.mxu0  ;;  %v2022_v26 = vpop.f32.mrf.mxu1 }
 0xa8c   : > { %v6654_v28 = vpop.f32.mrf.mxu0  ;;  %v6834_v29 = vpop.f32.mrf.mxu1 }
 0xa8d   : > { %v6655_v30 = vadd.f32 %v6654_v28, %v6653_v24  ;;  %v7115_v24 = vld [vmem:[#allocation2 + $0x8d0] ss:$8 sps:$4 sm:$0xff]   ;;  %v7123_v28 = vld [vmem:[#allocation2 + $0x8b4] ss:$8 sps:$4 sm:$0xff]  }
 0xa8e   : > { %v6656_v31 = vpop.f32.mrf.mxu0  ;;  %v2025_v32 = vpop.f32.mrf.mxu1  ;;  %v7121_v29 = vld [vmem:[#allocation2 + $0x8b0] ss:$8 sps:$4 sm:$0xff]  }
 0xa8f   : > { %v1983_v33 = vadd.f32 %v6655_v30, %v1803_v27  ;;  %v7118_v27 = vld [vmem:[#allocation2 + $0x8c0] ss:$8 sps:$4 sm:$0xff]   ;;  %v7126_v30 = vld [vmem:[#allocation2 + $0x8a4] ss:$8 sps:$4 sm:$0xff]   ;;  %v7129_v32 = vld [vmem:[#allocation2 + $0x894] ss:$8 sps:$4 sm:$0xff]  }
 0xa90   : > { %v6657_v34 = vpop.f32.mrf.mxu0  ;;  %v6835_v35 = vpop.f32.mrf.mxu1  ;;  %v7124_v31 = vld [vmem:[#allocation2 + $0x8a0] ss:$8 sps:$4 sm:$0xff]  }
 0xa91   : > { %v2023_v36 = vadd.f32 %v2022_v26, %v1983_v33  ;;  %v7120_v26 = vld [vmem:[#allocation2 + $0x8c4] ss:$8 sps:$4 sm:$0xff]   ;;  %v7127_v33 = vld [vmem:[#allocation2 + $0x890] ss:$8 sps:$4 sm:$0xff]   ;;  %v7130_v35 = vld [vmem:[#allocation2 + $0x980] ss:$8 sps:$4 sm:$0xff]  }
 0xa92   : > { %v7132_v34 = vld [vmem:[#allocation2 + $0x984] ss:$8 sps:$4 sm:$0xff]  }
 0xa93   : > { %v2028_v38 = vmax.f32 %v2023_v36, 0.0  ;;  %v7135_v36 = vld [vmem:[#allocation2 + $0x974] ss:$8 sps:$4 sm:$0xff]  }
 0xa95   : > { %v2029_v40 = vrot.slane %v2028_v38, 7  ;;  %v2031_v41 = vrot.slane %v2028_v38, 1  ;;  %v2034_v42 = vpack.c.bf16 %v2028_v38, %v2028_v38  ;;  %v7133_v38 = vld [vmem:[#allocation2 + $0x970] ss:$8 sps:$4 sm:$0xff]  }
 0xa97   : > { %v6116_v8 = vpack.c.bf16 %v2029_v40, %v2029_v40  ;;  %v6121_v43 = vpack.c.bf16 %v2031_v41, %v2031_v41  ;;  %2261 = vmatprep.mubr.bf16.mxu0 %v2034_v42  ;;  %v7141_v40 = vld [vmem:[#allocation2 + $0x964] ss:$8 sps:$4 sm:$0xff]   ;;  %v7139_v41 = vld [vmem:[#allocation2 + $0x960] ss:$8 sps:$4 sm:$0xff]   ;;  %v7147_v42 = vld [vmem:[#allocation2 + $0x954] ss:$8 sps:$4 sm:$0xff]  }
 0xa99   : > { %6117 = vmatmul.mubr.msk.bf16.vlgmr.msra.gmra.mxu0 %vm8186_vm6, %v6116_v8  ;;  %6853 = vmatmul.mubr.msk.bf16.vlgmr.msra.gmra.mxu1 %vm8190_vm7, %v6121_v43  ;;  %v7145_v8 = vld [vmem:[#allocation2 + $0x950] ss:$8 sps:$4 sm:$0xff]   ;;  %v7153_v43 = vld [vmem:[#allocation2 + $0x944] ss:$8 sps:$4 sm:$0xff]  }
 0xa9a   : > { %2364 = vmatprep.mubr.bf16.mxu0 %v7819_v58  ;;  %2790 = vmatprep.mubr.bf16.mxu1 %v7819_v58 }
 0xa9b   : > { %2759 = vmatpush1.bf16.msra.mxu1 %v7136_v12  ;;  %v7151_v12 = vld [vmem:[#allocation2 + $0x940] ss:$8 sps:$4 sm:$0xff]  }
 0xa9c   : > { %2760 = vmatprep.subr.bf16.mxu1 %v7144_v46  ;;  %v7165_v46 = vld [vmem:[#allocation2 + $0x924] ss:$8 sps:$4 sm:$0xff]  }
 0xa9f   : > { %2761 = vmatpush1.bf16.msra.mxu1 %v7142_v45  ;;  %v7157_v45 = vld [vmem:[#allocation2 + $0x930] ss:$8 sps:$4 sm:$0xff]  }
 0xaa0   : > { %2762 = vmatprep.subr.bf16.mxu1 %v7150_v48  ;;  %v7171_v48 = vld [vmem:[#allocation2 + $0x914] ss:$8 sps:$4 sm:$0xff]  }
 0xaa3   : > { %2763 = vmatpush1.bf16.msra.mxu1 %v7148_v47  ;;  %v7163_v47 = vld [vmem:[#allocation2 + $0x920] ss:$8 sps:$4 sm:$0xff]  }
 0xaa4   : > { %2764 = vmatprep.subr.bf16.mxu1 %v7156_v49  ;;  %v7169_v49 = vld [vmem:[#allocation2 + $0x910] ss:$8 sps:$4 sm:$0xff]  }
 0xaa7   : > { %2765 = vmatpush1.bf16.msra.mxu1 %v7154_v0  ;;  %v7174_v0 = vld [vmem:[#allocation2 + $0x9a4] ss:$8 sps:$4 sm:$0xff]  }
 0xaa8   : > { %2766 = vmatprep.subr.bf16.mxu1 %v7162_v50  ;;  %v7177_v50 = vld [vmem:[#allocation2 + $0x994] ss:$8 sps:$4 sm:$0xff]  }
 0xaab   : > { %2767 = vmatpush1.bf16.msra.mxu1 %v7160_v2  ;;  %v7172_v2 = vld [vmem:[#allocation2 + $0x9a0] ss:$8 sps:$4 sm:$0xff]  }
 0xaac   : > { %2768 = vmatprep.subr.bf16.mxu1 %v7168_v52  ;;  %v7180_v52 = vld [vmem:[#allocation2 + $0xd84] ss:$8 sps:$4 sm:$0xff]  }
 0xaaf   : > { %2769 = vmatpush1.bf16.msra.mxu1 %v7166_v51  ;;  %v7175_v51 = vld [vmem:[#allocation2 + $0x990] ss:$8 sps:$4 sm:$0xff]  }
 0xab0   : > { %2770 = vmatprep.subr.bf16.mxu1 %v7174_v0  ;;  %v7225_v0 = vld [vmem:[#allocation2 + $0xb44] ss:$8 sps:$4 sm:$0xff]  }
 0xab3   : > { %2771 = vmatpush1.bf16.msra.mxu1 %v7172_v2  ;;  %v7231_v2 = vld [vmem:[#allocation2 + $0xb34] ss:$8 sps:$4 sm:$0xff]  }
 0xab4   : > { %2772 = vmatprep.subr.bf16.mxu1 %v7177_v50  ;;  %v7229_v50 = vld [vmem:[#allocation2 + $0xb30] ss:$8 sps:$4 sm:$0xff]  }
 0xab7   : > { %2773 = vmatpush1.bf16.msra.mxu1 %v7175_v51  ;;  %v7237_v51 = vld [vmem:[#allocation2 + $0xb24] ss:$8 sps:$4 sm:$0xff]  }
 0xab8   : > { %2910 = vmatprep.subr.bf16.mxu1 %v7180_v52  ;;  %v7235_v52 = vld [vmem:[#allocation2 + $0xb20] ss:$8 sps:$4 sm:$0xff]  }
 0xb59   : > { %v6684_v54 = vpop.f32.mrf.mxu0  ;;  %v2303_v55 = vpop.f32.mrf.mxu1 }
 0xb5b   : > { %v6685_v56 = vpop.f32.mrf.mxu0  ;;  %v6854_v57 = vpop.f32.mrf.mxu1 }
 0xb5c   : > { %v6686_v59 = vadd.f32 %v6685_v56, %v6684_v54  ;;  %v7210_v54 = vld [vmem:[#allocation2 + $0xa84] ss:$8 sps:$4 sm:$0xff]   ;;  %v7208_v57 = vld [vmem:[#allocation2 + $0xa80] ss:$8 sps:$4 sm:$0xff]  }
 0xb5d   : > { %v6687_v60 = vpop.f32.mrf.mxu0  ;;  %v2306_v61 = vpop.f32.mrf.mxu1 }
 0xb5e   : > { %v2264_v62 = vadd.f32 %v6686_v59, %v2084_v39  ;;  %v7216_v61 = vld [vmem:[#allocation2 + $0xa74] ss:$8 sps:$4 sm:$0xff]  }
 0xb5f   : > { %v6688_v63 = vpop.f32.mrf.mxu0  ;;  %v6855_v1 = vpop.f32.mrf.mxu1 }
 0xb60   : > { %v2304_v3 = vadd.f32 %v2303_v55, %v2264_v62  ;;  %v7214_v63 = vld [vmem:[#allocation2 + $0xa70] ss:$8 sps:$4 sm:$0xff]  }
 0xb62   : > { %v2309_v4 = vadd.f32 %v2304_v3, %v8208_v53  ;;  %v7108_v53 = vld [vmem:[#allocation2 + $0x904] ss:$8 sps:$4 sm:$0xff]   ;;  %v7178_v3 = vld [vmem:[#allocation2 + $0xd80] ss:$8 sps:$4 sm:$0xff]  }
 0xb64   : > { %v2310_v5 = vmax.f32 %v2309_v4, 0.0 }
 0xb66   : > { %v2317_v6 = vpack.c.bf16 %v2310_v5, %v2310_v5  ;;  %v2312_v10 = vrot.slane %v2310_v5, 7  ;;  %v2314_v11 = vrot.slane %v2310_v5, 1  ;;  %v7183_v5 = vld [vmem:[#allocation2 + $0xd74] ss:$8 sps:$4 sm:$0xff]  }
 0xb68   : > { %6123 = vmatprep.subr.msk.bf16.mxu0 %vm223_vm1, %v2317_v6  ;;  %v2313_v13 = vsel %vm8174_vm0, 0.0, %v2312_v10  ;;  %v2315_v14 = vsel %vm8178_vm2, 0.0, %v2314_v11  ;;  %v7222_v6 = vld [vmem:[#allocation2 + $0xa64] ss:$8 sps:$4 sm:$0xff]   ;;  %v7220_v11 = vld [vmem:[#allocation2 + $0xa60] ss:$8 sps:$4 sm:$0xff]  }
 0xb69   : > { %v2316_v15 = vpack.c.bf16 %v2313_v13, %v2313_v13  ;;  %v2318_v25 = vpack.c.bf16 %v2315_v14, %v2315_v14  ;;  %v7181_v14 = vld [vmem:[#allocation2 + $0xd70] ss:$8 sps:$4 sm:$0xff]  }
 0xb6b   : > { %v2324_v17 = vsel %vm223_vm1, %v2316_v15, 0  ;;  %v2330_v19 = vsel %vm223_vm1, %v2318_v25, 0  ;;  %v7228_v15 = vld [vmem:[#allocation2 + $0xa54] ss:$8 sps:$4 sm:$0xff]  }
 0xb6c   : > { %2347 = vmatpush1.bf16.msra.mxu0 %v2324_v17  ;;  %v7186_v17 = vld [vmem:[#allocation2 + $0xd64] ss:$8 sps:$4 sm:$0xff]  }
 0xb6d   : > { %6856 = vmatprep.subr.bf16.mxu0 %v7817_v7 }
 0xb6f   : > { %6124 = vmatmul.mubr.msk.bf16.vlgmr.msra.gmra.mxu0 %vm2319_vm9, %v2311_v18 }
 0xb70   : > { %6857 = vmatpush3.bf16.msra.mxu0 %v2330_v19  ;;  %6858 = vmatprep.mubr.msk.bf16.mxu0 %vm7818_vm3, %v7817_v7  ;;  %v7234_v19 = vld [vmem:[#allocation2 + $0xa44] ss:$8 sps:$4 sm:$0xff]  }
 0xb71   : > { %2717 = vmatprep.subr.bf16.mxu0 %v7108_v53  ;;  %v7184_v53 = vld [vmem:[#allocation2 + $0xd60] ss:$8 sps:$4 sm:$0xff]  }
 0xb77   : > { %6859 = vmatmul.mubr.msk.bf16.vlgmr.msra.gmra.mxu0 %vm2319_vm9, %v2311_v18  ;;  %v7226_v18 = vld [vmem:[#allocation2 + $0xa50] ss:$8 sps:$4 sm:$0xff]  }
 0xb78   : > { %2718 = vmatpush1.bf16.msra.mxu0 %v7106_v37  ;;  %v7189_v37 = vld [vmem:[#allocation2 + $0xd54] ss:$8 sps:$4 sm:$0xff]  }
 0xb79   : > { %2719 = vmatprep.subr.bf16.mxu0 %v7111_v16  ;;  %v7232_v16 = vld [vmem:[#allocation2 + $0xa40] ss:$8 sps:$4 sm:$0xff]  }
 0xb7c   : > { %2720 = vmatpush1.bf16.msra.mxu0 %v7109_v20  ;;  %v7187_v20 = vld [vmem:[#allocation2 + $0xd50] ss:$8 sps:$4 sm:$0xff]  }
 0xb7d   : > { %2721 = vmatprep.subr.bf16.mxu0 %v7114_v21  ;;  %v7240_v21 = vld [vmem:[#allocation2 + $0xa34] ss:$8 sps:$4 sm:$0xff]  }
 0xb80   : > { %2722 = vmatpush1.bf16.msra.mxu0 %v7112_v22  ;;  %v7238_v22 = vld [vmem:[#allocation2 + $0xa30] ss:$8 sps:$4 sm:$0xff]  }
 0xb81   : > { %2723 = vmatprep.subr.bf16.mxu0 %v7117_v23  ;;  %v7190_v23 = vld [vmem:[#allocation2 + $0xd40] ss:$8 sps:$4 sm:$0xff]  }
 0xb84   : > { %2724 = vmatpush1.bf16.msra.mxu0 %v7115_v24  ;;  %v7246_v24 = vld [vmem:[#allocation2 + $0xa24] ss:$8 sps:$4 sm:$0xff]  }
 0xb85   : > { %2725 = vmatprep.subr.bf16.mxu0 %v7120_v26  ;;  %v7195_v26 = vld [vmem:[#allocation2 + $0xd34] ss:$8 sps:$4 sm:$0xff]  }
 0xb88   : > { %2726 = vmatpush1.bf16.msra.mxu0 %v7118_v27  ;;  %v7244_v27 = vld [vmem:[#allocation2 + $0xa20] ss:$8 sps:$4 sm:$0xff]  }
 0xb89   : > { %2727 = vmatprep.subr.bf16.mxu0 %v7123_v28  ;;  %v7193_v28 = vld [vmem:[#allocation2 + $0xd30] ss:$8 sps:$4 sm:$0xff]  }
 0xb8c   : > { %2728 = vmatpush1.bf16.msra.mxu0 %v7121_v29  ;;  %v7252_v29 = vld [vmem:[#allocation2 + $0xa14] ss:$8 sps:$4 sm:$0xff]  }
 0xb8d   : > { %2729 = vmatprep.subr.bf16.mxu0 %v7126_v30  ;;  %v7198_v30 = vld [vmem:[#allocation2 + $0xd24] ss:$8 sps:$4 sm:$0xff]  }
 0xb90   : > { %2730 = vmatpush1.bf16.msra.mxu0 %v7124_v31  ;;  %v7250_v31 = vld [vmem:[#allocation2 + $0xa10] ss:$8 sps:$4 sm:$0xff]  }
 0xb91   : > { %2731 = vmatprep.subr.bf16.mxu0 %v7129_v32  ;;  %v7196_v32 = vld [vmem:[#allocation2 + $0xd20] ss:$8 sps:$4 sm:$0xff]  }
 0xb94   : > { %2732 = vmatpush1.bf16.msra.mxu0 %v7127_v33  ;;  %v7258_v33 = vld [vmem:[#allocation2 + $0xb04] ss:$8 sps:$4 sm:$0xff]  }
 0xb95   : > { %2733 = vmatprep.subr.bf16.mxu0 %v7132_v34  ;;  %v7201_v34 = vld [vmem:[#allocation2 + $0xd14] ss:$8 sps:$4 sm:$0xff]  }
 0xb98   : > { %2734 = vmatpush2.bf16.msra.mxu0 %v7130_v35  ;;  %v7256_v35 = vld [vmem:[#allocation2 + $0xb00] ss:$8 sps:$4 sm:$0xff]  }
 0xb99   : > { %2735 = vmatprep.subr.bf16.mxu0 %v7135_v36  ;;  %v7199_v36 = vld [vmem:[#allocation2 + $0xd10] ss:$8 sps:$4 sm:$0xff]  }
 0xb9c   : > { %2736 = vmatpush2.bf16.msra.mxu0 %v7133_v38  ;;  %v7264_v38 = vld [vmem:[#allocation2 + $0xaf4] ss:$8 sps:$4 sm:$0xff]  }
 0xb9d   : > { %2737 = vmatprep.subr.bf16.mxu0 %v7141_v40  ;;  %v7204_v40 = vld [vmem:[#allocation2 + $0xb84] ss:$8 sps:$4 sm:$0xff]  }
 0xba0   : > { %2738 = vmatpush2.bf16.msra.mxu0 %v7139_v41  ;;  %v7262_v41 = vld [vmem:[#allocation2 + $0xaf0] ss:$8 sps:$4 sm:$0xff]  }
 0xba1   : > { %2739 = vmatprep.subr.bf16.mxu0 %v7147_v42  ;;  %v7202_v42 = vld [vmem:[#allocation2 + $0xb80] ss:$8 sps:$4 sm:$0xff]  }
 0xba4   : > { %2740 = vmatpush2.bf16.msra.mxu0 %v7145_v8  ;;  %v7270_v8 = vld [vmem:[#allocation2 + $0xae4] ss:$8 sps:$4 sm:$0xff]  }
 0xba5   : > { %2741 = vmatprep.subr.bf16.mxu0 %v7153_v43  ;;  %v7207_v43 = vld [vmem:[#allocation2 + $0xb74] ss:$8 sps:$4 sm:$0xff]  }
 0xba8   : > { %2742 = vmatpush2.bf16.msra.mxu0 %v7151_v12  ;;  %v7268_v12 = vld [vmem:[#allocation2 + $0xae0] ss:$8 sps:$4 sm:$0xff]  }
 0xba9   : > { %2743 = vmatprep.subr.bf16.mxu0 %v7159_v44  ;;  %v7205_v44 = vld [vmem:[#allocation2 + $0xb70] ss:$8 sps:$4 sm:$0xff]  }
 0xbac   : > { %2744 = vmatpush2.bf16.msra.mxu0 %v7157_v45  ;;  %v7213_v45 = vld [vmem:[#allocation2 + $0xb64] ss:$8 sps:$4 sm:$0xff]  }
 0xbad   : > { %2745 = vmatprep.subr.bf16.mxu0 %v7165_v46  ;;  %v7211_v46 = vld [vmem:[#allocation2 + $0xb60] ss:$8 sps:$4 sm:$0xff]  }
 0xbb0   : > { %2746 = vmatpush2.bf16.msra.mxu0 %v7163_v47  ;;  %v7219_v47 = vld [vmem:[#allocation2 + $0xb54] ss:$8 sps:$4 sm:$0xff]  }
 0xbb1   : > { %2747 = vmatprep.subr.bf16.mxu0 %v7171_v48  ;;  %v7217_v48 = vld [vmem:[#allocation2 + $0xb50] ss:$8 sps:$4 sm:$0xff]  }
 0xbb4   : > { %2748 = vmatpush2.bf16.msra.mxu0 %v7169_v49  ;;  %v7223_v49 = vld [vmem:[#allocation2 + $0xb40] ss:$8 sps:$4 sm:$0xff]  }
 0xbb5   : > { %3587 = vmatprep.subr.bf16.mxu0 %v7210_v54  ;;  %v7243_v54 = vld [vmem:[#allocation2 + $0xb14] ss:$8 sps:$4 sm:$0xff]  }
 0xc2f   : > { %v2366_v55 = vpop.f32.mrf.mxu0 }
 0xc30   : > { %v2413_v59 = vpack.c.bf16 %v2366_v55, %v2366_v55  ;;  %v7241_v55 = vld [vmem:[#allocation2 + $0xb10] ss:$8 sps:$4 sm:$0xff]  }
 0xc31   : > { %v2368_v39 = vpop.f32.mrf.mxu0 }
 0xc32   : > { %v8244_v56 = vpack.c.bf16 %v2368_v39, %v2368_v39  ;;  %v7249_v39 = vld [vmem:[#allocation2 + $0xc04] ss:$8 sps:$4 sm:$0xff]  }
 0xc33   : > { %v2370_v60 = vpop.f32.mrf.mxu0 }
 0xc34   : > { %2749 = vmatprep.mubr.bf16.mxu0 %v8244_v56  ;;  %v7255_v60 = vld [vmem:[#allocation2 + $0xbf4] ss:$8 sps:$4 sm:$0xff]  }
 0xc35   : > { %v2371_v62 = vpop.f32.mrf.mxu0  ;;  %2750 = vmatmul.mubr.bf16.vlgmr.msra.gmra.mxu0 %v2413_v59  ;;  %v7274_v59 = vld [vmem:[#allocation2 + $0xad0] ss:$8 sps:$4 sm:$0xff]  }
 0xc36   : > { %3588 = vmatpush1.bf16.msra.mxu0 %v7208_v57  ;;  %v7247_v57 = vld [vmem:[#allocation2 + $0xc00] ss:$8 sps:$4 sm:$0xff]   ;;  %v7253_v62 = vld [vmem:[#allocation2 + $0xbf0] ss:$8 sps:$4 sm:$0xff]  }
 0xc37   : > { %v2407_v1 = vpop.f32.mrf.mxu0  ;;  %3589 = vmatprep.subr.bf16.mxu0 %v7216_v61  ;;  %v7282_v61 = vld [vmem:[#allocation2 + $0xac4] ss:$8 sps:$4 sm:$0xff]  }
 0xc38   : > { %v2415_v4 = vpack.c.bf16 %v2407_v1, %v2407_v1  ;;  %v7261_v1 = vld [vmem:[#allocation2 + $0xbe4] ss:$8 sps:$4 sm:$0xff]  }
 0xc39   : > { %v6860_v10 = vpop.f32.mrf.mxu0 }
 0xc3a   : > { %2791 = vmatmul.mubr.bf16.vlgmr.msra.gmra.mxu1 %v2415_v4  ;;  %3590 = vmatpush1.bf16.msra.mxu0 %v7214_v63  ;;  %v7280_v63 = vld [vmem:[#allocation2 + $0xac0] ss:$8 sps:$4 sm:$0xff]   ;;  %v7294_v10 = vld [vmem:[#allocation2 + $0xaa4] ss:$8 sps:$4 sm:$0xff]  }
 0xc3b   : > { %2911 = vmatpush1.bf16.msra.mxu1 %v7178_v3  ;;  %v2410_v13 = vpop.f32.mrf.mxu0  ;;  %2942 = vmatprep.mubr.bf16.mxu1 %v7819_v58  ;;  %v7192_v58 = vld [vmem:[#allocation2 + $0xd44] ss:$8 sps:$4 sm:$0xff]   ;;  %v7288_v3 = vld [vmem:[#allocation2 + $0xab4] ss:$8 sps:$4 sm:$0xff]   ;;  %v7259_v4 = vld [vmem:[#allocation2 + $0xbe0] ss:$8 sps:$4 sm:$0xff]  }
 0xc3c   : > { %2912 = vmatprep.subr.bf16.mxu1 %v7183_v5  ;;  %3591 = vmatprep.subr.bf16.mxu0 %v7222_v6  ;;  %v7286_v5 = vld [vmem:[#allocation2 + $0xab0] ss:$8 sps:$4 sm:$0xff]   ;;  %v7267_v6 = vld [vmem:[#allocation2 + $0xbd4] ss:$8 sps:$4 sm:$0xff]   ;;  %v7292_v13 = vld [vmem:[#allocation2 + $0xaa0] ss:$8 sps:$4 sm:$0xff]  }
 0xc3d   : > { %v6861_v25 = vpop.f32.mrf.mxu0 }
 0xc3e   : > { %3592 = vmatpush1.bf16.msra.mxu0 %v7220_v11  ;;  %v7265_v11 = vld [vmem:[#allocation2 + $0xbd0] ss:$8 sps:$4 sm:$0xff]  }
 0xc3f   : > { %2913 = vmatpush1.bf16.msra.mxu1 %v7181_v14  ;;  %3593 = vmatprep.subr.bf16.mxu0 %v7228_v15  ;;  %v7273_v14 = vld [vmem:[#allocation2 + $0xbc4] ss:$8 sps:$4 sm:$0xff]   ;;  %v7297_v15 = vld [vmem:[#allocation2 + $0xa94] ss:$8 sps:$4 sm:$0xff]   ;;  %v7295_v25 = vld [vmem:[#allocation2 + $0xa90] ss:$8 sps:$4 sm:$0xff]  }
 0xc40   : > { %2914 = vmatprep.subr.bf16.mxu1 %v7186_v17  ;;  %v7271_v17 = vld [vmem:[#allocation2 + $0xbc0] ss:$8 sps:$4 sm:$0xff]  }
 0xc42   : > { %3594 = vmatpush1.bf16.msra.mxu0 %v7226_v18  ;;  %v7279_v18 = vld [vmem:[#allocation2 + $0xbb4] ss:$8 sps:$4 sm:$0xff]  }
 0xc43   : > { %2915 = vmatpush1.bf16.msra.mxu1 %v7184_v53  ;;  %3595 = vmatprep.subr.bf16.mxu0 %v7234_v19  ;;  %v7300_v53 = vld [vmem:[#allocation2 + $0xc84] ss:$8 sps:$4 sm:$0xff]   ;;  %v7277_v19 = vld [vmem:[#allocation2 + $0xbb0] ss:$8 sps:$4 sm:$0xff]  }
 0xc44   : > { %2916 = vmatprep.subr.bf16.mxu1 %v7189_v37  ;;  %v7285_v37 = vld [vmem:[#allocation2 + $0xba4] ss:$8 sps:$4 sm:$0xff]  }
 0xc46   : > { %3596 = vmatpush1.bf16.msra.mxu0 %v7232_v16  ;;  %v7283_v16 = vld [vmem:[#allocation2 + $0xba0] ss:$8 sps:$4 sm:$0xff]  }
 0xc47   : > { %2917 = vmatpush1.bf16.msra.mxu1 %v7187_v20  ;;  %3597 = vmatprep.subr.bf16.mxu0 %v7240_v21  ;;  %v7291_v20 = vld [vmem:[#allocation2 + $0xb94] ss:$8 sps:$4 sm:$0xff]   ;;  %v7289_v21 = vld [vmem:[#allocation2 + $0xb90] ss:$8 sps:$4 sm:$0xff]  }
 0xc48   : > { %2918 = vmatprep.subr.bf16.mxu1 %v7192_v58  ;;  %v8250_v58 = vsub.s32 0, %v7941_v9 }
 0xc4a   : > { %3598 = vmatpush1.bf16.msra.mxu0 %v7238_v22  ;;  %v2465_v22 = vld [vmem:[#allocation5 + $0x12] ss:$8 sm:$0x3] }
 0xc4b   : > { %2919 = vmatpush1.bf16.msra.mxu1 %v7190_v23  ;;  %3599 = vmatprep.subr.bf16.mxu0 %v7246_v24  ;;  %v8253_v23 = vsub.s32 1, %v7941_v9  ;;  %v2470_v24 = vrot.slane %v2465_v22, %v8250_v58 }
 0xc4c   : > { %2920 = vmatprep.subr.bf16.mxu1 %v7195_v26 }
 0xc4e   : > { %3600 = vmatpush1.bf16.msra.mxu0 %v7244_v27  ;;  %v2474_v27 = vrot.slane %v2465_v22, %v8253_v23  ;;  %v7333_v22 = vld [vmem:[#allocation2 + $0xcd4] ss:$8 sps:$4 sm:$0xff]  }
 0xc4f   : > { %2921 = vmatpush1.bf16.msra.mxu1 %v7193_v28  ;;  %3601 = vmatprep.subr.bf16.mxu0 %v7252_v29 }
 0xc50   : > { %2922 = vmatprep.subr.bf16.mxu1 %v7198_v30 }
 0xc52   : > { %3602 = vmatpush1.bf16.msra.mxu0 %v7250_v31 }
 0xc53   : > { %2923 = vmatpush1.bf16.msra.mxu1 %v7196_v32  ;;  %3603 = vmatprep.subr.bf16.mxu0 %v7258_v33 }
 0xc54   : > { %2924 = vmatprep.subr.bf16.mxu1 %v7201_v34 }
 0xc56   : > { %3604 = vmatpush2.bf16.msra.mxu0 %v7256_v35 }
 0xc57   : > { %2925 = vmatpush1.bf16.msra.mxu1 %v7199_v36  ;;  %3605 = vmatprep.subr.bf16.mxu0 %v7264_v38 }
 0xc58   : > { %3628 = vmatprep.subr.bf16.mxu1 %v7204_v40 }
 0xc5a   : > { %2943 = vmatmul.mubr.bf16.vlgmr.msra.gmra.mxu1 %v8244_v56  ;;  %3606 = vmatpush2.bf16.msra.mxu0 %v7262_v41  ;;  %v7276_v56 = vld [vmem:[#allocation2 + $0xad4] ss:$8 sps:$4 sm:$0xff]  }
 0xc5b   : > { %3629 = vmatpush1.bf16.msra.mxu1 %v7202_v42  ;;  %3607 = vmatprep.subr.bf16.mxu0 %v7270_v8 }
 0xc5c   : > { %3630 = vmatprep.subr.bf16.mxu1 %v7207_v43 }
 0xc5e   : > { %3608 = vmatpush2.bf16.msra.mxu0 %v7268_v12 }
 0xc5f   : > { %3631 = vmatpush1.bf16.msra.mxu1 %v7205_v44  ;;  %3609 = vmatprep.subr.bf16.mxu0 %v7276_v56  ;;  %v7641_v56 = vld [vmem:[#allocation2 + $0x13d0] ss:$8 sps:$4 sm:$0xff]  }
 0xc60   : > { %3632 = vmatprep.subr.bf16.mxu1 %v7213_v45  ;;  %v2955_v45 = vand.u32 3, %v7941_v9  ;;  %v7603_v9 = vld [vmem:[#allocation2 + $0x12b4] ss:$8 sps:$4 sm:$0xff]  }
 0xc62   : > { %3610 = vmatpush2.bf16.msra.mxu0 %v7274_v59  ;;  %vm6593_vm11 = vcmp.ne.s32.totalorder %v2955_v45, 0  ;;  %vm6594_vm12 = vcmp.ne.s32.totalorder %v2955_v45, 3  ;;  %v7366_v45 = vld [vmem:[#allocation2 + $0xde4] ss:$8 sps:$4 sm:$0xff]  }
 0xc63   : > { %3633 = vmatpush1.bf16.msra.mxu1 %v7211_v46  ;;  %3611 = vmatprep.subr.bf16.mxu0 %v7282_v61  ;;  %vm8265_vm13 = vmpackc.low %vm6593_vm11, %vm6593_vm11  ;;  %v7306_v61 = vld [vmem:[#allocation2 + $0xc64] ss:$8 sps:$4 sm:$0xff]  }
 0xc64   : > { %3634 = vmatprep.subr.bf16.mxu1 %v7219_v47  ;;  %vm8269_vm14 = vmpackc.low %vm6594_vm12, %vm6594_vm12 }
 0xc66   : > { %3612 = vmatpush2.bf16.msra.mxu0 %v7280_v63  ;;  %v7309_v63 = vld [vmem:[#allocation2 + $0xc54] ss:$8 sps:$4 sm:$0xff]  }
 0xc67   : > { %3635 = vmatpush1.bf16.msra.mxu1 %v7217_v48  ;;  %3613 = vmatprep.subr.bf16.mxu0 %v7288_v3  ;;  %v7312_v3 = vld [vmem:[#allocation2 + $0xc44] ss:$8 sps:$4 sm:$0xff]  }
 0xc68   : > { %3636 = vmatprep.subr.bf16.mxu1 %v7225_v0 }
 0xc6a   : > { %3614 = vmatpush2.bf16.msra.mxu0 %v7286_v5 }
 0xc6b   : > { %3637 = vmatpush1.bf16.msra.mxu1 %v7223_v49  ;;  %3615 = vmatprep.subr.bf16.mxu0 %v7294_v10 }
 0xc6c   : > { %3638 = vmatprep.subr.bf16.mxu1 %v7231_v2 }
 0xc6e   : > { %3616 = vmatpush2.bf16.msra.mxu0 %v7292_v13 }
 0xc6f   : > { %3639 = vmatpush1.bf16.msra.mxu1 %v7229_v50  ;;  %3617 = vmatprep.subr.bf16.mxu0 %v7297_v15 }
 0xc70   : > { %3640 = vmatprep.subr.bf16.mxu1 %v7237_v51 }
 0xc72   : > { %3618 = vmatpush2.bf16.msra.mxu0 %v7295_v25  ;;  %v7321_v25 = vld [vmem:[#allocation2 + $0xc14] ss:$8 sps:$4 sm:$0xff]  }
 0xc73   : > { %3641 = vmatpush1.bf16.msra.mxu1 %v7235_v52  ;;  %3669 = vmatprep.subr.bf16.mxu0 %v7300_v53  ;;  %v7324_v53 = vld [vmem:[#allocation2 + $0xd04] ss:$8 sps:$4 sm:$0xff]  }
 0xc74   : > { %3642 = vmatprep.subr.bf16.mxu1 %v7243_v54 }
 0xc77   : > { %3643 = vmatpush1.bf16.msra.mxu1 %v7241_v55  ;;  %v7298_v55 = vld [vmem:[#allocation2 + $0xc80] ss:$8 sps:$4 sm:$0xff]  }
 0xc78   : > { %3644 = vmatprep.subr.bf16.mxu1 %v7249_v39 }
 0xc7b   : > { %3645 = vmatpush2.bf16.msra.mxu1 %v7247_v57  ;;  %v7303_v57 = vld [vmem:[#allocation2 + $0xc74] ss:$8 sps:$4 sm:$0xff]  }
 0xc7c   : > { %3646 = vmatprep.subr.bf16.mxu1 %v7255_v60  ;;  %v7301_v60 = vld [vmem:[#allocation2 + $0xc70] ss:$8 sps:$4 sm:$0xff]  }
 0xc7f   : > { %3647 = vmatpush2.bf16.msra.mxu1 %v7253_v62  ;;  %v7304_v62 = vld [vmem:[#allocation2 + $0xc60] ss:$8 sps:$4 sm:$0xff]  }
 0xc80   : > { %3648 = vmatprep.subr.bf16.mxu1 %v7261_v1  ;;  %v7307_v1 = vld [vmem:[#allocation2 + $0xc50] ss:$8 sps:$4 sm:$0xff]  }
 0xc83   : > { %3649 = vmatpush2.bf16.msra.mxu1 %v7259_v4  ;;  %v7310_v4 = vld [vmem:[#allocation2 + $0xc40] ss:$8 sps:$4 sm:$0xff]  }
 0xc84   : > { %3650 = vmatprep.subr.bf16.mxu1 %v7267_v6  ;;  %v7315_v6 = vld [vmem:[#allocation2 + $0xc34] ss:$8 sps:$4 sm:$0xff]  }
 0xc87   : > { %3651 = vmatpush2.bf16.msra.mxu1 %v7265_v11  ;;  %v7313_v11 = vld [vmem:[#allocation2 + $0xc30] ss:$8 sps:$4 sm:$0xff]  }
 0xc88   : > { %3652 = vmatprep.subr.bf16.mxu1 %v7273_v14  ;;  %v7318_v14 = vld [vmem:[#allocation2 + $0xc24] ss:$8 sps:$4 sm:$0xff]  }
 0xc8b   : > { %3653 = vmatpush2.bf16.msra.mxu1 %v7271_v17  ;;  %v7316_v17 = vld [vmem:[#allocation2 + $0xc20] ss:$8 sps:$4 sm:$0xff]  }
 0xc8c   : > { %3654 = vmatprep.subr.bf16.mxu1 %v7279_v18  ;;  %v7319_v18 = vld [vmem:[#allocation2 + $0xc10] ss:$8 sps:$4 sm:$0xff]  }
 0xc8f   : > { %3655 = vmatpush2.bf16.msra.mxu1 %v7277_v19  ;;  %v7322_v19 = vld [vmem:[#allocation2 + $0xd00] ss:$8 sps:$4 sm:$0xff]  }
 0xc90   : > { %3656 = vmatprep.subr.bf16.mxu1 %v7285_v37  ;;  %v7327_v37 = vld [vmem:[#allocation2 + $0xcf4] ss:$8 sps:$4 sm:$0xff]  }
 0xc93   : > { %3657 = vmatpush2.bf16.msra.mxu1 %v7283_v16  ;;  %v7325_v16 = vld [vmem:[#allocation2 + $0xcf0] ss:$8 sps:$4 sm:$0xff]  }
 0xc94   : > { %3658 = vmatprep.subr.bf16.mxu1 %v7291_v20  ;;  %v7330_v20 = vld [vmem:[#allocation2 + $0xce4] ss:$8 sps:$4 sm:$0xff]  }
 0xc97   : > { %3659 = vmatpush2.bf16.msra.mxu1 %v7289_v21  ;;  %v7328_v21 = vld [vmem:[#allocation2 + $0xce0] ss:$8 sps:$4 sm:$0xff]  }
 0xcf5   : > { %v2751_v26 = vpop.f32.mrf.mxu0 }
 0xcf6   : > { %v2752_v29 = vadd.f32 %v2751_v26, %v2470_v24  ;;  %v7331_v24 = vld [vmem:[#allocation2 + $0xcd0] ss:$8 sps:$4 sm:$0xff]   ;;  %v7336_v26 = vld [vmem:[#allocation2 + $0xcc4] ss:$8 sps:$4 sm:$0xff]  }
 0xcf7   : > { %v2753_v28 = vpop.f32.mrf.mxu0 }
 0xcf8   : > { %v2754_v32 = vadd.f32 %v2753_v28, %v2474_v27  ;;  %v7334_v27 = vld [vmem:[#allocation2 + $0xcc0] ss:$8 sps:$4 sm:$0xff]   ;;  %v7339_v28 = vld [vmem:[#allocation2 + $0xcb4] ss:$8 sps:$4 sm:$0xff]  }
 0xcf9   : > { %v2755_v30 = vpop.f32.mrf.mxu0 }
 0xcfa   : > { %v2792_v31 = vpop.f32.mrf.mxu1  ;;  %v7342_v30 = vld [vmem:[#allocation2 + $0xca4] ss:$8 sps:$4 sm:$0xff]  }
 0xcfb   : > { %v2793_v33 = vadd.f32 %v2792_v31, %v2752_v29  ;;  %v2756_v34 = vpop.f32.mrf.mxu0  ;;  %v7337_v29 = vld [vmem:[#allocation2 + $0xcb0] ss:$8 sps:$4 sm:$0xff]   ;;  %v7340_v31 = vld [vmem:[#allocation2 + $0xca0] ss:$8 sps:$4 sm:$0xff]  }
 0xcfc   : > { %v2794_v35 = vpop.f32.mrf.mxu1 }
 0xcfd   : > { %v2799_v36 = vmax.f32 %v2793_v33, 0.0  ;;  %v2795_v38 = vadd.f32 %v2794_v35, %v2754_v32  ;;  %v7345_v32 = vld [vmem:[#allocation2 + $0xc94] ss:$8 sps:$4 sm:$0xff]   ;;  %v7343_v33 = vld [vmem:[#allocation2 + $0xc90] ss:$8 sps:$4 sm:$0xff]  }
 0xcfe   : > { %v2796_v40 = vpop.f32.mrf.mxu1 }
 0xcff   : > { %v2965_v41 = vrot.slane %v2799_v36, 4  ;;  %v2800_v42 = vmax.f32 %v2795_v38, 0.0  ;;  %v2994_v47 = vpack.c.bf16 %v2799_v36, %v2799_v36  ;;  %v7348_v38 = vld [vmem:[#allocation2 + $0xf04] ss:$8 sps:$4 sm:$0xff]   ;;  %v7351_v40 = vld [vmem:[#allocation2 + $0xef4] ss:$8 sps:$4 sm:$0xff]  }
 0xd00   : > { %v2797_v8 = vpop.f32.mrf.mxu1 }
 0xd01   : > { %v2966_v43 = vsel %vm2964_vm10, %v2965_v41, %v2799_v36  ;;  %v2967_v12 = vrot.slane %v2800_v42, 4  ;;  %v2995_v44 = vpack.c.bf16 %v2800_v42, %v2800_v42  ;;  %v7352_v41 = vld [vmem:[#allocation2 + $0xe00] ss:$8 sps:$4 sm:$0xff]   ;;  %v7349_v8 = vld [vmem:[#allocation2 + $0xef0] ss:$8 sps:$4 sm:$0xff]  }
 0xd02   : > { %v2969_v46 = vrot.slane %v2966_v43, 4  ;;  %v7360_v43 = vld [vmem:[#allocation2 + $0xdf4] ss:$8 sps:$4 sm:$0xff]  }
 0xd03   : > { %v2968_v48 = vsel %vm2964_vm10, %v2967_v12, %v2800_v42  ;;  %3660 = vmatprep.mubr.bf16.mxu1 %v2995_v44  ;;  %v7357_v12 = vld [vmem:[#allocation2 + $0xee4] ss:$8 sps:$4 sm:$0xff]   ;;  %v7358_v44 = vld [vmem:[#allocation2 + $0xdf0] ss:$8 sps:$4 sm:$0xff]  }
 0xd04   : > { %v8261_v0 = vsel %vm2964_vm10, %v2969_v46, %v2799_v36  ;;  %v2970_v49 = vrot.slane %v2968_v48, 4  ;;  %3661 = vmatmul.mubr.bf16.vlgmr.msra.gmra.mxu1 %v2994_v47  ;;  %v7346_v36 = vld [vmem:[#allocation2 + $0xf00] ss:$8 sps:$4 sm:$0xff]   ;;  %v7363_v47 = vld [vmem:[#allocation2 + $0xed4] ss:$8 sps:$4 sm:$0xff]  }
 0xd05   : > { %v2977_v2 = vrot.slane %v8261_v0, 3  ;;  %v2986_v34 = vrot.slane %v8261_v0, 1  ;;  %v7355_v46 = vld [vmem:[#allocation2 + $0xee0] ss:$8 sps:$4 sm:$0xff]   ;;  %v7372_v0 = vld [vmem:[#allocation2 + $0xdd4] ss:$8 sps:$4 sm:$0xff]  }
 0xd06   : > { %v2972_v50 = vsel %vm2964_vm10, %v2970_v49, %v2800_v42  ;;  %v7354_v42 = vld [vmem:[#allocation2 + $0xe04] ss:$8 sps:$4 sm:$0xff]   ;;  %v7364_v48 = vld [vmem:[#allocation2 + $0xde0] ss:$8 sps:$4 sm:$0xff]   ;;  %v7361_v49 = vld [vmem:[#allocation2 + $0xed0] ss:$8 sps:$4 sm:$0xff]  }
 0xd07   : > { %v2978_v51 = vrot.slane %v2972_v50, 3  ;;  %v2987_v52 = vrot.slane %v2972_v50, 1  ;;  %v6294_v39 = vpack.c.bf16 %v2977_v2, %v2977_v2  ;;  %v6304_v35 = vpack.c.bf16 %v2986_v34, %v2986_v34  ;;  %4331 = vmatprep.subr.bf16.mxu1 %v7354_v42  ;;  %v7369_v2 = vld [vmem:[#allocation2 + $0xec4] ss:$8 sps:$4 sm:$0xff]   ;;  %v7370_v50 = vld [vmem:[#allocation2 + $0xdd0] ss:$8 sps:$4 sm:$0xff]  }
 0xd08   : > { %4332 = vmatpush1.bf16.msra.mxu1 %v7352_v41  ;;  %v7427_v34 = vld [vmem:[#allocation2 + $0xf20] ss:$8 sps:$4 sm:$0xff]   ;;  %v7438_v41 = vld [vmem:[#allocation2 + $0xe24] ss:$8 sps:$4 sm:$0xff]  }
 0xd09   : > { %v6289_v54 = vpack.c.bf16 %v2978_v51, %v2978_v51  ;;  %v6299_v59 = vpack.c.bf16 %v2987_v52, %v2987_v52  ;;  %4333 = vmatprep.subr.bf16.mxu1 %v7360_v43  ;;  %v7378_v51 = vld [vmem:[#allocation2 + $0xdc4] ss:$8 sps:$4 sm:$0xff]   ;;  %v7367_v52 = vld [vmem:[#allocation2 + $0xec0] ss:$8 sps:$4 sm:$0xff]   ;;  %v7441_v43 = vld [vmem:[#allocation2 + $0xe14] ss:$8 sps:$4 sm:$0xff]  }
 0xd0a   : > { %v7436_v42 = vld [vmem:[#allocation2 + $0xe20] ss:$8 sps:$4 sm:$0xff]  }
 0xd0b   : > { %6290 = vmatprep.mubr.msk.bf16.mxu0 %vm8265_vm13, %v6289_v54  ;;  %v7375_v54 = vld [vmem:[#allocation2 + $0xeb4] ss:$8 sps:$4 sm:$0xff]  }
 0xd0c   : > { %6295 = vmatmul.mubr.msk.bf16.vlgmr.msra.gmra.mxu0 %vm8265_vm13, %v6294_v39  ;;  %4334 = vmatpush1.bf16.msra.mxu1 %v7358_v44  ;;  %v7384_v39 = vld [vmem:[#allocation2 + $0xdb4] ss:$8 sps:$4 sm:$0xff]  }
 0xd0d   : > { %3670 = vmatpush1.bf16.msra.mxu0 %v7298_v55  ;;  %6300 = vmatprep.mubr.msk.bf16.mxu0 %vm8269_vm14, %v6299_v59  ;;  %v7376_v55 = vld [vmem:[#allocation2 + $0xdc0] ss:$8 sps:$4 sm:$0xff]   ;;  %v7381_v59 = vld [vmem:[#allocation2 + $0xea4] ss:$8 sps:$4 sm:$0xff]  }
 0xd0e   : > { %3671 = vmatprep.subr.bf16.mxu0 %v7303_v57  ;;  %4335 = vmatprep.subr.bf16.mxu1 %v7366_v45  ;;  %v7373_v57 = vld [vmem:[#allocation2 + $0xeb0] ss:$8 sps:$4 sm:$0xff]  }
 0xd10   : > { %4336 = vmatpush1.bf16.msra.mxu1 %v7364_v48 }
 0xd11   : > { %3672 = vmatpush1.bf16.msra.mxu0 %v7301_v60  ;;  %4337 = vmatprep.subr.bf16.mxu1 %v7372_v0  ;;  %v7382_v60 = vld [vmem:[#allocation2 + $0xdb0] ss:$8 sps:$4 sm:$0xff]  }
 0xd12   : > { %3673 = vmatprep.subr.bf16.mxu0 %v7306_v61  ;;  %v7390_v61 = vld [vmem:[#allocation2 + $0xda4] ss:$8 sps:$4 sm:$0xff]  }
 0xd14   : > { %4338 = vmatpush1.bf16.msra.mxu1 %v7370_v50  ;;  %v3095_v50 = vld [vmem:[#allocation5 + $0x13] ss:$8 sm:$0x3] }
 0xd15   : > { %3674 = vmatpush1.bf16.msra.mxu0 %v7304_v62  ;;  %4339 = vmatprep.subr.bf16.mxu1 %v7378_v51  ;;  %v7379_v62 = vld [vmem:[#allocation2 + $0xea0] ss:$8 sps:$4 sm:$0xff]   ;;  %v3100_v51 = vrot.slane %v3095_v50, %v8250_v58 }
 0xd16   : > { %3675 = vmatprep.subr.bf16.mxu0 %v7309_v63  ;;  %v7387_v63 = vld [vmem:[#allocation2 + $0xe94] ss:$8 sps:$4 sm:$0xff]  }
 0xd18   : > { %4340 = vmatpush1.bf16.msra.mxu1 %v7376_v55 }
 0xd19   : > { %3676 = vmatpush1.bf16.msra.mxu0 %v7307_v1  ;;  %4341 = vmatprep.subr.bf16.mxu1 %v7384_v39  ;;  %v7388_v1 = vld [vmem:[#allocation2 + $0xda0] ss:$8 sps:$4 sm:$0xff]  }
 0xd1a   : > { %v8279_v5 = vpop.f32.mrf.mxu1  ;;  %3677 = vmatprep.subr.bf16.mxu0 %v7312_v3  ;;  %v7396_v3 = vld [vmem:[#allocation2 + $0xd94] ss:$8 sps:$4 sm:$0xff]  }
 0xd1c   : > { %v8281_v10 = vpop.f32.mrf.mxu1  ;;  %4342 = vmatpush1.bf16.msra.mxu1 %v7382_v60 }
 0xd1d   : > { %3678 = vmatpush1.bf16.msra.mxu0 %v7310_v4  ;;  %4343 = vmatprep.subr.bf16.mxu1 %v7390_v61  ;;  %v7385_v4 = vld [vmem:[#allocation2 + $0xe90] ss:$8 sps:$4 sm:$0xff]  }
 0xd1e   : > { %v2948_v13 = vpop.f32.mrf.mxu1  ;;  %3679 = vmatprep.subr.bf16.mxu0 %v7315_v6  ;;  %v7393_v6 = vld [vmem:[#allocation2 + $0xf84] ss:$8 sps:$4 sm:$0xff]  }
 0xd1f   : > { %v7402_v13 = vld [vmem:[#allocation2 + $0xe84] ss:$8 sps:$4 sm:$0xff]  }
 0xd20   : > { %v2949_v15 = vpop.f32.mrf.mxu1  ;;  %4344 = vmatpush1.bf16.msra.mxu1 %v7388_v1 }
 0xd21   : > { %3680 = vmatpush1.bf16.msra.mxu0 %v7313_v11  ;;  %v7394_v11 = vld [vmem:[#allocation2 + $0xd90] ss:$8 sps:$4 sm:$0xff]   ;;  %4345 = vmatprep.subr.bf16.mxu1 %v7396_v3  ;;  %v7399_v15 = vld [vmem:[#allocation2 + $0xf74] ss:$8 sps:$4 sm:$0xff]  }
 0xd22   : > { %3681 = vmatprep.subr.bf16.mxu0 %v7318_v14  ;;  %v7391_v14 = vld [vmem:[#allocation2 + $0xf80] ss:$8 sps:$4 sm:$0xff]  }
 0xd24   : > { %4346 = vmatpush1.bf16.msra.mxu1 %v7394_v11 }
 0xd25   : > { %3682 = vmatpush1.bf16.msra.mxu0 %v7316_v17  ;;  %v7400_v17 = vld [vmem:[#allocation2 + $0xe80] ss:$8 sps:$4 sm:$0xff]   ;;  %4347 = vmatprep.subr.bf16.mxu1 %v7402_v13 }
 0xd26   : > { %3683 = vmatprep.subr.bf16.mxu0 %v7321_v25  ;;  %v7408_v25 = vld [vmem:[#allocation2 + $0xe74] ss:$8 sps:$4 sm:$0xff]  }
 0xd28   : > { %4348 = vmatpush2.bf16.msra.mxu1 %v7400_v17 }
 0xd29   : > { %3684 = vmatpush1.bf16.msra.mxu0 %v7319_v18  ;;  %v7397_v18 = vld [vmem:[#allocation2 + $0xf70] ss:$8 sps:$4 sm:$0xff]   ;;  %4349 = vmatprep.subr.bf16.mxu1 %v7408_v25 }
 0xd2a   : > { %3685 = vmatprep.subr.bf16.mxu0 %v7324_v53  ;;  %v7405_v53 = vld [vmem:[#allocation2 + $0xf64] ss:$8 sps:$4 sm:$0xff]  }
 0xd2d   : > { %3686 = vmatpush2.bf16.msra.mxu0 %v7322_v19  ;;  %v7406_v19 = vld [vmem:[#allocation2 + $0xe70] ss:$8 sps:$4 sm:$0xff]  }
 0xd2e   : > { %3687 = vmatprep.subr.bf16.mxu0 %v7327_v37  ;;  %v7414_v37 = vld [vmem:[#allocation2 + $0xe64] ss:$8 sps:$4 sm:$0xff]   ;;  %4350 = vmatpush2.bf16.msra.mxu1 %v7406_v19 }
 0xd2f   : > { %4351 = vmatprep.subr.bf16.mxu1 %v7414_v37 }
 0xd31   : > { %3688 = vmatpush2.bf16.msra.mxu0 %v7325_v16  ;;  %v7403_v16 = vld [vmem:[#allocation2 + $0xf60] ss:$8 sps:$4 sm:$0xff]  }
 0xd32   : > { %3689 = vmatprep.subr.bf16.mxu0 %v7330_v20  ;;  %v7411_v20 = vld [vmem:[#allocation2 + $0xf54] ss:$8 sps:$4 sm:$0xff]  }
 0xd35   : > { %3690 = vmatpush2.bf16.msra.mxu0 %v7328_v21  ;;  %v7412_v21 = vld [vmem:[#allocation2 + $0xe60] ss:$8 sps:$4 sm:$0xff]  }
 0xd36   : > { %3691 = vmatprep.subr.bf16.mxu0 %v7333_v22  ;;  %v7420_v22 = vld [vmem:[#allocation2 + $0xe54] ss:$8 sps:$4 sm:$0xff]   ;;  %4352 = vmatpush2.bf16.msra.mxu1 %v7412_v21 }
 0xd37   : > { %4353 = vmatprep.subr.bf16.mxu1 %v7420_v22 }
 0xd39   : > { %3692 = vmatpush2.bf16.msra.mxu0 %v7331_v24  ;;  %v7409_v24 = vld [vmem:[#allocation2 + $0xf50] ss:$8 sps:$4 sm:$0xff]  }
 0xd3a   : > { %3693 = vmatprep.subr.bf16.mxu0 %v7336_v26  ;;  %v7417_v26 = vld [vmem:[#allocation2 + $0xf44] ss:$8 sps:$4 sm:$0xff]  }
 0xd3d   : > { %3694 = vmatpush2.bf16.msra.mxu0 %v7334_v27  ;;  %v7418_v27 = vld [vmem:[#allocation2 + $0xe50] ss:$8 sps:$4 sm:$0xff]  }
 0xd3e   : > { %3695 = vmatprep.subr.bf16.mxu0 %v7339_v28  ;;  %v7415_v28 = vld [vmem:[#allocation2 + $0xf40] ss:$8 sps:$4 sm:$0xff]   ;;  %4354 = vmatpush2.bf16.msra.mxu1 %v7418_v27 }
 0xd41   : > { %3696 = vmatpush2.bf16.msra.mxu0 %v7337_v29  ;;  %v7423_v29 = vld [vmem:[#allocation2 + $0xf34] ss:$8 sps:$4 sm:$0xff]  }
 0xd42   : > { %3697 = vmatprep.subr.bf16.mxu0 %v7342_v30  ;;  %v7421_v30 = vld [vmem:[#allocation2 + $0xf30] ss:$8 sps:$4 sm:$0xff]  }
 0xd45   : > { %3698 = vmatpush2.bf16.msra.mxu0 %v7340_v31  ;;  %v7426_v31 = vld [vmem:[#allocation2 + $0xe44] ss:$8 sps:$4 sm:$0xff]  }
 0xd46   : > { %3699 = vmatprep.subr.bf16.mxu0 %v7345_v32  ;;  %v7424_v32 = vld [vmem:[#allocation2 + $0xe40] ss:$8 sps:$4 sm:$0xff]   ;;  %4355 = vmatprep.subr.bf16.mxu1 %v7426_v31  ;;  %v7447_v31 = vld [vmem:[#allocation2 + $0xff4] ss:$8 sps:$4 sm:$0xff]  }
 0xd47   : > { %4356 = vmatpush2.bf16.msra.mxu1 %v7424_v32 }
 0xd49   : > { %3700 = vmatpush2.bf16.msra.mxu0 %v7343_v33  ;;  %v7429_v33 = vld [vmem:[#allocation2 + $0xf24] ss:$8 sps:$4 sm:$0xff]  }
 0xd4a   : > { %4372 = vmatprep.subr.bf16.mxu0 %v7348_v38  ;;  %v7435_v38 = vld [vmem:[#allocation2 + $0xf14] ss:$8 sps:$4 sm:$0xff]  }
 0xd4c   : > { %6305 = vmatmul.mubr.msk.bf16.vlgmr.msra.gmra.mxu0 %vm8269_vm14, %v6304_v35  ;;  %v7432_v35 = vld [vmem:[#allocation2 + $0xe34] ss:$8 sps:$4 sm:$0xff]  }
 0xd4d   : > { %4373 = vmatpush1.bf16.msra.mxu0 %v7346_v36  ;;  %v7430_v36 = vld [vmem:[#allocation2 + $0xe30] ss:$8 sps:$4 sm:$0xff]   ;;  %4357 = vmatprep.subr.bf16.mxu1 %v7432_v35  ;;  %v7448_v35 = vld [vmem:[#allocation2 + $0xfe0] ss:$8 sps:$4 sm:$0xff]  }
 0xd4e   : > { %4374 = vmatprep.subr.bf16.mxu0 %v7351_v40  ;;  %v7433_v40 = vld [vmem:[#allocation2 + $0xf10] ss:$8 sps:$4 sm:$0xff]   ;;  %4358 = vmatpush2.bf16.msra.mxu1 %v7430_v36  ;;  %v7453_v36 = vld [vmem:[#allocation2 + $0xfd4] ss:$8 sps:$4 sm:$0xff]  }
 0xd4f   : > { %4359 = vmatprep.subr.bf16.mxu1 %v7438_v41  ;;  %v7454_v41 = vld [vmem:[#allocation2 + $0xfc0] ss:$8 sps:$4 sm:$0xff]  }
 0xd51   : > { %4375 = vmatpush1.bf16.msra.mxu0 %v7349_v8  ;;  %v7439_v8 = vld [vmem:[#allocation2 + $0xe10] ss:$8 sps:$4 sm:$0xff]  }
 0xd52   : > { %4376 = vmatprep.subr.bf16.mxu0 %v7357_v12  ;;  %4360 = vmatpush2.bf16.msra.mxu1 %v7436_v42  ;;  %v7444_v12 = vld [vmem:[#allocation2 + $0x1004] ss:$8 sps:$4 sm:$0xff]   ;;  %v7459_v42 = vld [vmem:[#allocation2 + $0xfb4] ss:$8 sps:$4 sm:$0xff]  }
 0xd53   : > { %4361 = vmatprep.subr.bf16.mxu1 %v7441_v43  ;;  %v7462_v43 = vld [vmem:[#allocation2 + $0xfa4] ss:$8 sps:$4 sm:$0xff]  }
 0xd55   : > { %4377 = vmatpush1.bf16.msra.mxu0 %v7355_v46 }
 0xd56   : > { %4378 = vmatprep.subr.bf16.mxu0 %v7363_v47  ;;  %4362 = vmatpush2.bf16.msra.mxu1 %v7439_v8  ;;  %v7457_v8 = vld [vmem:[#allocation2 + $0xfb0] ss:$8 sps:$4 sm:$0xff]  }
 0xd57   : > { %4413 = vmatprep.subr.bf16.mxu1 %v7444_v12  ;;  %v7460_v12 = vld [vmem:[#allocation2 + $0xfa0] ss:$8 sps:$4 sm:$0xff]  }
 0xd59   : > { %4379 = vmatpush1.bf16.msra.mxu0 %v7361_v49 }
 0xd5a   : > { %4380 = vmatprep.subr.bf16.mxu0 %v7369_v2 }
 0xd5d   : > { %4381 = vmatpush1.bf16.msra.mxu0 %v7367_v52  ;;  %v3104_v52 = vrot.slane %v3095_v50, %v8253_v23  ;;  %v7477_v50 = vld [vmem:[#allocation2 + $0x1054] ss:$8 sps:$4 sm:$0xff]  }
 0xd5e   : > { %4382 = vmatprep.subr.bf16.mxu0 %v7375_v54  ;;  %v2818_v54 = vld [vmem:[#allocation5 + $0x14] ss:$8 sm:$0x3] }
 0xd5f   : > { %v2823_v39 = vrot.slane %v2818_v54, %v8250_v58 }
 0xd61   : > { %4383 = vmatpush1.bf16.msra.mxu0 %v7373_v57 }
 0xd62   : > { %4384 = vmatprep.subr.bf16.mxu0 %v7381_v59  ;;  %v2827_v59 = vrot.slane %v2818_v54, %v8253_v23  ;;  %v7478_v54 = vld [vmem:[#allocation2 + $0x1040] ss:$8 sps:$4 sm:$0xff]  }
 0xd65   : > { %4385 = vmatpush1.bf16.msra.mxu0 %v7379_v62  ;;  %v2945_v62 = vadd.f32 %v8279_v5, %v2823_v39  ;;  %v7481_v39 = vld [vmem:[#allocation2 + $0x1030] ss:$8 sps:$4 sm:$0xff]  }
 0xd66   : > { %4386 = vmatprep.subr.bf16.mxu0 %v7387_v63 }
 0xd69   : > { %4387 = vmatpush1.bf16.msra.mxu0 %v7385_v4  ;;  %v2947_v4 = vadd.f32 %v8281_v10, %v2827_v59  ;;  %v7484_v59 = vld [vmem:[#allocation2 + $0x1020] ss:$8 sps:$4 sm:$0xff]  }
 0xd6a   : > { %4388 = vmatprep.subr.bf16.mxu0 %v7393_v6 }
 0xd6d   : > { %4389 = vmatpush2.bf16.msra.mxu0 %v7391_v14 }
 0xd6e   : > { %4390 = vmatprep.subr.bf16.mxu0 %v7399_v15 }
 0xd71   : > { %4391 = vmatpush2.bf16.msra.mxu0 %v7397_v18 }
 0xd72   : > { %4392 = vmatprep.subr.bf16.mxu0 %v7405_v53 }
 0xd75   : > { %4393 = vmatpush2.bf16.msra.mxu0 %v7403_v16 }
 0xd76   : > { %4394 = vmatprep.subr.bf16.mxu0 %v7411_v20 }
 0xd79   : > { %4395 = vmatpush2.bf16.msra.mxu0 %v7409_v24 }
 0xd7a   : > { %4396 = vmatprep.subr.bf16.mxu0 %v7417_v26 }
 0xd7d   : > { %4397 = vmatpush2.bf16.msra.mxu0 %v7415_v28 }
 0xd7e   : > { %4398 = vmatprep.subr.bf16.mxu0 %v7423_v29  ;;  %v7442_v29 = vld [vmem:[#allocation2 + $0x1000] ss:$8 sps:$4 sm:$0xff]  }
 0xd81   : > { %4399 = vmatpush2.bf16.msra.mxu0 %v7421_v30 }
 0xd82   : > { %4400 = vmatprep.subr.bf16.mxu0 %v7429_v33  ;;  %v7445_v33 = vld [vmem:[#allocation2 + $0xff0] ss:$8 sps:$4 sm:$0xff]  }
 0xd85   : > { %4401 = vmatpush2.bf16.msra.mxu0 %v7427_v34  ;;  %v7450_v34 = vld [vmem:[#allocation2 + $0xfe4] ss:$8 sps:$4 sm:$0xff]  }
 0xd86   : > { %4402 = vmatprep.subr.bf16.mxu0 %v7435_v38  ;;  %v7451_v38 = vld [vmem:[#allocation2 + $0xfd0] ss:$8 sps:$4 sm:$0xff]  }
 0xd89   : > { %4403 = vmatpush2.bf16.msra.mxu0 %v7433_v40  ;;  %v7456_v40 = vld [vmem:[#allocation2 + $0xfc4] ss:$8 sps:$4 sm:$0xff]  }
 0xdc4   : > { %v3662_v44 = vpop.f32.mrf.mxu1 }
 0xdc6   : > { %v3664_v45 = vpop.f32.mrf.mxu1 }
 0xdc8   : > { %v3666_v46 = vpop.f32.mrf.mxu1 }
 0xdc9   : > { %v7468_v46 = vld [vmem:[#allocation2 + $0x1084] ss:$8 sps:$4 sm:$0xff]  }
 0xdca   : > { %v3667_v47 = vpop.f32.mrf.mxu1 }
 0xdcb   : > { %v7466_v47 = vld [vmem:[#allocation2 + $0x1080] ss:$8 sps:$4 sm:$0xff]  }
 0xdcc   : > { %v3621_v48 = vpop.f32.mrf.mxu0 }
 0xdcd   : > { %v3622_v55 = vadd.f32 %v3621_v48, %v3100_v51  ;;  %v7471_v48 = vld [vmem:[#allocation2 + $0x1074] ss:$8 sps:$4 sm:$0xff]   ;;  %v7475_v51 = vld [vmem:[#allocation2 + $0x1050] ss:$8 sps:$4 sm:$0xff]  }
 0xdce   : > { %v3623_v0 = vpop.f32.mrf.mxu0 }
 0xdcf   : > { %v3624_v57 = vadd.f32 %v3623_v0, %v3104_v52  ;;  %v3663_v60 = vadd.f32 %v3662_v44, %v3622_v55  ;;  %v7465_v44 = vld [vmem:[#allocation2 + $0xf94] ss:$8 sps:$4 sm:$0xff]   ;;  %v7469_v0 = vld [vmem:[#allocation2 + $0x1070] ss:$8 sps:$4 sm:$0xff]   ;;  %v7480_v52 = vld [vmem:[#allocation2 + $0x1044] ss:$8 sps:$4 sm:$0xff]  }
 0xdd0   : > { %v3625_v49 = vpop.f32.mrf.mxu0  ;;  %v7483_v55 = vld [vmem:[#allocation2 + $0x1034] ss:$8 sps:$4 sm:$0xff]  }
 0xdd1   : > { %v3665_v1 = vadd.f32 %v3664_v45, %v3624_v57  ;;  %v7463_v45 = vld [vmem:[#allocation2 + $0xf90] ss:$8 sps:$4 sm:$0xff]   ;;  %v7474_v49 = vld [vmem:[#allocation2 + $0x1064] ss:$8 sps:$4 sm:$0xff]  }
 0xdd2   : > { %v3626_v2 = vpop.f32.mrf.mxu0  ;;  %v7486_v57 = vld [vmem:[#allocation2 + $0x1024] ss:$8 sps:$4 sm:$0xff]  }
 0xdd3   : > { %v7472_v2 = vld [vmem:[#allocation2 + $0x1060] ss:$8 sps:$4 sm:$0xff]  }
 0xe0c   : > { %v3703_v61 = vpop.f32.mrf.mxu0 }
 0xe0d   : > { %v3704_v63 = vadd.f32 %v3703_v61, %v3663_v60  ;;  %v7489_v60 = vld [vmem:[#allocation2 + $0x1014] ss:$8 sps:$4 sm:$0xff]   ;;  %v7487_v61 = vld [vmem:[#allocation2 + $0x1010] ss:$8 sps:$4 sm:$0xff]  }
 0xe0e   : > { %v3705_v3 = vpop.f32.mrf.mxu0 }
 0xe0f   : > { %v3710_v6 = vadd.f32 %v3704_v63, %v2945_v62  ;;  %v3706_v11 = vadd.f32 %v3705_v3, %v3665_v1  ;;  %v7490_v1 = vld [vmem:[#allocation2 + $0x1200] ss:$8 sps:$4 sm:$0xff]   ;;  %v7492_v3 = vld [vmem:[#allocation2 + $0x1204] ss:$8 sps:$4 sm:$0xff]  }
 0xe10   : > { %v3707_v13 = vpop.f32.mrf.mxu0 }
 0xe11   : > { %v8292_v14 = vmax.f32 %v3710_v6, 0.0  ;;  %v3711_v15 = vadd.f32 %v3706_v11, %v2947_v4  ;;  %v7495_v4 = vld [vmem:[#allocation2 + $0x11f4] ss:$8 sps:$4 sm:$0xff]   ;;  %v7496_v6 = vld [vmem:[#allocation2 + $0x1100] ss:$8 sps:$4 sm:$0xff]  }
 0xe12   : > { %v3708_v17 = vpop.f32.mrf.mxu0  ;;  %v7498_v11 = vld [vmem:[#allocation2 + $0x1104] ss:$8 sps:$4 sm:$0xff]   ;;  %v7493_v13 = vld [vmem:[#allocation2 + $0x11f0] ss:$8 sps:$4 sm:$0xff]  }
 0xe13   : > { %v3714_v25 = vrot.slane %v8292_v14, 4  ;;  %v8295_v18 = vmax.f32 %v3711_v15, 0.0  ;;  %v3738_v37 = vpack.c.bf16 %v8292_v14, %v8292_v14  ;;  %5073 = vmatprep.subr.bf16.mxu0 %v7498_v11  ;;  %v7504_v15 = vld [vmem:[#allocation2 + $0x10f4] ss:$8 sps:$4 sm:$0xff]   ;;  %v7501_v17 = vld [vmem:[#allocation2 + $0x11e4] ss:$8 sps:$4 sm:$0xff]  }
 0xe14   : > { %v7580_v11 = vld [vmem:[#allocation2 + $0x1120] ss:$8 sps:$4 sm:$0xff]  }
 0xe15   : > { %v3715_v53 = vsel %vm2964_vm10, %v3714_v25, %v8292_v14  ;;  %v3716_v5 = vrot.slane %v8295_v18, 4  ;;  %v3739_v19 = vpack.c.bf16 %v8295_v18, %v8295_v18  ;;  %v7502_v25 = vld [vmem:[#allocation2 + $0x10f0] ss:$8 sps:$4 sm:$0xff]  }
 0xe16   : > { %v3718_v10 = vrot.slane %v3715_v53, 4  ;;  %v7510_v53 = vld [vmem:[#allocation2 + $0x10e4] ss:$8 sps:$4 sm:$0xff]  }
 0xe17   : > { %4404 = vmatprep.mubr.bf16.mxu0 %v3739_v19  ;;  %v3717_v16 = vsel %vm2964_vm10, %v3716_v5, %v8295_v18  ;;  %v7499_v5 = vld [vmem:[#allocation2 + $0x11e0] ss:$8 sps:$4 sm:$0xff]   ;;  %v7507_v19 = vld [vmem:[#allocation2 + $0x11d4] ss:$8 sps:$4 sm:$0xff]  }
 0xe18   : > { %4405 = vmatmul.mubr.bf16.vlgmr.msra.gmra.mxu0 %v3738_v37  ;;  %v3719_v20 = vrot.slane %v3717_v16, 4  ;;  %v8308_v21 = vsel %vm2964_vm10, %v3718_v10, %v8292_v14  ;;  %v7508_v10 = vld [vmem:[#allocation2 + $0x10e0] ss:$8 sps:$4 sm:$0xff]   ;;  %v7516_v37 = vld [vmem:[#allocation2 + $0x10d4] ss:$8 sps:$4 sm:$0xff]  }
 0xe19   : > { %v3724_v24 = vrot.slane %v8308_v21, 3  ;;  %v3730_v62 = vrot.slane %v8308_v21, 1  ;;  %5074 = vmatpush1.bf16.msra.mxu0 %v7496_v6  ;;  %v7505_v16 = vld [vmem:[#allocation2 + $0x11d0] ss:$8 sps:$4 sm:$0xff]   ;;  %v7582_v6 = vld [vmem:[#allocation2 + $0x1124] ss:$8 sps:$4 sm:$0xff]  }
 0xe1a   : > { %v3721_v22 = vsel %vm2964_vm10, %v3719_v20, %v8295_v18  ;;  %5075 = vmatprep.subr.bf16.mxu0 %v7504_v15  ;;  %v7513_v20 = vld [vmem:[#allocation2 + $0x11c4] ss:$8 sps:$4 sm:$0xff]   ;;  %v7514_v21 = vld [vmem:[#allocation2 + $0x10d0] ss:$8 sps:$4 sm:$0xff]  }
 0xe1b   : > { %v3725_v26 = vrot.slane %v3721_v22, 3  ;;  %v3731_v27 = vrot.slane %v3721_v22, 1  ;;  %v6410_v30 = vpack.c.bf16 %v3724_v24, %v3724_v24  ;;  %v6420_v63 = vpack.c.bf16 %v3730_v62, %v3730_v62  ;;  %v7522_v22 = vld [vmem:[#allocation2 + $0x10c4] ss:$8 sps:$4 sm:$0xff]   ;;  %v7511_v24 = vld [vmem:[#allocation2 + $0x11c0] ss:$8 sps:$4 sm:$0xff]  }
 0xe1c   : > { %v7571_v62 = vld [vmem:[#allocation2 + $0x1220] ss:$8 sps:$4 sm:$0xff]   ;;  %v7583_v15 = vld [vmem:[#allocation2 + $0x1110] ss:$8 sps:$4 sm:$0xff]  }
 0xe1d   : > { %v6405_v28 = vpack.c.bf16 %v3725_v26, %v3725_v26  ;;  %v6415_v32 = vpack.c.bf16 %v3731_v27, %v3731_v27  ;;  %5076 = vmatpush1.bf16.msra.mxu0 %v7502_v25  ;;  %v7519_v26 = vld [vmem:[#allocation2 + $0x11b4] ss:$8 sps:$4 sm:$0xff]   ;;  %v7520_v27 = vld [vmem:[#allocation2 + $0x10c0] ss:$8 sps:$4 sm:$0xff]  }
 0xe1e   : > { %5077 = vmatprep.subr.bf16.mxu0 %v7510_v53 }
 0xe1f   : > { %6406 = vmatprep.mubr.msk.bf16.mxu1 %vm8265_vm13, %v6405_v28  ;;  %v7528_v28 = vld [vmem:[#allocation2 + $0x10b4] ss:$8 sps:$4 sm:$0xff]  }
 0xe20   : > { %6411 = vmatmul.mubr.msk.bf16.vlgmr.msra.gmra.mxu1 %vm8265_vm13, %v6410_v30  ;;  %v7525_v30 = vld [vmem:[#allocation2 + $0x11a4] ss:$8 sps:$4 sm:$0xff]  }
 0xe21   : > { %4414 = vmatpush1.bf16.msra.mxu1 %v7442_v29  ;;  %6416 = vmatprep.mubr.msk.bf16.mxu1 %vm8269_vm14, %v6415_v32  ;;  %v7517_v29 = vld [vmem:[#allocation2 + $0x11b0] ss:$8 sps:$4 sm:$0xff]   ;;  %v7534_v32 = vld [vmem:[#allocation2 + $0x10a4] ss:$8 sps:$4 sm:$0xff]  }
 0xe22   : > { %4415 = vmatprep.subr.bf16.mxu1 %v7447_v31  ;;  %5078 = vmatpush1.bf16.msra.mxu0 %v7508_v10  ;;  %v7526_v31 = vld [vmem:[#allocation2 + $0x10b0] ss:$8 sps:$4 sm:$0xff]  }
 0xe23   : > { %5079 = vmatprep.subr.bf16.mxu0 %v7516_v37 }
 0xe25   : > { %4416 = vmatpush1.bf16.msra.mxu1 %v7445_v33  ;;  %v7523_v33 = vld [vmem:[#allocation2 + $0x11a0] ss:$8 sps:$4 sm:$0xff]  }
 0xe26   : > { %4417 = vmatprep.subr.bf16.mxu1 %v7450_v34  ;;  %5080 = vmatpush1.bf16.msra.mxu0 %v7514_v21  ;;  %v7531_v34 = vld [vmem:[#allocation2 + $0x1194] ss:$8 sps:$4 sm:$0xff]  }
 0xe27   : > { %5081 = vmatprep.subr.bf16.mxu0 %v7522_v22  ;;  %v3839_v21 = vld [vmem:[#allocation5 + $0x15] ss:$8 sm:$0x3] }
 0xe28   : > { %v3844_v22 = vrot.slane %v3839_v21, %v8250_v58 }
 0xe29   : > { %4418 = vmatpush1.bf16.msra.mxu1 %v7448_v35  ;;  %v7532_v35 = vld [vmem:[#allocation2 + $0x10a0] ss:$8 sps:$4 sm:$0xff]  }
 0xe2a   : > { %4419 = vmatprep.subr.bf16.mxu1 %v7453_v36  ;;  %5082 = vmatpush1.bf16.msra.mxu0 %v7520_v27  ;;  %v7540_v36 = vld [vmem:[#allocation2 + $0x1094] ss:$8 sps:$4 sm:$0xff]  }
 0xe2b   : > { %5083 = vmatprep.subr.bf16.mxu0 %v7528_v28 }
 0xe2d   : > { %4420 = vmatpush1.bf16.msra.mxu1 %v7451_v38  ;;  %v7529_v38 = vld [vmem:[#allocation2 + $0x1190] ss:$8 sps:$4 sm:$0xff]  }
 0xe2e   : > { %4421 = vmatprep.subr.bf16.mxu1 %v7456_v40  ;;  %5084 = vmatpush1.bf16.msra.mxu0 %v7526_v31  ;;  %v7537_v40 = vld [vmem:[#allocation2 + $0x1284] ss:$8 sps:$4 sm:$0xff]  }
 0xe2f   : > { %5085 = vmatprep.subr.bf16.mxu0 %v7534_v32 }
 0xe31   : > { %4422 = vmatpush1.bf16.msra.mxu1 %v7454_v41  ;;  %v7538_v41 = vld [vmem:[#allocation2 + $0x1090] ss:$8 sps:$4 sm:$0xff]  }
 0xe32   : > { %4423 = vmatprep.subr.bf16.mxu1 %v7459_v42  ;;  %5086 = vmatpush1.bf16.msra.mxu0 %v7532_v35  ;;  %v7546_v42 = vld [vmem:[#allocation2 + $0x1184] ss:$8 sps:$4 sm:$0xff]  }
 0xe33   : > { %5087 = vmatprep.subr.bf16.mxu0 %v7540_v36 }
 0xe35   : > { %4424 = vmatpush1.bf16.msra.mxu1 %v7457_v8  ;;  %v7535_v8 = vld [vmem:[#allocation2 + $0x1280] ss:$8 sps:$4 sm:$0xff]  }
 0xe36   : > { %4425 = vmatprep.subr.bf16.mxu1 %v7462_v43  ;;  %5088 = vmatpush1.bf16.msra.mxu0 %v7538_v41  ;;  %v7543_v43 = vld [vmem:[#allocation2 + $0x1274] ss:$8 sps:$4 sm:$0xff]  }
 0xe37   : > { %5089 = vmatprep.subr.bf16.mxu0 %v7546_v42 }
 0xe39   : > { %4426 = vmatpush1.bf16.msra.mxu1 %v7460_v12  ;;  %v7544_v12 = vld [vmem:[#allocation2 + $0x1180] ss:$8 sps:$4 sm:$0xff]  }
 0xe3a   : > { %4427 = vmatprep.subr.bf16.mxu1 %v7465_v44  ;;  %v7552_v44 = vld [vmem:[#allocation2 + $0x1174] ss:$8 sps:$4 sm:$0xff]   ;;  %5090 = vmatpush2.bf16.msra.mxu0 %v7544_v12 }
 0xe3b   : > { %5091 = vmatprep.subr.bf16.mxu0 %v7552_v44 }
 0xe3d   : > { %4428 = vmatpush1.bf16.msra.mxu1 %v7463_v45  ;;  %v7541_v45 = vld [vmem:[#allocation2 + $0x1270] ss:$8 sps:$4 sm:$0xff]  }
 0xe3e   : > { %4429 = vmatprep.subr.bf16.mxu1 %v7468_v46  ;;  %v7549_v46 = vld [vmem:[#allocation2 + $0x1264] ss:$8 sps:$4 sm:$0xff]  }
 0xe41   : > { %4430 = vmatpush2.bf16.msra.mxu1 %v7466_v47  ;;  %v7550_v47 = vld [vmem:[#allocation2 + $0x1170] ss:$8 sps:$4 sm:$0xff]  }
 0xe42   : > { %4431 = vmatprep.subr.bf16.mxu1 %v7471_v48  ;;  %v7558_v48 = vld [vmem:[#allocation2 + $0x1164] ss:$8 sps:$4 sm:$0xff]   ;;  %5092 = vmatpush2.bf16.msra.mxu0 %v7550_v47 }
 0xe43   : > { %5093 = vmatprep.subr.bf16.mxu0 %v7558_v48 }
 0xe45   : > { %4432 = vmatpush2.bf16.msra.mxu1 %v7469_v0  ;;  %v7547_v0 = vld [vmem:[#allocation2 + $0x1260] ss:$8 sps:$4 sm:$0xff]  }
 0xe46   : > { %4433 = vmatprep.subr.bf16.mxu1 %v7474_v49  ;;  %v7555_v49 = vld [vmem:[#allocation2 + $0x1254] ss:$8 sps:$4 sm:$0xff]  }
 0xe49   : > { %4434 = vmatpush2.bf16.msra.mxu1 %v7472_v2  ;;  %v7556_v2 = vld [vmem:[#allocation2 + $0x1160] ss:$8 sps:$4 sm:$0xff]  }
 0xe4a   : > { %4435 = vmatprep.subr.bf16.mxu1 %v7477_v50  ;;  %v7564_v50 = vld [vmem:[#allocation2 + $0x1154] ss:$8 sps:$4 sm:$0xff]   ;;  %5094 = vmatpush2.bf16.msra.mxu0 %v7556_v2 }
 0xe4b   : > { %5095 = vmatprep.subr.bf16.mxu0 %v7564_v50  ;;  %v7586_v50 = vld [vmem:[#allocation2 + $0x1300] ss:$8 sps:$4 sm:$0xff]  }
 0xe4d   : > { %4436 = vmatpush2.bf16.msra.mxu1 %v7475_v51  ;;  %v7553_v51 = vld [vmem:[#allocation2 + $0x1250] ss:$8 sps:$4 sm:$0xff]  }
 0xe4e   : > { %4437 = vmatprep.subr.bf16.mxu1 %v7480_v52  ;;  %v7561_v52 = vld [vmem:[#allocation2 + $0x1244] ss:$8 sps:$4 sm:$0xff]  }
 0xe51   : > { %4438 = vmatpush2.bf16.msra.mxu1 %v7478_v54  ;;  %v7562_v54 = vld [vmem:[#allocation2 + $0x1150] ss:$8 sps:$4 sm:$0xff]  }
 0xe52   : > { %4439 = vmatprep.subr.bf16.mxu1 %v7483_v55  ;;  %v7559_v55 = vld [vmem:[#allocation2 + $0x1240] ss:$8 sps:$4 sm:$0xff]   ;;  %5096 = vmatpush2.bf16.msra.mxu0 %v7562_v54 }
 0xe55   : > { %4440 = vmatpush2.bf16.msra.mxu1 %v7481_v39  ;;  %v7567_v39 = vld [vmem:[#allocation2 + $0x1234] ss:$8 sps:$4 sm:$0xff]  }
 0xe56   : > { %4441 = vmatprep.subr.bf16.mxu1 %v7486_v57  ;;  %v7565_v57 = vld [vmem:[#allocation2 + $0x1230] ss:$8 sps:$4 sm:$0xff]  }
 0xe59   : > { %4442 = vmatpush2.bf16.msra.mxu1 %v7484_v59  ;;  %v7570_v59 = vld [vmem:[#allocation2 + $0x1144] ss:$8 sps:$4 sm:$0xff]  }
 0xe5a   : > { %4443 = vmatprep.subr.bf16.mxu1 %v7489_v60  ;;  %v7568_v60 = vld [vmem:[#allocation2 + $0x1140] ss:$8 sps:$4 sm:$0xff]   ;;  %5097 = vmatprep.subr.bf16.mxu0 %v7570_v59  ;;  %v7597_v59 = vld [vmem:[#allocation2 + $0x12d4] ss:$8 sps:$4 sm:$0xff]  }
 0xe5b   : > { %5098 = vmatpush2.bf16.msra.mxu0 %v7568_v60  ;;  %v7595_v60 = vld [vmem:[#allocation2 + $0x12d0] ss:$8 sps:$4 sm:$0xff]  }
 0xe5d   : > { %4444 = vmatpush2.bf16.msra.mxu1 %v7487_v61  ;;  %v7573_v61 = vld [vmem:[#allocation2 + $0x1224] ss:$8 sps:$4 sm:$0xff]  }
 0xe5e   : > { %5114 = vmatprep.subr.bf16.mxu1 %v7492_v3  ;;  %v7579_v3 = vld [vmem:[#allocation2 + $0x1214] ss:$8 sps:$4 sm:$0xff]  }
 0xe60   : > { %6421 = vmatmul.mubr.msk.bf16.vlgmr.msra.gmra.mxu1 %vm8269_vm14, %v6420_v63  ;;  %v7576_v63 = vld [vmem:[#allocation2 + $0x1134] ss:$8 sps:$4 sm:$0xff]  }
 0xe61   : > { %5115 = vmatpush1.bf16.msra.mxu1 %v7490_v1  ;;  %v7574_v1 = vld [vmem:[#allocation2 + $0x1130] ss:$8 sps:$4 sm:$0xff]   ;;  %5099 = vmatprep.subr.bf16.mxu0 %v7576_v63 }
 0xe62   : > { %5116 = vmatprep.subr.bf16.mxu1 %v7495_v4  ;;  %v7577_v4 = vld [vmem:[#allocation2 + $0x1210] ss:$8 sps:$4 sm:$0xff]   ;;  %5100 = vmatpush2.bf16.msra.mxu0 %v7574_v1  ;;  %v7606_v1 = vld [vmem:[#allocation2 + $0x12a4] ss:$8 sps:$4 sm:$0xff]  }
 0xe63   : > { %5101 = vmatprep.subr.bf16.mxu0 %v7582_v6  ;;  %v7601_v63 = vld [vmem:[#allocation2 + $0x12b0] ss:$8 sps:$4 sm:$0xff]  }
 0xe64   : > { %v7607_v6 = vld [vmem:[#allocation2 + $0x1290] ss:$8 sps:$4 sm:$0xff]  }
 0xe65   : > { %5117 = vmatpush1.bf16.msra.mxu1 %v7493_v13  ;;  %v7585_v13 = vld [vmem:[#allocation2 + $0x1114] ss:$8 sps:$4 sm:$0xff]  }
 0xe66   : > { %5118 = vmatprep.subr.bf16.mxu1 %v7501_v17  ;;  %5102 = vmatpush2.bf16.msra.mxu0 %v7580_v11  ;;  %v7588_v17 = vld [vmem:[#allocation2 + $0x1304] ss:$8 sps:$4 sm:$0xff]  }
 0xe67   : > { %5103 = vmatprep.subr.bf16.mxu0 %v7585_v13  ;;  %v7612_v11 = vld [vmem:[#allocation2 + $0x1384] ss:$8 sps:$4 sm:$0xff]   ;;  %v7610_v13 = vld [vmem:[#allocation2 + $0x1380] ss:$8 sps:$4 sm:$0xff]  }
 0xe69   : > { %5119 = vmatpush1.bf16.msra.mxu1 %v7499_v5 }
 0xe6a   : > { %5120 = vmatprep.subr.bf16.mxu1 %v7507_v19  ;;  %5104 = vmatpush2.bf16.msra.mxu0 %v7583_v15  ;;  %v7615_v15 = vld [vmem:[#allocation2 + $0x1374] ss:$8 sps:$4 sm:$0xff]  }
 0xe6b   : > { %5155 = vmatprep.subr.bf16.mxu0 %v7588_v17  ;;  %v7613_v17 = vld [vmem:[#allocation2 + $0x1370] ss:$8 sps:$4 sm:$0xff]  }
 0xe6d   : > { %5121 = vmatpush1.bf16.msra.mxu1 %v7505_v16 }
 0xe6e   : > { %5122 = vmatprep.subr.bf16.mxu1 %v7513_v20 }
 0xe71   : > { %5123 = vmatpush1.bf16.msra.mxu1 %v7511_v24  ;;  %v3848_v24 = vrot.slane %v3839_v21, %v8253_v23  ;;  %v7630_v21 = vld [vmem:[#allocation2 + $0x1324] ss:$8 sps:$4 sm:$0xff]  }
 0xe72   : > { %5124 = vmatprep.subr.bf16.mxu1 %v7519_v26 }
 0xe75   : > { %5125 = vmatpush1.bf16.msra.mxu1 %v7517_v29 }
 0xe76   : > { %5126 = vmatprep.subr.bf16.mxu1 %v7525_v30 }
 0xe79   : > { %5127 = vmatpush1.bf16.msra.mxu1 %v7523_v33 }
 0xe7a   : > { %5128 = vmatprep.subr.bf16.mxu1 %v7531_v34 }
 0xe7d   : > { %5129 = vmatpush1.bf16.msra.mxu1 %v7529_v38 }
 0xe7e   : > { %5130 = vmatprep.subr.bf16.mxu1 %v7537_v40 }
 0xe81   : > { %5131 = vmatpush2.bf16.msra.mxu1 %v7535_v8 }
 0xe82   : > { %5132 = vmatprep.subr.bf16.mxu1 %v7543_v43 }
 0xe85   : > { %5133 = vmatpush2.bf16.msra.mxu1 %v7541_v45 }
 0xe86   : > { %5134 = vmatprep.subr.bf16.mxu1 %v7549_v46 }
 0xe89   : > { %5135 = vmatpush2.bf16.msra.mxu1 %v7547_v0 }
 0xe8a   : > { %5136 = vmatprep.subr.bf16.mxu1 %v7555_v49 }
 0xe8d   : > { %5137 = vmatpush2.bf16.msra.mxu1 %v7553_v51 }
 0xe8e   : > { %5138 = vmatprep.subr.bf16.mxu1 %v7561_v52  ;;  %v7591_v52 = vld [vmem:[#allocation2 + $0x12f4] ss:$8 sps:$4 sm:$0xff]  }
 0xe91   : > { %5139 = vmatpush2.bf16.msra.mxu1 %v7559_v55  ;;  %v7589_v55 = vld [vmem:[#allocation2 + $0x12f0] ss:$8 sps:$4 sm:$0xff]  }
 0xe92   : > { %5140 = vmatprep.subr.bf16.mxu1 %v7567_v39  ;;  %v7594_v39 = vld [vmem:[#allocation2 + $0x12e4] ss:$8 sps:$4 sm:$0xff]  }
 0xe95   : > { %5141 = vmatpush2.bf16.msra.mxu1 %v7565_v57  ;;  %v7592_v57 = vld [vmem:[#allocation2 + $0x12e0] ss:$8 sps:$4 sm:$0xff]  }
 0xe96   : > { %5142 = vmatprep.subr.bf16.mxu1 %v7573_v61  ;;  %v7600_v61 = vld [vmem:[#allocation2 + $0x12c4] ss:$8 sps:$4 sm:$0xff]  }
 0xe99   : > { %5143 = vmatpush2.bf16.msra.mxu1 %v7571_v62  ;;  %v7598_v62 = vld [vmem:[#allocation2 + $0x12c0] ss:$8 sps:$4 sm:$0xff]  }
 0xe9a   : > { %5144 = vmatprep.subr.bf16.mxu1 %v7579_v3  ;;  %v7604_v3 = vld [vmem:[#allocation2 + $0x12a0] ss:$8 sps:$4 sm:$0xff]  }
 0xe9d   : > { %5145 = vmatpush2.bf16.msra.mxu1 %v7577_v4  ;;  %v7609_v4 = vld [vmem:[#allocation2 + $0x1294] ss:$8 sps:$4 sm:$0xff]  }
 0xed8   : > { %v4406_v25 = vpop.f32.mrf.mxu0 }
 0xeda   : > { %v4408_v53 = vpop.f32.mrf.mxu0 }
 0xedc   : > { %v4410_v5 = vpop.f32.mrf.mxu0 }
 0xedd   : > { %v7621_v5 = vld [vmem:[#allocation2 + $0x1354] ss:$8 sps:$4 sm:$0xff]  }
 0xede   : > { %v4411_v19 = vpop.f32.mrf.mxu0 }
 0xedf   : > { %v7619_v19 = vld [vmem:[#allocation2 + $0x1350] ss:$8 sps:$4 sm:$0xff]  }
 0xee0   : > { %v4365_v10 = vpop.f32.mrf.mxu1 }
 0xee1   : > { %v4366_v26 = vadd.f32 %v4365_v10, %v3844_v22  ;;  %v7624_v10 = vld [vmem:[#allocation2 + $0x1344] ss:$8 sps:$4 sm:$0xff]   ;;  %v7628_v22 = vld [vmem:[#allocation2 + $0x1320] ss:$8 sps:$4 sm:$0xff]  }
 0xee2   : > { %v4367_v37 = vpop.f32.mrf.mxu1 }
 0xee3   : > { %v4368_v27 = vadd.f32 %v4367_v37, %v3848_v24  ;;  %v4407_v28 = vadd.f32 %v4406_v25, %v4366_v26  ;;  %v7618_v25 = vld [vmem:[#allocation2 + $0x1364] ss:$8 sps:$4 sm:$0xff]   ;;  %v7622_v37 = vld [vmem:[#allocation2 + $0x1340] ss:$8 sps:$4 sm:$0xff]   ;;  %v7633_v24 = vld [vmem:[#allocation2 + $0x1314] ss:$8 sps:$4 sm:$0xff]  }
 0xee4   : > { %v4369_v16 = vpop.f32.mrf.mxu1  ;;  %v7631_v26 = vld [vmem:[#allocation2 + $0x1310] ss:$8 sps:$4 sm:$0xff]  }
 0xee5   : > { %v4409_v31 = vadd.f32 %v4408_v53, %v4368_v27  ;;  %v7616_v53 = vld [vmem:[#allocation2 + $0x1360] ss:$8 sps:$4 sm:$0xff]   ;;  %v7627_v16 = vld [vmem:[#allocation2 + $0x1334] ss:$8 sps:$4 sm:$0xff]  }
 0xee6   : > { %v4370_v20 = vpop.f32.mrf.mxu1 }
 0xee7   : > { %v7625_v20 = vld [vmem:[#allocation2 + $0x1330] ss:$8 sps:$4 sm:$0xff]  }
 0xf20   : > { %v4447_v29 = vpop.f32.mrf.mxu1 }
 0xf21   : > { %v4448_v30 = vadd.f32 %v4447_v29, %v4407_v28  ;;  %v7634_v29 = vld [vmem:[#allocation2 + $0x1480] ss:$8 sps:$4 sm:$0xff]  }
 0xf22   : > { %v4449_v32 = vpop.f32.mrf.mxu1  ;;  %6701 = vmatprep.subr.bf16.mxu1 %v7634_v29 }
 0xf23   : > { %v4454_v33 = vmax.f32 %v4448_v30, 0.0  ;;  %v4450_v34 = vadd.f32 %v4449_v32, %v4409_v31  ;;  %v7635_v30 = vld [vmem:[#allocation2 + $0x1400] ss:$8 sps:$4 sm:$0xff]   ;;  %v7636_v31 = vld [vmem:[#allocation2 + $0x1470] ss:$8 sps:$4 sm:$0xff]  }
 0xf24   : > { %v4451_v35 = vpop.f32.mrf.mxu1  ;;  %v7642_v32 = vld [vmem:[#allocation2 + $0x16a0] ss:$8 sps:$4 sm:$0xff]  }
 0xf25   : > { %v4456_v36 = vrot.slane %v4454_v33, 4  ;;  %v4455_v38 = vmax.f32 %v4450_v34, 0.0  ;;  %v4480_v12 = vpack.c.bf16 %v4454_v33, %v4454_v33  ;;  %v7644_v34 = vld [vmem:[#allocation2 + $0x1620] ss:$8 sps:$4 sm:$0xff]  }
 0xf26   : > { %v4452_v40 = vpop.f32.mrf.mxu1  ;;  %v7638_v35 = vld [vmem:[#allocation2 + $0x1460] ss:$8 sps:$4 sm:$0xff]  }
 0xf27   : > { %v4457_v41 = vsel %vm2964_vm10, %v4456_v36, %v4454_v33  ;;  %v4458_v42 = vrot.slane %v4455_v38, 4  ;;  %v4481_v8 = vpack.c.bf16 %v4455_v38, %v4455_v38  ;;  %v7646_v36 = vld [vmem:[#allocation2 + $0x1690] ss:$8 sps:$4 sm:$0xff]  }
 0xf28   : > { %v4460_v43 = vrot.slane %v4457_v41, 4  ;;  %v7640_v40 = vld [vmem:[#allocation2 + $0x1450] ss:$8 sps:$4 sm:$0xff]   ;;  %v7643_v41 = vld [vmem:[#allocation2 + $0x1440] ss:$8 sps:$4 sm:$0xff]  }
 0xf29   : > { %v4459_v44 = vsel %vm2964_vm10, %v4458_v42, %v4455_v38  ;;  %5146 = vmatprep.mubr.bf16.mxu1 %v4481_v8  ;;  %v7645_v42 = vld [vmem:[#allocation2 + $0x13c0] ss:$8 sps:$4 sm:$0xff]   ;;  %v7647_v8 = vld [vmem:[#allocation2 + $0x1430] ss:$8 sps:$4 sm:$0xff]  }
 0xf2a   : > { %v8327_v45 = vsel %vm2964_vm10, %v4460_v43, %v4454_v33  ;;  %v4461_v46 = vrot.slane %v4459_v44, 4  ;;  %5147 = vmatmul.mubr.bf16.vlgmr.msra.gmra.mxu1 %v4480_v12  ;;  %v7637_v33 = vld [vmem:[#allocation2 + $0x13f0] ss:$8 sps:$4 sm:$0xff]   ;;  %v7650_v44 = vld [vmem:[#allocation2 + $0x1680] ss:$8 sps:$4 sm:$0xff]  }
 0xf2b   : > { %v4466_v47 = vrot.slane %v8327_v45, 3  ;;  %v4472_v27 = vrot.slane %v8327_v45, 1  ;;  %6702 = vmatpush3.bf16.msra.mxu1 %v7635_v30  ;;  %v7648_v43 = vld [vmem:[#allocation2 + $0x1610] ss:$8 sps:$4 sm:$0xff]   ;;  %v7651_v45 = vld [vmem:[#allocation2 + $0x1420] ss:$8 sps:$4 sm:$0xff]  }
 0xf2c   : > { %v4463_v48 = vsel %vm2964_vm10, %v4461_v46, %v4455_v38  ;;  %6703 = vmatprep.subr.bf16.mxu1 %v7636_v31  ;;  %v7639_v38 = vld [vmem:[#allocation2 + $0x13e0] ss:$8 sps:$4 sm:$0xff]   ;;  %v7649_v12 = vld [vmem:[#allocation2 + $0x13b0] ss:$8 sps:$4 sm:$0xff]  }
 0xf2d   : > { %v4467_v0 = vrot.slane %v4463_v48, 3  ;;  %v4473_v49 = vrot.slane %v4463_v48, 1  ;;  %v6526_v51 = vpack.c.bf16 %v4466_v47, %v4466_v47  ;;  %v6536_v28 = vpack.c.bf16 %v4472_v27, %v4472_v27  ;;  %v7652_v46 = vld [vmem:[#allocation2 + $0x1600] ss:$8 sps:$4 sm:$0xff]   ;;  %v7654_v48 = vld [vmem:[#allocation2 + $0x1670] ss:$8 sps:$4 sm:$0xff]  }
 0xf2e   : > { %v7653_v47 = vld [vmem:[#allocation2 + $0x13a0] ss:$8 sps:$4 sm:$0xff]  }
 0xf2f   : > { %v6521_v2 = vpack.c.bf16 %v4467_v0, %v4467_v0  ;;  %v6531_v54 = vpack.c.bf16 %v4473_v49, %v4473_v49  ;;  %6704 = vmatpush3.bf16.msra.mxu1 %v7637_v33  ;;  %v7655_v0 = vld [vmem:[#allocation2 + $0x1410] ss:$8 sps:$4 sm:$0xff]  }
 0xf30   : > { %6705 = vmatprep.subr.bf16.mxu1 %v7638_v35  ;;  %v7656_v49 = vld [vmem:[#allocation2 + $0x15f0] ss:$8 sps:$4 sm:$0xff]  }
 0xf31   : > { %6522 = vmatprep.mubr.msk.bf16.mxu0 %vm8265_vm13, %v6521_v2  ;;  %v7657_v2 = vld [vmem:[#allocation2 + $0x1390] ss:$8 sps:$4 sm:$0xff]  }
 0xf32   : > { %6527 = vmatmul.mubr.msk.bf16.vlgmr.msra.gmra.mxu0 %vm8265_vm13, %v6526_v51  ;;  %v7659_v51 = vld [vmem:[#allocation2 + $0x15e0] ss:$8 sps:$4 sm:$0xff]  }
 0xf33   : > { %5156 = vmatpush1.bf16.msra.mxu0 %v7586_v50  ;;  %6532 = vmatprep.mubr.msk.bf16.mxu0 %vm8269_vm14, %v6531_v54  ;;  %v7658_v50 = vld [vmem:[#allocation2 + $0x1660] ss:$8 sps:$4 sm:$0xff]   ;;  %v7661_v54 = vld [vmem:[#allocation2 + $0x15d0] ss:$8 sps:$4 sm:$0xff]  }
 0xf34   : > { %5157 = vmatprep.subr.bf16.mxu0 %v7591_v52  ;;  %6706 = vmatpush3.bf16.msra.mxu1 %v7639_v38  ;;  %v7660_v52 = vld [vmem:[#allocation2 + $0x1650] ss:$8 sps:$4 sm:$0xff]  }
 0xf35   : > { %6707 = vmatprep.subr.bf16.mxu1 %v7640_v40 }
 0xf37   : > { %5158 = vmatpush1.bf16.msra.mxu0 %v7589_v55  ;;  %v7662_v55 = vld [vmem:[#allocation2 + $0x1640] ss:$8 sps:$4 sm:$0xff]  }
 0xf38   : > { %5159 = vmatprep.subr.bf16.mxu0 %v7594_v39  ;;  %6708 = vmatpush3.bf16.msra.mxu1 %v7641_v56  ;;  %v7663_v39 = vld [vmem:[#allocation2 + $0x15c0] ss:$8 sps:$4 sm:$0xff]  }
 0xf39   : > { %6709 = vmatprep.subr.bf16.mxu1 %v7643_v41 }
 0xf3b   : > { %5160 = vmatpush1.bf16.msra.mxu0 %v7592_v57  ;;  %v7664_v57 = vld [vmem:[#allocation2 + $0x1630] ss:$8 sps:$4 sm:$0xff]  }
 0xf3c   : > { %5161 = vmatprep.subr.bf16.mxu0 %v7597_v59  ;;  %6710 = vmatpush3.bf16.msra.mxu1 %v7645_v42  ;;  %v7665_v59 = vld [vmem:[#allocation2 + $0x15b0] ss:$8 sps:$4 sm:$0xff]  }
 0xf3d   : > { %6711 = vmatprep.subr.bf16.mxu1 %v7647_v8 }
 0xf3f   : > { %5162 = vmatpush1.bf16.msra.mxu0 %v7595_v60 }
 0xf40   : > { %5163 = vmatprep.subr.bf16.mxu0 %v7600_v61  ;;  %6712 = vmatpush3.bf16.msra.mxu1 %v7649_v12  ;;  %v7667_v12 = vld [vmem:[#allocation2 + $0x1490] ss:$8 sps:$4 sm:$0xff]  }
 0xf41   : > { %6713 = vmatprep.subr.bf16.mxu1 %v7651_v45  ;;  %v5234_v45 = vld [vmem:[#allocation5 + $0x17] ss:$0 sm:$0xff] }
 0xf43   : > { %5164 = vmatpush1.bf16.msra.mxu0 %v7598_v62 }
 0xf44   : > { %5165 = vmatprep.subr.bf16.mxu0 %v7603_v9  ;;  %6714 = vmatpush3.bf16.msra.mxu1 %v7653_v47 }
 0xf45   : > { %6715 = vmatprep.subr.bf16.mxu1 %v7655_v0 }
 0xf47   : > { %5166 = vmatpush1.bf16.msra.mxu0 %v7601_v63 }
 0xf48   : > { %5167 = vmatprep.subr.bf16.mxu0 %v7606_v1  ;;  %6716 = vmatpush3.bf16.msra.mxu1 %v7657_v2 }
 0xf49   : > { %6862 = vmatprep.subr.bf16.mxu1 %v7817_v7 }
 0xf4b   : > { %5168 = vmatpush1.bf16.msra.mxu0 %v7604_v3 }
 0xf4c   : > { %5169 = vmatprep.subr.bf16.mxu0 %v7609_v4 }
 0xf4f   : > { %5170 = vmatpush1.bf16.msra.mxu0 %v7607_v6  ;;  %v4581_v6 = vld [vmem:[#allocation5 + $0x16] ss:$8 sm:$0x3] }
 0xf50   : > { %5171 = vmatprep.subr.bf16.mxu0 %v7612_v11  ;;  %v4586_v11 = vrot.slane %v4581_v6, %v8250_v58 }
 0xf53   : > { %5172 = vmatpush2.bf16.msra.mxu0 %v7610_v13  ;;  %v4590_v13 = vrot.slane %v4581_v6, %v8253_v23 }
 0xf54   : > { %5173 = vmatprep.subr.bf16.mxu0 %v7615_v15 }
 0xf57   : > { %5174 = vmatpush2.bf16.msra.mxu0 %v7613_v17 }
 0xf58   : > { %5175 = vmatprep.subr.bf16.mxu0 %v7618_v25 }
 0xf5b   : > { %5176 = vmatpush2.bf16.msra.mxu0 %v7616_v53 }
 0xf5c   : > { %5177 = vmatprep.subr.bf16.mxu0 %v7621_v5 }
 0xf5f   : > { %5178 = vmatpush2.bf16.msra.mxu0 %v7619_v19 }
 0xf60   : > { %5179 = vmatprep.subr.bf16.mxu0 %v7624_v10 }
 0xf63   : > { %5180 = vmatpush2.bf16.msra.mxu0 %v7622_v37 }
 0xf64   : > { %5181 = vmatprep.subr.bf16.mxu0 %v7627_v16 }
 0xf67   : > { %5182 = vmatpush2.bf16.msra.mxu0 %v7625_v20 }
 0xf68   : > { %5183 = vmatprep.subr.bf16.mxu0 %v7630_v21 }
 0xf6b   : > { %5184 = vmatpush2.bf16.msra.mxu0 %v7628_v22 }
 0xf6c   : > { %5185 = vmatprep.subr.bf16.mxu0 %v7633_v24 }
 0xf6f   : > { %5186 = vmatpush2.bf16.msra.mxu0 %v7631_v26 }
 0xf70   : > { %6748 = vmatprep.subr.bf16.mxu0 %v7642_v32 }
 0xf72   : > { %6537 = vmatmul.mubr.msk.bf16.vlgmr.msra.gmra.mxu0 %vm8269_vm14, %v6536_v28 }
 0xf73   : > { %6749 = vmatpush3.bf16.msra.mxu0 %v7644_v34 }
 0xf74   : > { %6750 = vmatprep.subr.bf16.mxu0 %v7646_v36 }
 0xf77   : > { %6751 = vmatpush3.bf16.msra.mxu0 %v7648_v43  ;;  %v7666_v43 = vld [vmem:[#allocation2 + $0x14a0] ss:$8 sps:$4 sm:$0xff]  }
 0xf78   : > { %6752 = vmatprep.subr.bf16.mxu0 %v7650_v44 }
 0xf7b   : > { %6753 = vmatpush3.bf16.msra.mxu0 %v7652_v46 }
 0xf7c   : > { %6754 = vmatprep.subr.bf16.mxu0 %v7654_v48 }
 0xf7f   : > { %6755 = vmatpush3.bf16.msra.mxu0 %v7656_v49 }
 0xf80   : > { %6756 = vmatprep.subr.bf16.mxu0 %v7658_v50 }
 0xf83   : > { %6757 = vmatpush3.bf16.msra.mxu0 %v7659_v51 }
 0xf84   : > { %6758 = vmatprep.subr.bf16.mxu0 %v7660_v52 }
 0xf87   : > { %6759 = vmatpush3.bf16.msra.mxu0 %v7661_v54 }
 0xf88   : > { %6760 = vmatprep.subr.bf16.mxu0 %v7662_v55 }
 0xf8b   : > { %6761 = vmatpush3.bf16.msra.mxu0 %v7663_v39 }
 0xf8c   : > { %6762 = vmatprep.subr.bf16.mxu0 %v7664_v57 }
 0xf8f   : > { %6763 = vmatpush3.bf16.msra.mxu0 %v7665_v59 }
 0xfea   : > { %v5148_v60 = vpop.f32.mrf.mxu1 }
 0xfec   : > { %v5150_v61 = vpop.f32.mrf.mxu1 }
 0xfee   : > { %v5152_v62 = vpop.f32.mrf.mxu1 }
 0xff0   : > { %v5153_v9 = vpop.f32.mrf.mxu1 }
 0xff2   : > { %v5107_v63 = vpop.f32.mrf.mxu0 }
 0xff3   : > { %v5108_v15 = vadd.f32 %v5107_v63, %v4586_v11 }
 0xff4   : > { %v5109_v1 = vpop.f32.mrf.mxu0 }
 0xff5   : > { %v5110_v17 = vadd.f32 %v5109_v1, %v4590_v13  ;;  %v5149_v25 = vadd.f32 %v5148_v60, %v5108_v15 }
 0xff6   : > { %v5111_v3 = vpop.f32.mrf.mxu0 }
 0xff7   : > { %v5151_v19 = vadd.f32 %v5150_v61, %v5110_v17  ;;  %v7668_v17 = vld [vmem:[#allocation2 + $0x15a0] ss:$8 sps:$4 sm:$0xff]  }
 0xff8   : > { %v5112_v4 = vpop.f32.mrf.mxu0 }
0x1032   : > { %v5189_v53 = vpop.f32.mrf.mxu0 }
0x1033   : > { %v5190_v5 = vadd.f32 %v5189_v53, %v5149_v25  ;;  %v7669_v25 = vld [vmem:[#allocation2 + $0x1520] ss:$8 sps:$4 sm:$0xff]   ;;  %v7670_v53 = vld [vmem:[#allocation2 + $0x1590] ss:$8 sps:$4 sm:$0xff]  }
0x1034   : > { %v5191_v10 = vpop.f32.mrf.mxu0 }
0x1035   : > { %v5196_v37 = vadd.f32 %v5190_v5, %v8292_v14  ;;  %v5192_v16 = vadd.f32 %v5191_v10, %v5151_v19  ;;  %v7671_v19 = vld [vmem:[#allocation2 + $0x1510] ss:$8 sps:$4 sm:$0xff]  }
0x1036   : > { %v5193_v20 = vpop.f32.mrf.mxu0 }
0x1037   : > { %v8344_v21 = vmax.f32 %v5196_v37, 0.0  ;;  %v5197_v22 = vadd.f32 %v5192_v16, %v8295_v18  ;;  %v7672_v16 = vld [vmem:[#allocation2 + $0x1580] ss:$8 sps:$4 sm:$0xff]  }
0x1038   : > { %v5194_v24 = vpop.f32.mrf.mxu0 }
0x1039   : > { %v5480_v58 = vsel %vm223_vm1, %v8344_v21, 0.0  ;;  %v8349_v23 = vmax.f32 %v5197_v22, 0.0  ;;  %v5200_v30 = vpack.c.bf16 %v8344_v21, %v8344_v21  ;;  %v7673_v22 = vld [vmem:[#allocation2 + $0x1500] ss:$8 sps:$4 sm:$0xff]  }
0x103a   : > { %v5481_v26 = vrot.slane %v5480_v58, 4 }
0x103b   : > { %v5487_v27 = vsel %vm223_vm1, %v8349_v23, 0.0  ;;  %v5201_v28 = vpack.c.bf16 %v8349_v23, %v8349_v23 }
0x103c   : > { %v5482_v14 = vadd.f32 %v5481_v26, %v5480_v58  ;;  %v5488_v29 = vrot.slane %v5487_v27, 4  ;;  %v7674_v58 = vld [vmem:[#allocation2 + $0x1570] ss:$8 sps:$4 sm:$0xff]  }
0x103d   : > { %5363 = vmatprep.mubr.bf16.mxu1 %v5201_v28 }
0x103e   : > { %v5483_v18 = vrot.slane %v5482_v14, 2  ;;  %v5489_v31 = vadd.f32 %v5488_v29, %v5487_v27  ;;  %5364 = vmatmul.mubr.bf16.vlgmr.msra.gmra.mxu1 %v5200_v30  ;;  %v7675_v27 = vld [vmem:[#allocation2 + $0x14f0] ss:$8 sps:$4 sm:$0xff]   ;;  %v7677_v29 = vld [vmem:[#allocation2 + $0x14e0] ss:$8 sps:$4 sm:$0xff]  }
0x103f   : > { %6866 = vmatprep.mubr.msk.bf16.mxu1 %vm7818_vm3, %v7817_v7  ;;  %6863 = vmatpush3.bf16.msra.mxu1 %v7666_v43  ;;  %vm5433_vm3 = vcmask 3072   ;;  %v7678_v30 = vld [vmem:[#allocation2 + $0x1550] ss:$8 sps:$4 sm:$0xff]  }
0x1040   : > { %v5490_v32 = vrot.slane %v5489_v31, 2  ;;  %v5484_v33 = vadd.f32 %v5483_v18, %v5482_v14  ;;  %6864 = vmatprep.subr.bf16.mxu1 %v7817_v7  ;;  %v5377_v7 = vld [vmem:[#allocation5 + $0x20] ss:$0 sm:$0xff] }
0x1041   : > { %v7676_v14 = vld [vmem:[#allocation2 + $0x1560] ss:$8 sps:$4 sm:$0xff]  }
0x1042   : > { %v5491_v34 = vadd.f32 %v5490_v32, %v5489_v31  ;;  %v5485_v35 = vrot.slane %v5484_v33, 1  ;;  %v7679_v31 = vld [vmem:[#allocation2 + $0x14d0] ss:$8 sps:$4 sm:$0xff]   ;;  %v7680_v32 = vld [vmem:[#allocation2 + $0x1540] ss:$8 sps:$4 sm:$0xff]  }
0x1043   : > { %6865 = vmatpush3.bf16.msra.mxu1 %v7667_v12 }
0x1044   : > { %v5492_v36 = vrot.slane %v5491_v34, 1  ;;  %v5486_v38 = vadd.f32 %v5485_v35, %v5484_v33  ;;  %6726 = vmatprep.subr.bf16.mxu1 %v7668_v17  ;;  %v7681_v33 = vld [vmem:[#allocation2 + $0x14c0] ss:$8 sps:$4 sm:$0xff]   ;;  %v7683_v35 = vld [vmem:[#allocation2 + $0x14b0] ss:$8 sps:$4 sm:$0xff]  }
0x1046   : > { %v5493_v40 = vadd.f32 %v5492_v36, %v5491_v34  ;;  %v5495_v56 = vmul.f32 0.25, %v5486_v38  ;;  %v7682_v34 = vld [vmem:[#allocation2 + $0x1530] ss:$8 sps:$4 sm:$0xff]  }
0x1048   : > { %v5496_v41 = vmul.f32 0.25, %v5493_v40  ;;  %v5499_v8 = vpack.c.bf16 %v5495_v56, %v5495_v56 }
0x104a   : > { %v5500_v42 = vpack.c.bf16 %v5496_v41, %v5496_v41 }
0x104c   : > { %5830 = vmatprep.mubr.bf16.mxu0 %v5500_v42 }
0x104d   : > { %5831 = vmatmul.mubr.bf16.vlgmr.msra.gmra.mxu0 %v5499_v8 }
0x10fe   : > { %v6717_v44 = vpop.f32.mrf.mxu1 }
0x1100   : > { %v6718_v46 = vpop.f32.mrf.mxu1 }
0x1101   : > { %v6719_v47 = vadd.f32 %v6718_v46, %v6717_v44 }
0x1102   : > { %v6720_v48 = vpop.f32.mrf.mxu1 }
0x1103   : > { %v5366_v0 = vadd.f32 %v6719_v47, %v5234_v45 }
0x1104   : > { %v6721_v49 = vpop.f32.mrf.mxu1 }
0x1105   : > { %v5371_v2 = vmax.f32 %v5366_v0, 0.0 }
0x1107   : > { %v5372_v50 = vpack.c.bf16 %v5371_v2, %v5371_v2 }
0x1109   : > { %6867 = vmatmul.mubr.msk.bf16.vlgmr.msra.gmra.mxu1 %vm402_vm8, %v5372_v50 }
0x110a   : > { %6727 = vmatpush3.bf16.msra.mxu1 %v7669_v25 }
0x110b   : > { %6728 = vmatprep.subr.bf16.mxu1 %v7670_v53 }
0x110d   : > { %v6764_v51 = vpop.f32.mrf.mxu0 }
0x110e   : > { %6729 = vmatpush3.bf16.msra.mxu1 %v7671_v19 }
0x110f   : > { %v6765_v52 = vpop.f32.mrf.mxu0  ;;  %6730 = vmatprep.subr.bf16.mxu1 %v7672_v16 }
0x1110   : > { %v8361_v54 = vadd.f32 %v6765_v52, %v6764_v51 }
0x1111   : > { %v6767_v55 = vpop.f32.mrf.mxu0 }
0x1112   : > { %6731 = vmatpush3.bf16.msra.mxu1 %v7673_v22 }
0x1113   : > { %v6768_v39 = vpop.f32.mrf.mxu0  ;;  %6732 = vmatprep.subr.bf16.mxu1 %v7674_v58 }
0x1116   : > { %6733 = vmatpush3.bf16.msra.mxu1 %v7675_v27 }
0x1117   : > { %6734 = vmatprep.subr.bf16.mxu1 %v7676_v14 }
0x111a   : > { %6735 = vmatpush3.bf16.msra.mxu1 %v7677_v29 }
0x111b   : > { %6736 = vmatprep.subr.bf16.mxu1 %v7678_v30 }
0x111e   : > { %6737 = vmatpush3.bf16.msra.mxu1 %v7679_v31 }
0x111f   : > { %6738 = vmatprep.subr.bf16.mxu1 %v7680_v32 }
0x1122   : > { %6739 = vmatpush3.bf16.msra.mxu1 %v7681_v33 }
0x1123   : > { %6740 = vmatprep.subr.bf16.mxu1 %v7682_v34 }
0x1126   : > { %6741 = vmatpush3.bf16.msra.mxu1 %v7683_v35 }
0x11c9   : > { %v5427_v57 = vpop.f32.mrf.mxu1 }
0x11ca   : > { %v5428_v59 = vadd.f32 %v5427_v57, %v5377_v7  ;;  %v5565_v7 = vld [vmem:[#allocation5 + $0x21] ss:$0 sm:$0xff] }
0x11cb   : > { %v6868_v60 = vpop.f32.mrf.mxu1 }
0x11cc   : > { %v5434_v61 = vsel %vm5433_vm3, %v5428_v59, -inf }
0x11cd   : > { %v5435_v62 = vrot.slane %v5434_v61, 4  ;;  %v5430_v9 = vpop.f32.mrf.mxu1 }
0x11cf   : > { %v5436_v63 = vmax.f32 %v5434_v61, %v5435_v62  ;;  %v6869_v1 = vpop.f32.mrf.mxu1 }
0x11d1   : > { %v5437_v3 = vrot.slane %v5436_v63, 2 }
0x11d3   : > { %v5438_v4 = vmax.f32 %v5436_v63, %v5437_v3 }
0x11d5   : > { %v5439_v6 = vrot.slane %v5438_v4, 1 }
0x11d7   : > { %v5440_v11 = vmax.f32 %v5438_v4, %v5439_v6 }
0x11d9   : > { %v5441_v13 = vsub.f32 %v5428_v59, %v5440_v11 }
0x11db   : > { %v5442_v15 = vmul.f32 1.442695, %v5441_v13 }
0x11dd   : > { %7684 = vpow2.f32 %v5442_v15 }
0x11ea   : > { %v7685_v5 = vpop.eup %7684 }
0x11eb   : > { %v5444_v10 = vsel %vm5433_vm3, %v7685_v5, 0.0  ;;  %5453 = vperm.xlu0 %6965, %v7685_v5  }
0x11ec   : > { %v5445_v37 = vrot.slane %v5444_v10, 4 }
0x11ee   : > { %v5446_v20 = vadd.f32 %v5445_v37, %v5444_v10 }
0x11f0   : > { %v5447_v24 = vrot.slane %v5446_v20, 2 }
0x11f2   : > { %v5448_v26 = vadd.f32 %v5447_v24, %v5446_v20 }
0x11f4   : > { %v5449_v28 = vrot.slane %v5448_v26, 1 }
0x11f6   : > { %v5450_v18 = vadd.f32 %v5449_v28, %v5448_v26 }
0x11f8   : > { %5474 = vperm.xlu1 %6966, %v5450_v18  }
0x1266   : > { %v5454_v36 = vpop.permute.xlu0 %5453 }
0x1267   : > { %v5456_v38 = vmul.f32 %v5454_v36, %v8344_v21  ;;  %v5457_v40 = vmul.f32 %v5454_v36, %v8349_v23 }
0x1269   : > { %v5458_v56 = vsel %vm223_vm1, %v5456_v38, 0.0  ;;  %v5465_v41 = vsel %vm223_vm1, %v5457_v40, 0.0  ;;  %vm5838_vm1 = vcmask 32768  }
0x126a   : > { %v5459_v42 = vrot.slane %v5458_v56, 4  ;;  %v5466_v8 = vrot.slane %v5465_v41, 4 }
0x126c   : > { %v5460_v43 = vadd.f32 %v5459_v42, %v5458_v56  ;;  %v5467_v12 = vadd.f32 %v5466_v8, %v5465_v41 }
0x126e   : > { %v5461_v45 = vrot.slane %v5460_v43, 2  ;;  %v5468_v46 = vrot.slane %v5467_v12, 2 }
0x1270   : > { %v5462_v47 = vadd.f32 %v5461_v45, %v5460_v43  ;;  %v5469_v48 = vadd.f32 %v5468_v46, %v5467_v12 }
0x1272   : > { %v5463_v0 = vrot.slane %v5462_v47, 1  ;;  %v5470_v49 = vrot.slane %v5469_v48, 1 }
0x1273   : > { %v5475_v44 = vpop.permute.xlu1 %5474 }
0x1274   : > { %7686 = vrcp.f32 %v5475_v44  ;;  %v5464_v21 = vadd.f32 %v5463_v0, %v5462_v47  ;;  %v5471_v23 = vadd.f32 %v5470_v49, %v5469_v48 }
0x1281   : > { %v7687_v2 = vpop.eup %7686 }
0x1282   : > { %v5479_v50 = vmul.f32 %v7687_v2, %v5471_v23  ;;  %v5478_v51 = vmul.f32 %v7687_v2, %v5464_v21 }
0x1284   : > { %v5498_v52 = vpack.c.bf16 %v5479_v50, %v5479_v50  ;;  %v5497_v55 = vpack.c.bf16 %v5478_v51, %v5478_v51 }
0x1286   : > { %5790 = vmatprep.mubr.bf16.mxu1 %v5498_v52 }
0x1287   : > { %5791 = vmatmul.mubr.bf16.vlgmr.msra.gmra.mxu1 %v5497_v55 }
0x1347   : > { %v6742_v39 = vpop.f32.mrf.mxu1 }
0x1349   : > { %v6743_v57 = vpop.f32.mrf.mxu1 }
0x134a   : > { %v6744_v59 = vadd.f32 %v6743_v57, %v6742_v39 }
0x134b   : > { %v6745_v60 = vpop.f32.mrf.mxu1 }
0x134c   : > { %v5793_v61 = vadd.f32 %v6744_v59, %v5565_v7 }
0x134d   : > { %v6746_v62 = vpop.f32.mrf.mxu1 }
0x134e   : > { %v5833_v9 = vadd.f32 %v8361_v54, %v5793_v61 }
0x1350   : > { %5839 = vst.msk [vmem:[%s192_s30] sm:$0x1] %vm5838_vm1, %v5833_v9 }
0x1351   : > { %7753 = shalt.err (!%p7750_p3)
}
0x1352   : > { %s7754_s17 = scalar_lea.hbm %s5851_s7, 16  ;;  %s7758_s24 = scalar_lea.hbm %s8407_s3, 32 }
0x1353   : > { %p7755_p2 = scmp.ne.s32.totalorder %s5851_s7, %s7754_s17  ;;  %p7759_p6 = scmp.lt.s32.totalorder %s5851_s7, %s8407_s3 }
0x1354   : > { %p7760_p9 = scmp.lt.s32.totalorder %s7758_s24, %s7754_s17 }
0x1355   : > { %p7756_p4 = pnand %p7755_p2, %p7881_p5 }
0x1356   : > { %p7761_p7 = por %p7760_p9, %p7759_p6 }
0x1357   : > { %p7757_p13 = pneg %p7756_p4 }
0x1359   : > { %p7762_p10 = pnand %p7761_p7, %p7757_p13 }
0x135b   : > { %7765 = shalt.err (!%p7762_p10)
}
0x135c   : > { %6878 = dma.vmem_to_hbm [thread:$0]  (%p7881_p5), %s5854_s4, 16, %s5851_s7, %s5841_s8  }
0x135d PF: > { %p6895_p12 = scmp.ge.s32.totalorder %s7808_s15, 2  ;;  %s5865_s27 = sand.u32 1, %s7796_s12  }
0x135e   : > { %p8437_p8 = scmp.ne.s32.totalorder %s8410_s23, 0  ;;  %s5866_s28 = scalar_lea.sflag [#allocation4], %s5865_s27 }
0x1360   : > { %p6888_p11 = pnand %p6895_p12, %p8437_p8 }
0x1362   : > { %p6889_p0 = pneg %p6888_p11 }
0x1364   : > { %7791 = dma.done.wait (%p6889_p0), %s5866_s28, 16  }
0x1365   : > { %7793 = vsyncadd (%p6889_p0), %s5866_s28, 4294967280  ;;  %p15_p1 = scmp.ge.s32.totalorder %s7868_s18, 4   ;;  %s8438_s12 = smov %s7800_s13 }
0x1366   : > { %s8439_s13 = smov %s7804_s14  ;;  %s8440_s14 = smov %s7879_s21 }
0x1367   : > { %s8441_s15 = smov %s7868_s18  ;;  %17 = sbr.rel (!%p15_p1) target bundleno = 5 (0x5), region = 81 }
0x136c   :  { %5870 = vsyncpa [#allocation3], 1 }
0x136d   :  { %5872 = vsyncpa [#allocation3 + $0x1], 1 }
0x136e   :  { %5873 = vsyncpa [#allocation6], 1 }
0x136f   :  { %5874 = vsyncpa [#allocation4], 1 }
0x1370   :  { %5876 = vsyncpa [#allocation4 + $0x1], 1 }

</bundles_post_ra>
